<compile_context>
chip_gen: v6e
topology: v6e:2x2x1
jax: 0.10.0
libtpu: 0.0.40
codegen_flags: <defaults>
</compile_context>

<pallas_src>
import functools

import jax
import jax.numpy as jnp
from jax.experimental import pallas as pl
from jax.experimental.pallas import tpu as pltpu

K = 7         # kernel size
PAD = 3       # "same" padding for 7x7
DATA_OFF = 8  # row offset of the image inside the padded scratch (8-aligned)
NCOL = 128    # lane-dense fc output width (>= num_classes)


# ---------------------------------------------------------------------------
# Fused kernel: conv1 -> ReLU -> conv2 -> ReLU -> global avg pool -> fc
# for `nb` samples per grid step, everything resident in VMEM.
# ---------------------------------------------------------------------------
def _fused_cnn_kernel(x_ref, t1_ref, b1_ref, t2_ref, b2_ref, wfb_ref, bf_ref,
                      out_ref, xp1_ref, xp2_ref, *, H, W, cin, c1, c2, nb):
    f32, bf16 = jnp.float32, jnp.bfloat16
    WCIN, WC1, WC2 = W * cin, W * c1, W * c2
    M = nb * H

    # Grid-invariant parameter reads, hoisted once (no repeated broadcasts).
    b1 = b1_ref[...]            # (1, W*c1)   f32
    b2 = b2_ref[...]            # (1, W*c2)   f32
    wfb = wfb_ref[...]          # (W*c2, 128) bf16  (pool + width-sum folded in)
    bf = bf_ref[...]            # (1, 128)    f32

    def conv7(xp_ref, rows_f32, t_ref, wc_in, wc_out):
        """Stride-1 / pad-3 7x7 conv of a (nb, H, wc_in) slab via 7 MXU taps."""
        # Zero only the halo rows the taps can read, then drop in the image.
        # (Re-done every grid step: scratch is per-core and the batch axis is
        #  "parallel", so a program_id==0 one-time init would be unsafe.)
        halo = jnp.zeros((nb, PAD, wc_in), f32)
        xp_ref[:, DATA_OFF - PAD:DATA_OFF, :] = halo
        xp_ref[:, DATA_OFF + H:DATA_OFF + H + PAD, :] = halo
        xp_ref[:, DATA_OFF:DATA_OFF + H, :] = rows_f32

        # 7 row taps, each one batched matmul over all nb samples, accumulated
        # in f32 on the MXU result path.
        acc = jnp.zeros((M, wc_out), f32)
        for kh in range(K):
            s = DATA_OFF - PAD + kh
            xk = xp_ref[:, s:s + H, :].reshape(M, wc_in).astype(bf16)
            acc = acc + jnp.dot(xk, t_ref[kh], preferred_element_type=f32)
        return acc

    # ---- layer 1: conv + bias + ReLU ---------------------------------------
    a1 = conv7(xp1_ref, x_ref[...].astype(f32), t1_ref, WCIN, WC1)
    a1 = jnp.maximum(a1 + b1, 0.0)                       # (M, W*c1) f32

    # ---- layer 2 ------------------------------------------------------------
    a2 = conv7(xp2_ref, a1.reshape(nb, H, WC1), t2_ref, WC1, WC2)
    a2 = jnp.maximum(a2 + b2, 0.0)                       # (M, W*c2) f32

    # ---- global avg pool + fc (1/(H*W) pool & width-sum folded into wfb) ---
    mm = jnp.dot(a2.astype(bf16), wfb, preferred_element_type=f32)   # (M, 128)
    pooled = jnp.sum(mm.reshape(nb, H, NCOL), axis=1)    # (nb, 128) height sum
    out_ref[...] = pooled + bf                           # one lane-dense store


# ---------------------------------------------------------------------------
# Weight preprocessing (wrapper side, tiny tensors):
# per-kh block-Toeplitz matrix turning the width/channel part of a stride-1,
# pad-3 conv into a single matmul on lane-dense (H, W*C) rows.
# ---------------------------------------------------------------------------
def _conv_row_toeplitz(w_oihw, W):
    cout, cin, Kh, Kw = w_oihw.shape
    w_hwio = jnp.transpose(w_oihw, (2, 3, 1, 0)).astype(jnp.float32)  # (K,K,ci,co)
    win = jnp.arange(W)[:, None]
    wout = jnp.arange(W)[None, :]
    kw = win - wout + PAD                                    # (Win, Wout)
    valid = (kw >= 0) & (kw < Kw)
    g = w_hwio[:, jnp.clip(kw, 0, Kw - 1)]                   # (K, Win, Wout, ci, co)
    g = jnp.where(valid[None, :, :, None, None], g, 0.0)
    g = jnp.transpose(g, (0, 1, 3, 2, 4))                    # (K, Win, ci, Wout, co)
    return g.reshape(Kh, W * cin, W * cout)                  # (K, W*ci, W*co)


# ---------------------------------------------------------------------------
# Full forward pass (accepts NCHW like the PyTorch module)
# ---------------------------------------------------------------------------
def cnn_kernel7x7_forward(x_nchw, params, samples_per_block=8):
    N, cin, H, W = x_nchw.shape
    c1 = params["conv1_w"].shape[0]
    c2 = params["conv2_w"].shape[0]
    ncls = params["fc_w"].shape[0]
    nb = min(samples_per_block, N)
    assert N % nb == 0, "batch must be divisible by samples_per_block"
    assert ncls <= NCOL

    # NCHW -> lane-dense rows (N, H, W*cin); bf16 is the MXU operand dtype.
    x_rows = jnp.transpose(x_nchw, (0, 2, 3, 1)).reshape(N, H, W * cin)
    x_rows = x_rows.astype(jnp.bfloat16)

    t1 = _conv_row_toeplitz(params["conv1_w"], W).astype(jnp.bfloat16)   # (7, W*cin, W*c1)
    t2 = _conv_row_toeplitz(params["conv2_w"], W).astype(jnp.bfloat16)   # (7, W*c1,  W*c2)
    b1_row = jnp.tile(params["conv1_b"], W).reshape(1, W * c1).astype(jnp.float32)
    b2_row = jnp.tile(params["conv2_b"], W).reshape(1, W * c2).astype(jnp.float32)
    # fold 1/(H*W) global-avg-pool and the width-sum into the fc weight,
    # zero-pad the class dimension to a lane-dense 128 columns
    wfb = jnp.tile(params["fc_w"].T, (W, 1)) / float(H * W)              # (W*c2, ncls)
    wfb = jnp.pad(wfb, ((0, 0), (0, NCOL - ncls))).astype(jnp.bfloat16)  # (W*c2, 128)
    bf = jnp.pad(params["fc_b"].reshape(1, ncls).astype(jnp.float32),
                 ((0, 0), (0, NCOL - ncls)))                             # (1, 128)

    HPAD = ((DATA_OFF + H + PAD + 7) // 8) * 8
    kernel = functools.partial(_fused_cnn_kernel, H=H, W=W, cin=cin,
                               c1=c1, c2=c2, nb=nb)
    out = pl.pallas_call(
        kernel,
        out_shape=jax.ShapeDtypeStruct((N, NCOL), jnp.float32),
        grid=(N // nb,),
        in_specs=[
            pl.BlockSpec((nb, H, W * cin), lambda i: (i, 0, 0)),
            pl.BlockSpec((K, W * cin, W * c1), lambda i: (0, 0, 0)),
            pl.BlockSpec((1, W * c1), lambda i: (0, 0)),
            pl.BlockSpec((K, W * c1, W * c2), lambda i: (0, 0, 0)),
            pl.BlockSpec((1, W * c2), lambda i: (0, 0)),
            pl.BlockSpec((W * c2, NCOL), lambda i: (0, 0)),
            pl.BlockSpec((1, NCOL), lambda i: (0, 0)),
        ],
        out_specs=pl.BlockSpec((nb, NCOL), lambda i: (i, 0)),
        scratch_shapes=[
            pltpu.VMEM((nb, HPAD, W * cin), jnp.float32),  # row-padded conv1 input
            pltpu.VMEM((nb, HPAD, W * c1), jnp.float32),   # row-padded conv2 input
        ],
        compiler_params=pltpu.CompilerParams(
            dimension_semantics=("parallel",)),
    )(x_rows, t1, b1_row, t2, b2_row, wfb, bf)
    return out[:, :ncls]


# ---------------------------------------------------------------------------
# Pure-JAX reference (for correctness check)
# ---------------------------------------------------------------------------
def reference_forward(x_nchw, params):
    dn = ("NCHW", "OIHW", "NCHW")
    x = jax.lax.conv_general_dilated(
        x_nchw, params["conv1_w"], (1, 1), [(PAD, PAD), (PAD, PAD)],
        dimension_numbers=dn, precision=jax.lax.Precision.HIGHEST)
    x = jax.nn.relu(x + params["conv1_b"][None, :, None, None])
    x = jax.lax.conv_general_dilated(
        x, params["conv2_w"], (1, 1), [(PAD, PAD), (PAD, PAD)],
        dimension_numbers=dn, precision=jax.lax.Precision.HIGHEST)
    x = jax.nn.relu(x + params["conv2_b"][None, :, None, None])
    x = jnp.mean(x, axis=(2, 3))                              # (N, 16)
    return x @ params["fc_w"].T + params["fc_b"]


def init_params(key, num_classes=10):
    ks = jax.random.split(key, 6)
    return {
        # PyTorch-shaped parameters (OIHW conv weights, (out,in) linear weight)
        "conv1_w": 0.1 * jax.random.normal(ks[0], (8, 3, K, K), jnp.float32),
        "conv1_b": 0.1 * jax.random.normal(ks[1], (8,), jnp.float32),
        "conv2_w": 0.1 * jax.random.normal(ks[2], (16, 8, K, K), jnp.float32),
        "conv2_b": 0.1 * jax.random.normal(ks[3], (16,), jnp.float32),
        "fc_w": 0.1 * jax.random.normal(ks[4], (num_classes, 16), jnp.float32),
        "fc_b": 0.1 * jax.random.normal(ks[5], (num_classes,), jnp.float32),
    }


if __name__ == "__main__":
    key = jax.random.PRNGKey(0)
    k_x, k_p = jax.random.split(key)
    # NCHW input like the PyTorch module; batch 16 -> 2 grid steps of nb=8
    # samples each (even grid for v7x's two TensorCores, M = 128 per matmul).
    x = jax.random.normal(k_x, (16, 3, 16, 16), jnp.float32)
    params = init_params(k_p, num_classes=10)

    out = jax.block_until_ready(cnn_kernel7x7_forward(x, params))
    ref = jax.block_until_ready(reference_forward(x, params))

    assert out.shape == (16, 10) and out.dtype == jnp.float32
    # bf16 MXU operands vs HIGHEST-precision f32 reference -> loosened tolerance
    assert jnp.allclose(out, ref, atol=3e-2, rtol=3e-2), (
        f"max abs diff {jnp.max(jnp.abs(out - ref))}")
    print("KERNEL_OK")
</pallas_src>

<mosaic_0001>
module attributes {stable_mosaic.version = 11 : i64} {
  func.func @_fused_cnn_kernel(%arg0: i32, %arg1: memref<8x16x48xbf16, #tpu.memory_space<vmem>>, %arg2: memref<7x48x128xbf16, #tpu.memory_space<vmem>>, %arg3: memref<1x128xf32, #tpu.memory_space<vmem>>, %arg4: memref<7x128x256xbf16, #tpu.memory_space<vmem>>, %arg5: memref<1x256xf32, #tpu.memory_space<vmem>>, %arg6: memref<256x128xbf16, #tpu.memory_space<vmem>>, %arg7: memref<1x128xf32, #tpu.memory_space<vmem>>, %arg8: memref<8x128xf32, #tpu.memory_space<vmem>>, %arg9: memref<8x32x48xf32, #tpu.memory_space<vmem>>, %arg10: memref<8x32x128xf32, #tpu.memory_space<vmem>>) attributes {dimension_semantics = [#tpu.dimension_semantics<parallel>], iteration_bounds = array<i64: 2>, scalar_prefetch = 0 : i64, scratch_operands = 2 : i64, tpu.core_type = #tpu.core_type<tc>, window_params = [{transform_indices = @transform_0, window_bounds = array<i64: 8, 16, 48>}, {pipeline_mode = #tpu.pipeline_mode<synchronous>, transform_indices = @transform_1, window_bounds = array<i64: 7, 48, 128>}, {pipeline_mode = #tpu.pipeline_mode<synchronous>, transform_indices = @transform_2, window_bounds = array<i64: 1, 128>}, {pipeline_mode = #tpu.pipeline_mode<synchronous>, transform_indices = @transform_3, window_bounds = array<i64: 7, 128, 256>}, {pipeline_mode = #tpu.pipeline_mode<synchronous>, transform_indices = @transform_4, window_bounds = array<i64: 1, 256>}, {pipeline_mode = #tpu.pipeline_mode<synchronous>, transform_indices = @transform_5, window_bounds = array<i64: 256, 128>}, {pipeline_mode = #tpu.pipeline_mode<synchronous>, transform_indices = @transform_6, window_bounds = array<i64: 1, 128>}, {transform_indices = @transform_7, window_bounds = array<i64: 8, 128>}]} {
    %c0 = arith.constant 0 : index
    %c0_0 = arith.constant 0 : index
    %0 = vector.load %arg3[%c0, %c0_0] : memref<1x128xf32, #tpu.memory_space<vmem>>, vector<1x128xf32>
    %c0_1 = arith.constant 0 : index
    %c0_2 = arith.constant 0 : index
    %1 = vector.load %arg5[%c0_1, %c0_2] : memref<1x256xf32, #tpu.memory_space<vmem>>, vector<1x256xf32>
    %c0_3 = arith.constant 0 : index
    %c0_4 = arith.constant 0 : index
    %2 = vector.load %arg6[%c0_3, %c0_4] : memref<256x128xbf16, #tpu.memory_space<vmem>>, vector<256x128xbf16>
    %c0_5 = arith.constant 0 : index
    %c0_6 = arith.constant 0 : index
    %3 = vector.load %arg7[%c0_5, %c0_6] : memref<1x128xf32, #tpu.memory_space<vmem>>, vector<1x128xf32>
    %c0_7 = arith.constant 0 : index
    %c0_8 = arith.constant 0 : index
    %c0_9 = arith.constant 0 : index
    %4 = vector.load %arg1[%c0_7, %c0_8, %c0_9] : memref<8x16x48xbf16, #tpu.memory_space<vmem>>, vector<8x16x48xbf16>
    %5 = arith.extf %4 : vector<8x16x48xbf16> to vector<8x16x48xf32>
    %cst = arith.constant 0.000000e+00 : f32
    %6 = vector.broadcast %cst : f32 to vector<8x3x48xf32>
    %c0_10 = arith.constant 0 : index
    %c5 = arith.constant 5 : index
    %c0_11 = arith.constant 0 : index
    %7 = vector.load %arg9[%c0_10, %c5, %c0_11] : memref<8x32x48xf32, #tpu.memory_space<vmem>>, vector<8x3x48xf32>
    tpu.vector_store %arg9[%c0_10, %c5, %c0_11], %6 {strides = array<i32>} : memref<8x32x48xf32, #tpu.memory_space<vmem>>, vector<8x3x48xf32>,
    %c0_12 = arith.constant 0 : index
    %c24 = arith.constant 24 : index
    %c0_13 = arith.constant 0 : index
    %8 = vector.load %arg9[%c0_12, %c24, %c0_13] : memref<8x32x48xf32, #tpu.memory_space<vmem>>, vector<8x3x48xf32>
    tpu.vector_store %arg9[%c0_12, %c24, %c0_13], %6 {strides = array<i32>} : memref<8x32x48xf32, #tpu.memory_space<vmem>>, vector<8x3x48xf32>,
    %c0_14 = arith.constant 0 : index
    %c8 = arith.constant 8 : index
    %c0_15 = arith.constant 0 : index
    %9 = vector.load %arg9[%c0_14, %c8, %c0_15] : memref<8x32x48xf32, #tpu.memory_space<vmem>>, vector<8x16x48xf32>
    tpu.vector_store %arg9[%c0_14, %c8, %c0_15], %5 {strides = array<i32>} : memref<8x32x48xf32, #tpu.memory_space<vmem>>, vector<8x16x48xf32>,
    %cst_16 = arith.constant 0.000000e+00 : f32
    %10 = vector.broadcast %cst_16 : f32 to vector<128x128xf32>
    %c0_17 = arith.constant 0 : index
    %c5_18 = arith.constant 5 : index
    %c0_19 = arith.constant 0 : index
    %11 = vector.load %arg9[%c0_17, %c5_18, %c0_19] : memref<8x32x48xf32, #tpu.memory_space<vmem>>, vector<8x16x48xf32>
    %12 = vector.shape_cast %11 : vector<8x16x48xf32> to vector<128x48xf32>
    %13 = arith.truncf %12 : vector<128x48xf32> to vector<128x48xbf16>
    %c0_20 = arith.constant 0 : index
    %c0_21 = arith.constant 0 : index
    %c0_22 = arith.constant 0 : index
    %14 = vector.load %arg2[%c0_20, %c0_21, %c0_22] : memref<7x48x128xbf16, #tpu.memory_space<vmem>>, vector<1x48x128xbf16>
    %15 = vector.shape_cast %14 : vector<1x48x128xbf16> to vector<48x128xbf16>
    %cst_23 = arith.constant dense<0.000000e+00> : vector<128x128xf32>
    %16 = tpu.matmul %13, %15, %cst_23 {dimension_numbers = #tpu.dot_dimension_numbers<[1], [0], [0], [1], [0, 0, 1, 1], [], []>} : vector<128x48xbf16>, vector<48x128xbf16>, vector<128x128xf32> -> vector<128x128xf32>
    %17 = arith.addf %10, %16 : vector<128x128xf32>
    %c0_24 = arith.constant 0 : index
    %c6 = arith.constant 6 : index
    %c0_25 = arith.constant 0 : index
    %18 = vector.load %arg9[%c0_24, %c6, %c0_25] : memref<8x32x48xf32, #tpu.memory_space<vmem>>, vector<8x16x48xf32>
    %19 = vector.shape_cast %18 : vector<8x16x48xf32> to vector<128x48xf32>
    %20 = arith.truncf %19 : vector<128x48xf32> to vector<128x48xbf16>
    %c1 = arith.constant 1 : index
    %c0_26 = arith.constant 0 : index
    %c0_27 = arith.constant 0 : index
    %21 = vector.load %arg2[%c1, %c0_26, %c0_27] : memref<7x48x128xbf16, #tpu.memory_space<vmem>>, vector<1x48x128xbf16>
    %22 = vector.shape_cast %21 : vector<1x48x128xbf16> to vector<48x128xbf16>
    %cst_28 = arith.constant dense<0.000000e+00> : vector<128x128xf32>
    %23 = tpu.matmul %20, %22, %cst_28 {dimension_numbers = #tpu.dot_dimension_numbers<[1], [0], [0], [1], [0, 0, 1, 1], [], []>} : vector<128x48xbf16>, vector<48x128xbf16>, vector<128x128xf32> -> vector<128x128xf32>
    %24 = arith.addf %17, %23 : vector<128x128xf32>
    %c0_29 = arith.constant 0 : index
    %c7 = arith.constant 7 : index
    %c0_30 = arith.constant 0 : index
    %25 = vector.load %arg9[%c0_29, %c7, %c0_30] : memref<8x32x48xf32, #tpu.memory_space<vmem>>, vector<8x16x48xf32>
    %26 = vector.shape_cast %25 : vector<8x16x48xf32> to vector<128x48xf32>
    %27 = arith.truncf %26 : vector<128x48xf32> to vector<128x48xbf16>
    %c2 = arith.constant 2 : index
    %c0_31 = arith.constant 0 : index
    %c0_32 = arith.constant 0 : index
    %28 = vector.load %arg2[%c2, %c0_31, %c0_32] : memref<7x48x128xbf16, #tpu.memory_space<vmem>>, vector<1x48x128xbf16>
    %29 = vector.shape_cast %28 : vector<1x48x128xbf16> to vector<48x128xbf16>
    %cst_33 = arith.constant dense<0.000000e+00> : vector<128x128xf32>
    %30 = tpu.matmul %27, %29, %cst_33 {dimension_numbers = #tpu.dot_dimension_numbers<[1], [0], [0], [1], [0, 0, 1, 1], [], []>} : vector<128x48xbf16>, vector<48x128xbf16>, vector<128x128xf32> -> vector<128x128xf32>
    %31 = arith.addf %24, %30 : vector<128x128xf32>
    %c0_34 = arith.constant 0 : index
    %c8_35 = arith.constant 8 : index
    %c0_36 = arith.constant 0 : index
    %32 = vector.load %arg9[%c0_34, %c8_35, %c0_36] : memref<8x32x48xf32, #tpu.memory_space<vmem>>, vector<8x16x48xf32>
    %33 = vector.shape_cast %32 : vector<8x16x48xf32> to vector<128x48xf32>
    %34 = arith.truncf %33 : vector<128x48xf32> to vector<128x48xbf16>
    %c3 = arith.constant 3 : index
    %c0_37 = arith.constant 0 : index
    %c0_38 = arith.constant 0 : index
    %35 = vector.load %arg2[%c3, %c0_37, %c0_38] : memref<7x48x128xbf16, #tpu.memory_space<vmem>>, vector<1x48x128xbf16>
    %36 = vector.shape_cast %35 : vector<1x48x128xbf16> to vector<48x128xbf16>
    %cst_39 = arith.constant dense<0.000000e+00> : vector<128x128xf32>
    %37 = tpu.matmul %34, %36, %cst_39 {dimension_numbers = #tpu.dot_dimension_numbers<[1], [0], [0], [1], [0, 0, 1, 1], [], []>} : vector<128x48xbf16>, vector<48x128xbf16>, vector<128x128xf32> -> vector<128x128xf32>
    %38 = arith.addf %31, %37 : vector<128x128xf32>
    %c0_40 = arith.constant 0 : index
    %c9 = arith.constant 9 : index
    %c0_41 = arith.constant 0 : index
    %39 = vector.load %arg9[%c0_40, %c9, %c0_41] : memref<8x32x48xf32, #tpu.memory_space<vmem>>, vector<8x16x48xf32>
    %40 = vector.shape_cast %39 : vector<8x16x48xf32> to vector<128x48xf32>
    %41 = arith.truncf %40 : vector<128x48xf32> to vector<128x48xbf16>
    %c4 = arith.constant 4 : index
    %c0_42 = arith.constant 0 : index
    %c0_43 = arith.constant 0 : index
    %42 = vector.load %arg2[%c4, %c0_42, %c0_43] : memref<7x48x128xbf16, #tpu.memory_space<vmem>>, vector<1x48x128xbf16>
    %43 = vector.shape_cast %42 : vector<1x48x128xbf16> to vector<48x128xbf16>
    %cst_44 = arith.constant dense<0.000000e+00> : vector<128x128xf32>
    %44 = tpu.matmul %41, %43, %cst_44 {dimension_numbers = #tpu.dot_dimension_numbers<[1], [0], [0], [1], [0, 0, 1, 1], [], []>} : vector<128x48xbf16>, vector<48x128xbf16>, vector<128x128xf32> -> vector<128x128xf32>
    %45 = arith.addf %38, %44 : vector<128x128xf32>
    %c0_45 = arith.constant 0 : index
    %c10 = arith.constant 10 : index
    %c0_46 = arith.constant 0 : index
    %46 = vector.load %arg9[%c0_45, %c10, %c0_46] : memref<8x32x48xf32, #tpu.memory_space<vmem>>, vector<8x16x48xf32>
    %47 = vector.shape_cast %46 : vector<8x16x48xf32> to vector<128x48xf32>
    %48 = arith.truncf %47 : vector<128x48xf32> to vector<128x48xbf16>
    %c5_47 = arith.constant 5 : index
    %c0_48 = arith.constant 0 : index
    %c0_49 = arith.constant 0 : index
    %49 = vector.load %arg2[%c5_47, %c0_48, %c0_49] : memref<7x48x128xbf16, #tpu.memory_space<vmem>>, vector<1x48x128xbf16>
    %50 = vector.shape_cast %49 : vector<1x48x128xbf16> to vector<48x128xbf16>
    %cst_50 = arith.constant dense<0.000000e+00> : vector<128x128xf32>
    %51 = tpu.matmul %48, %50, %cst_50 {dimension_numbers = #tpu.dot_dimension_numbers<[1], [0], [0], [1], [0, 0, 1, 1], [], []>} : vector<128x48xbf16>, vector<48x128xbf16>, vector<128x128xf32> -> vector<128x128xf32>
    %52 = arith.addf %45, %51 : vector<128x128xf32>
    %c0_51 = arith.constant 0 : index
    %c11 = arith.constant 11 : index
    %c0_52 = arith.constant 0 : index
    %53 = vector.load %arg9[%c0_51, %c11, %c0_52] : memref<8x32x48xf32, #tpu.memory_space<vmem>>, vector<8x16x48xf32>
    %54 = vector.shape_cast %53 : vector<8x16x48xf32> to vector<128x48xf32>
    %55 = arith.truncf %54 : vector<128x48xf32> to vector<128x48xbf16>
    %c6_53 = arith.constant 6 : index
    %c0_54 = arith.constant 0 : index
    %c0_55 = arith.constant 0 : index
    %56 = vector.load %arg2[%c6_53, %c0_54, %c0_55] : memref<7x48x128xbf16, #tpu.memory_space<vmem>>, vector<1x48x128xbf16>
    %57 = vector.shape_cast %56 : vector<1x48x128xbf16> to vector<48x128xbf16>
    %cst_56 = arith.constant dense<0.000000e+00> : vector<128x128xf32>
    %58 = tpu.matmul %55, %57, %cst_56 {dimension_numbers = #tpu.dot_dimension_numbers<[1], [0], [0], [1], [0, 0, 1, 1], [], []>} : vector<128x48xbf16>, vector<48x128xbf16>, vector<128x128xf32> -> vector<128x128xf32>
    %59 = arith.addf %52, %58 : vector<128x128xf32>
    %60 = vector.broadcast %0 : vector<1x128xf32> to vector<128x128xf32>
    %61 = arith.addf %59, %60 : vector<128x128xf32>
    %cst_57 = arith.constant 0.000000e+00 : f32
    %62 = vector.broadcast %cst_57 : f32 to vector<128x128xf32>
    %63 = arith.maximumf %61, %62 : vector<128x128xf32>
    %64 = vector.shape_cast %63 : vector<128x128xf32> to vector<8x16x128xf32>
    %cst_58 = arith.constant 0.000000e+00 : f32
    %65 = vector.broadcast %cst_58 : f32 to vector<8x3x128xf32>
    %c0_59 = arith.constant 0 : index
    %c5_60 = arith.constant 5 : index
    %c0_61 = arith.constant 0 : index
    %66 = vector.load %arg10[%c0_59, %c5_60, %c0_61] : memref<8x32x128xf32, #tpu.memory_space<vmem>>, vector<8x3x128xf32>
    tpu.vector_store %arg10[%c0_59, %c5_60, %c0_61], %65 {strides = array<i32>} : memref<8x32x128xf32, #tpu.memory_space<vmem>>, vector<8x3x128xf32>,
    %c0_62 = arith.constant 0 : index
    %c24_63 = arith.constant 24 : index
    %c0_64 = arith.constant 0 : index
    %67 = vector.load %arg10[%c0_62, %c24_63, %c0_64] : memref<8x32x128xf32, #tpu.memory_space<vmem>>, vector<8x3x128xf32>
    tpu.vector_store %arg10[%c0_62, %c24_63, %c0_64], %65 {strides = array<i32>} : memref<8x32x128xf32, #tpu.memory_space<vmem>>, vector<8x3x128xf32>,
    %c0_65 = arith.constant 0 : index
    %c8_66 = arith.constant 8 : index
    %c0_67 = arith.constant 0 : index
    %68 = vector.load %arg10[%c0_65, %c8_66, %c0_67] : memref<8x32x128xf32, #tpu.memory_space<vmem>>, vector<8x16x128xf32>
    tpu.vector_store %arg10[%c0_65, %c8_66, %c0_67], %64 {strides = array<i32>} : memref<8x32x128xf32, #tpu.memory_space<vmem>>, vector<8x16x128xf32>,
    %cst_68 = arith.constant 0.000000e+00 : f32
    %69 = vector.broadcast %cst_68 : f32 to vector<128x256xf32>
    %c0_69 = arith.constant 0 : index
    %c5_70 = arith.constant 5 : index
    %c0_71 = arith.constant 0 : index
    %70 = vector.load %arg10[%c0_69, %c5_70, %c0_71] : memref<8x32x128xf32, #tpu.memory_space<vmem>>, vector<8x16x128xf32>
    %71 = vector.shape_cast %70 : vector<8x16x128xf32> to vector<128x128xf32>
    %72 = arith.truncf %71 : vector<128x128xf32> to vector<128x128xbf16>
    %c0_72 = arith.constant 0 : index
    %c0_73 = arith.constant 0 : index
    %c0_74 = arith.constant 0 : index
    %73 = vector.load %arg4[%c0_72, %c0_73, %c0_74] : memref<7x128x256xbf16, #tpu.memory_space<vmem>>, vector<1x128x256xbf16>
    %74 = vector.shape_cast %73 : vector<1x128x256xbf16> to vector<128x256xbf16>
    %cst_75 = arith.constant dense<0.000000e+00> : vector<128x256xf32>
    %75 = tpu.matmul %72, %74, %cst_75 {dimension_numbers = #tpu.dot_dimension_numbers<[1], [0], [0], [1], [0, 0, 1, 1], [], []>} : vector<128x128xbf16>, vector<128x256xbf16>, vector<128x256xf32> -> vector<128x256xf32>
    %76 = arith.addf %69, %75 : vector<128x256xf32>
    %c0_76 = arith.constant 0 : index
    %c6_77 = arith.constant 6 : index
    %c0_78 = arith.constant 0 : index
    %77 = vector.load %arg10[%c0_76, %c6_77, %c0_78] : memref<8x32x128xf32, #tpu.memory_space<vmem>>, vector<8x16x128xf32>
    %78 = vector.shape_cast %77 : vector<8x16x128xf32> to vector<128x128xf32>
    %79 = arith.truncf %78 : vector<128x128xf32> to vector<128x128xbf16>
    %c1_79 = arith.constant 1 : index
    %c0_80 = arith.constant 0 : index
    %c0_81 = arith.constant 0 : index
    %80 = vector.load %arg4[%c1_79, %c0_80, %c0_81] : memref<7x128x256xbf16, #tpu.memory_space<vmem>>, vector<1x128x256xbf16>
    %81 = vector.shape_cast %80 : vector<1x128x256xbf16> to vector<128x256xbf16>
    %cst_82 = arith.constant dense<0.000000e+00> : vector<128x256xf32>
    %82 = tpu.matmul %79, %81, %cst_82 {dimension_numbers = #tpu.dot_dimension_numbers<[1], [0], [0], [1], [0, 0, 1, 1], [], []>} : vector<128x128xbf16>, vector<128x256xbf16>, vector<128x256xf32> -> vector<128x256xf32>
    %83 = arith.addf %76, %82 : vector<128x256xf32>
    %c0_83 = arith.constant 0 : index
    %c7_84 = arith.constant 7 : index
    %c0_85 = arith.constant 0 : index
    %84 = vector.load %arg10[%c0_83, %c7_84, %c0_85] : memref<8x32x128xf32, #tpu.memory_space<vmem>>, vector<8x16x128xf32>
    %85 = vector.shape_cast %84 : vector<8x16x128xf32> to vector<128x128xf32>
    %86 = arith.truncf %85 : vector<128x128xf32> to vector<128x128xbf16>
    %c2_86 = arith.constant 2 : index
    %c0_87 = arith.constant 0 : index
    %c0_88 = arith.constant 0 : index
    %87 = vector.load %arg4[%c2_86, %c0_87, %c0_88] : memref<7x128x256xbf16, #tpu.memory_space<vmem>>, vector<1x128x256xbf16>
    %88 = vector.shape_cast %87 : vector<1x128x256xbf16> to vector<128x256xbf16>
    %cst_89 = arith.constant dense<0.000000e+00> : vector<128x256xf32>
    %89 = tpu.matmul %86, %88, %cst_89 {dimension_numbers = #tpu.dot_dimension_numbers<[1], [0], [0], [1], [0, 0, 1, 1], [], []>} : vector<128x128xbf16>, vector<128x256xbf16>, vector<128x256xf32> -> vector<128x256xf32>
    %90 = arith.addf %83, %89 : vector<128x256xf32>
    %c0_90 = arith.constant 0 : index
    %c8_91 = arith.constant 8 : index
    %c0_92 = arith.constant 0 : index
    %91 = vector.load %arg10[%c0_90, %c8_91, %c0_92] : memref<8x32x128xf32, #tpu.memory_space<vmem>>, vector<8x16x128xf32>
    %92 = vector.shape_cast %91 : vector<8x16x128xf32> to vector<128x128xf32>
    %93 = arith.truncf %92 : vector<128x128xf32> to vector<128x128xbf16>
    %c3_93 = arith.constant 3 : index
    %c0_94 = arith.constant 0 : index
    %c0_95 = arith.constant 0 : index
    %94 = vector.load %arg4[%c3_93, %c0_94, %c0_95] : memref<7x128x256xbf16, #tpu.memory_space<vmem>>, vector<1x128x256xbf16>
    %95 = vector.shape_cast %94 : vector<1x128x256xbf16> to vector<128x256xbf16>
    %cst_96 = arith.constant dense<0.000000e+00> : vector<128x256xf32>
    %96 = tpu.matmul %93, %95, %cst_96 {dimension_numbers = #tpu.dot_dimension_numbers<[1], [0], [0], [1], [0, 0, 1, 1], [], []>} : vector<128x128xbf16>, vector<128x256xbf16>, vector<128x256xf32> -> vector<128x256xf32>
    %97 = arith.addf %90, %96 : vector<128x256xf32>
    %c0_97 = arith.constant 0 : index
    %c9_98 = arith.constant 9 : index
    %c0_99 = arith.constant 0 : index
    %98 = vector.load %arg10[%c0_97, %c9_98, %c0_99] : memref<8x32x128xf32, #tpu.memory_space<vmem>>, vector<8x16x128xf32>
    %99 = vector.shape_cast %98 : vector<8x16x128xf32> to vector<128x128xf32>
    %100 = arith.truncf %99 : vector<128x128xf32> to vector<128x128xbf16>
    %c4_100 = arith.constant 4 : index
    %c0_101 = arith.constant 0 : index
    %c0_102 = arith.constant 0 : index
    %101 = vector.load %arg4[%c4_100, %c0_101, %c0_102] : memref<7x128x256xbf16, #tpu.memory_space<vmem>>, vector<1x128x256xbf16>
    %102 = vector.shape_cast %101 : vector<1x128x256xbf16> to vector<128x256xbf16>
    %cst_103 = arith.constant dense<0.000000e+00> : vector<128x256xf32>
    %103 = tpu.matmul %100, %102, %cst_103 {dimension_numbers = #tpu.dot_dimension_numbers<[1], [0], [0], [1], [0, 0, 1, 1], [], []>} : vector<128x128xbf16>, vector<128x256xbf16>, vector<128x256xf32> -> vector<128x256xf32>
    %104 = arith.addf %97, %103 : vector<128x256xf32>
    %c0_104 = arith.constant 0 : index
    %c10_105 = arith.constant 10 : index
    %c0_106 = arith.constant 0 : index
    %105 = vector.load %arg10[%c0_104, %c10_105, %c0_106] : memref<8x32x128xf32, #tpu.memory_space<vmem>>, vector<8x16x128xf32>
    %106 = vector.shape_cast %105 : vector<8x16x128xf32> to vector<128x128xf32>
    %107 = arith.truncf %106 : vector<128x128xf32> to vector<128x128xbf16>
    %c5_107 = arith.constant 5 : index
    %c0_108 = arith.constant 0 : index
    %c0_109 = arith.constant 0 : index
    %108 = vector.load %arg4[%c5_107, %c0_108, %c0_109] : memref<7x128x256xbf16, #tpu.memory_space<vmem>>, vector<1x128x256xbf16>
    %109 = vector.shape_cast %108 : vector<1x128x256xbf16> to vector<128x256xbf16>
    %cst_110 = arith.constant dense<0.000000e+00> : vector<128x256xf32>
    %110 = tpu.matmul %107, %109, %cst_110 {dimension_numbers = #tpu.dot_dimension_numbers<[1], [0], [0], [1], [0, 0, 1, 1], [], []>} : vector<128x128xbf16>, vector<128x256xbf16>, vector<128x256xf32> -> vector<128x256xf32>
    %111 = arith.addf %104, %110 : vector<128x256xf32>
    %c0_111 = arith.constant 0 : index
    %c11_112 = arith.constant 11 : index
    %c0_113 = arith.constant 0 : index
    %112 = vector.load %arg10[%c0_111, %c11_112, %c0_113] : memref<8x32x128xf32, #tpu.memory_space<vmem>>, vector<8x16x128xf32>
    %113 = vector.shape_cast %112 : vector<8x16x128xf32> to vector<128x128xf32>
    %114 = arith.truncf %113 : vector<128x128xf32> to vector<128x128xbf16>
    %c6_114 = arith.constant 6 : index
    %c0_115 = arith.constant 0 : index
    %c0_116 = arith.constant 0 : index
    %115 = vector.load %arg4[%c6_114, %c0_115, %c0_116] : memref<7x128x256xbf16, #tpu.memory_space<vmem>>, vector<1x128x256xbf16>
    %116 = vector.shape_cast %115 : vector<1x128x256xbf16> to vector<128x256xbf16>
    %cst_117 = arith.constant dense<0.000000e+00> : vector<128x256xf32>
    %117 = tpu.matmul %114, %116, %cst_117 {dimension_numbers = #tpu.dot_dimension_numbers<[1], [0], [0], [1], [0, 0, 1, 1], [], []>} : vector<128x128xbf16>, vector<128x256xbf16>, vector<128x256xf32> -> vector<128x256xf32>
    %118 = arith.addf %111, %117 : vector<128x256xf32>
    %119 = vector.broadcast %1 : vector<1x256xf32> to vector<128x256xf32>
    %120 = arith.addf %118, %119 : vector<128x256xf32>
    %cst_118 = arith.constant 0.000000e+00 : f32
    %121 = vector.broadcast %cst_118 : f32 to vector<128x256xf32>
    %122 = arith.maximumf %120, %121 : vector<128x256xf32>
    %123 = arith.truncf %122 : vector<128x256xf32> to vector<128x256xbf16>
    %cst_119 = arith.constant dense<0.000000e+00> : vector<128x128xf32>
    %124 = tpu.matmul %123, %2, %cst_119 {dimension_numbers = #tpu.dot_dimension_numbers<[1], [0], [0], [1], [0, 0, 1, 1], [], []>} : vector<128x256xbf16>, vector<256x128xbf16>, vector<128x128xf32> -> vector<128x128xf32>
    %125 = vector.shape_cast %124 : vector<128x128xf32> to vector<8x16x128xf32>
    %cst_120 = arith.constant dense<0.000000e+00> : vector<8x128xf32>
    %126 = vector.multi_reduction <add>, %125, %cst_120 [1] : vector<8x16x128xf32> to vector<8x128xf32>
    %127 = vector.broadcast %3 : vector<1x128xf32> to vector<8x128xf32>
    %128 = arith.addf %126, %127 : vector<8x128xf32>
    %c0_121 = arith.constant 0 : index
    %c0_122 = arith.constant 0 : index
    %129 = vector.load %arg8[%c0_121, %c0_122] : memref<8x128xf32, #tpu.memory_space<vmem>>, vector<8x128xf32>
    tpu.vector_store %arg8[%c0_121, %c0_122], %128 {strides = array<i32>} : memref<8x128xf32, #tpu.memory_space<vmem>>, vector<8x128xf32>,
    return
  }
  func.func @transform_0(%arg0: i32) -> (i32, i32, i32) {
    %c0_i32 = arith.constant 0 : i32
    %c0_i32_0 = arith.constant 0 : i32
    %c0_i32_1 = arith.constant 0 : i32
    return %arg0, %c0_i32, %c0_i32_0 : i32, i32, i32
  }
  func.func @transform_1(%arg0: i32) -> (i32, i32, i32) {
    %c0_i32 = arith.constant 0 : i32
    %c0_i32_0 = arith.constant 0 : i32
    %c0_i32_1 = arith.constant 0 : i32
    %c0_i32_2 = arith.constant 0 : i32
    return %c0_i32, %c0_i32_0, %c0_i32_1 : i32, i32, i32
  }
  func.func @transform_2(%arg0: i32) -> (i32, i32) {
    %c0_i32 = arith.constant 0 : i32
    %c0_i32_0 = arith.constant 0 : i32
    %c0_i32_1 = arith.constant 0 : i32
    return %c0_i32, %c0_i32_0 : i32, i32
  }
  func.func @transform_3(%arg0: i32) -> (i32, i32, i32) {
    %c0_i32 = arith.constant 0 : i32
    %c0_i32_0 = arith.constant 0 : i32
    %c0_i32_1 = arith.constant 0 : i32
    %c0_i32_2 = arith.constant 0 : i32
    return %c0_i32, %c0_i32_0, %c0_i32_1 : i32, i32, i32
  }
  func.func @transform_4(%arg0: i32) -> (i32, i32) {
    %c0_i32 = arith.constant 0 : i32
    %c0_i32_0 = arith.constant 0 : i32
    %c0_i32_1 = arith.constant 0 : i32
    return %c0_i32, %c0_i32_0 : i32, i32
  }
  func.func @transform_5(%arg0: i32) -> (i32, i32) {
    %c0_i32 = arith.constant 0 : i32
    %c0_i32_0 = arith.constant 0 : i32
    %c0_i32_1 = arith.constant 0 : i32
    return %c0_i32, %c0_i32_0 : i32, i32
  }
  func.func @transform_6(%arg0: i32) -> (i32, i32) {
    %c0_i32 = arith.constant 0 : i32
    %c0_i32_0 = arith.constant 0 : i32
    %c0_i32_1 = arith.constant 0 : i32
    return %c0_i32, %c0_i32_0 : i32, i32
  }
  func.func @transform_7(%arg0: i32) -> (i32, i32) {
    %c0_i32 = arith.constant 0 : i32
    %c0_i32_0 = arith.constant 0 : i32
    return %arg0, %c0_i32 : i32, i32
  }
}

</mosaic_0001>

<bundles_post_ra>
// kernel: tpu_custom_call.1
= control target key start
LH: loop header
LB: loop body
LE: loop exit
PB: predicated region body
PF: predicated region fallthrough
CT: control target
= control target key end

     0   :  { %s6226_s0 = inlined_call_operand.hbm [shape: bf16[16,16,48], index: 0, kind: input, shape index: {}]   ;;  %s6227_s1 = inlined_call_operand.hbm [shape: bf16[7,48,128], index: 1, kind: input, shape index: {}]   ;;  %s6228_s2 = inlined_call_operand.vmem [shape: f32[1,128], index: 2, kind: input, shape index: {}]   ;;  %s6229_s3 = inlined_call_operand.hbm [shape: bf16[7,128,256], index: 3, kind: input, shape index: {}]   ;;  %s6230_s4 = inlined_call_operand.vmem [shape: f32[1,256], index: 4, kind: input, shape index: {}]   ;;  %s6231_s5 = inlined_call_operand.hbm [shape: bf16[256,128], index: 5, kind: input, shape index: {}]   ;;  %s6232_s6 = inlined_call_operand.vmem [shape: f32[1,128], index: 6, kind: input, shape index: {}]   ;;  %s6233_s7 = inlined_call_operand.hbm [shape: f32[16,128], index: 7, kind: output, shape index: {}]  }
   0x1   :  { %6242 = sst [smem:[#allocation47_spill]] %s6227_s1 }
   0x2   :  { %12 = vsyncpa [#allocation5], 0 }
   0x3   :  { %14 = vsyncpa [#allocation5 + $0x1], 0 }
   0x4   :  { %15 = vsyncpa [#allocation8], 0 }
   0x5   :  { %16 = vsyncpa [#allocation11], 0 }
   0x6   :  { %17 = vsyncpa [#allocation6], 0 }
   0x7   :  { %19 = vsyncpa [#allocation6 + $0x1], 0  ;;  %s5167_s24 = smov 0   ;;  %s5169_s25 = smov 0  }
   0x8   :  { %s5171_s26 = smov 0   ;;  %s5173_s27 = smov 0  }
   0x9 LB: > { %s5188_s28 = sadd.s32 4294967295, %s5114_s27   ;;  %s4079_s29 = sadd.s32 4294967294, %s5114_s27   ;;  %s5114_s27 = sphi %s5173_s27, %s6365_s27   ;;  %s5110_s26 = sphi %s5171_s26, %s6364_s26   ;;  %s5106_s25 = sphi %s5169_s25, %s6363_s25   ;;  %s5102_s24 = sphi %s5167_s24, %s6362_s24  }
   0xa   : > { %p45_p0 = scmp.ne.s32.totalorder %s5106_s25, %s5102_s24  ;;  %p6235_p1 = scmp.eq.s32.totalorder %s5188_s28, 0 }
   0xb   : > { %p195_p2 = scmp.eq.s32.totalorder %s5188_s28, 1  ;;  %p201_p3 = scmp.eq.s32.totalorder %s4079_s29, 1 }
   0xc   : > { %p5197_p4 = por %p6235_p1, %p45_p0  ;;  %p4080_p5 = scmp.ge.s32.totalorder %s5114_s27, 1 }
   0xd   : > { %p5202_p6 = por %p201_p3, %p45_p0  ;;  %p208_p7 = scmp.lt.s32.totalorder %s5114_s27, 3 }
   0xe   : > { %s6243_s30 = scalar_select %p5197_p4, 1, 0 }
   0xf   : > { %s6244_s8 = scalar_select %p5202_p6, 1, 0 }
  0x10   : > { %p5207_p8 = pnand %p4080_p5, %p208_p7  ;;  %s5116_s10 = smov [#allocation7]  }
  0x11   : > { %s220_s11 = sshll.u32 %s5116_s10, 4  ;;  %s5117_s13 = smov [#allocation9]   ;;  %s221_s11 = int_to_ptr.vmem [resolvable:$true] %s220_s11 }
  0x12   : > { %s6245_s9 = scalar_select %p5207_p8, 1, 0 }
  0x13   : > { %p4664_p9 = pneg %p5207_p8  ;;  %s236_s14 = sshll.u32 %s5117_s13, 4  ;;  %s237_s14 = int_to_ptr.vmem [resolvable:$true] %s236_s14 }
  0x14   : > { %s4947_s15 = scalar_lea.vmem %s221_s11, 2688  ;;  %p4955_p5 = scmp.lt.s32.totalorder %s221_s11, %s221_s11 }
  0x15   : > { %p5216_p11 = pnand %p4664_p9, %p6235_p1  ;;  %p4948_p13 = scmp.ne.s32.totalorder %s221_s11, %s4947_s15 }
  0x16   : > { %p4956_p7 = scmp.lt.s32.totalorder %s4947_s15, %s4947_s15 }
  0x17   : > { %p4938_p12 = pneg %p5216_p11 }
  0x18   : > { %p4957_p10 = por %p4956_p7, %p4955_p5 }
  0x19   : > { %p4950_p0 = pnand %p4948_p13, %p4938_p12 }
  0x1b   : > { %p4951_p3 = pneg %p4950_p0 }
  0x1d   : > { %p4958_p9 = pnand %p4957_p10, %p4951_p3 }
  0x1f   : > { %4961 = shalt.err (!%p4958_p9)
}
  0x20   : > { %s6234_s16 = smov 64   ;;  %s6236_s17 = smov 4  }
  0x21   : > { %s6247_s1 = sld [smem:[#allocation47_spill]]  ;;  %s4973_s20 = scalar_lea.vmem %s237_s14, 14336 }
  0x22   : > { %p4974_p13 = scmp.ne.s32.totalorder %s237_s14, %s4973_s20  ;;  %p4981_p10 = scmp.lt.s32.totalorder %s237_s14, %s237_s14 }
  0x23   : > { %p4982_p3 = scmp.lt.s32.totalorder %s4973_s20, %s4973_s20 }
  0x24   : > { %p4976_p0 = pnand %p4974_p13, %p4938_p12 }
  0x25   : > { %p4983_p7 = por %p4982_p3, %p4981_p10 }
  0x26   : > { %p4977_p5 = pneg %p4976_p0 }
  0x27   : > { %4667 = dma.hbm_to_vmem [thread:$0]  (!%p5216_p11), %s6247_s1, 2688, %s221_s11, [#allocation8], %s6234_s16, %s6234_s16, %s6236_s17  }
  0x28   : > { %p4984_p9 = pnand %p4983_p7, %p4977_p5 }
  0x2a   : > { %4987 = shalt.err (!%p4984_p9)
}
  0x2b   : > { %s5120_s21 = smov 128   ;;  %s5121_s22 = smov 8  }
  0x2c   : > { %4670 = dma.hbm_to_vmem [thread:$0]  (!%p5216_p11), %s6229_s3, 14336, %s237_s14, [#allocation8], %s5120_s21, %s5120_s21, %s5121_s22  }
  0x2d   : > { %s5122_s10 = smov [#allocation10]   ;;  %s5242_s13 = sadd.s32 1, %s5114_s27  }
  0x2e   : > { %s252_s11 = sshll.u32 %s5122_s10, 4  ;;  %s253_s11 = int_to_ptr.vmem [resolvable:$true] %s252_s11 }
  0x2f   : > { %s4999_s15 = scalar_lea.vmem %s253_s11, 2048  ;;  %p5007_p10 = scmp.lt.s32.totalorder %s253_s11, %s253_s11 }
  0x30   : > { %p5000_p13 = scmp.ne.s32.totalorder %s253_s11, %s4999_s15  ;;  %p5008_p3 = scmp.lt.s32.totalorder %s4999_s15, %s4999_s15 }
  0x32   : > { %p5002_p0 = pnand %p5000_p13, %p4938_p12  ;;  %p5009_p7 = por %p5008_p3, %p5007_p10 }
  0x34   : > { %p5003_p5 = pneg %p5002_p0 }
  0x36   : > { %p5010_p9 = pnand %p5009_p7, %p5003_p5 }
  0x38   : > { %5013 = shalt.err (!%p5010_p9)
}
  0x39   : > { %4673 = dma.hbm_to_vmem [thread:$0]  (!%p5216_p11), %s6231_s5, 2048, %s253_s11, [#allocation11], %s6234_s16, %s6234_s16, %s6236_s17  }
  0x3a   : > { %s29_s19 = ssub.s32 %s5114_s27, %s5242_s13  ;;  %s32_s12 = sadd.s32 1, %s5110_s26 }
  0x3b   : > { %p30_p12 = scmp.eq.s32.totalorder %s29_s19, 0  ;;  %p39_p13 = scmp.ne.s32.totalorder %s5110_s26, %s5106_s25 }
  0x3c   : > { %p40_p0 = scmp.eq.s32.totalorder %s5114_s27, 0  ;;  %p4685_p5 = scmp.lt.s32.totalorder %s5114_s27, 2 }
  0x3d   : > { %s5263_s20 = scalar_select %p30_p12, %s5110_s26, %s32_s12  }
  0x3e   : > { %p41_p10 = por %p40_p0, %p39_p13  ;;  %p5267_p3 = por %p195_p2, %p39_p13 }
  0x3f   : > { %s269_s22 = sand.u32 1, %s5110_s26   ;;  %s4307_s23 = sshll.u32 %s5114_s27, 10 }
  0x40   : > { %s6248_s21 = scalar_select %p5267_p3, 1, 0 }
  0x41   : > { %s4085_s29 = sshll.u32 %s269_s22, 6  ;;  %s5276_s11 = scalar_lea.hbm %s6226_s0, %s4307_s23 }
  0x42   : > { %s273_s14 = scalar_lea.vmem [#allocation4], %s4085_s29  ;;  %p5278_p11 = pnand %p4685_p5, %p41_p10 }
  0x43   : > { %s281_s18 = sshll.u32 %s273_s14, 4  ;;  %s5284_s12 = scalar_lea.sflag [#allocation5], %s269_s22  ;;  %s5282_s18 = int_to_ptr.vmem [resolvable:$true] %s281_s18 }
  0x44   : > { %s5014_s16 = scalar_lea.hbm %s5276_s11, 1024  ;;  %p5016_p7 = pneg %p5278_p11 }
  0x45   : > { %p5015_p2 = scmp.ne.s32.totalorder %s5276_s11, %s5014_s16  ;;  %s5019_s29 = scalar_lea.hbm %s6226_s0, 2048 }
  0x46   : > { %p5020_p13 = scmp.lt.s32.totalorder %s5276_s11, %s6226_s0  ;;  %p5021_p0 = scmp.lt.s32.totalorder %s5019_s29, %s5014_s16 }
  0x47   : > { %p5017_p9 = pnand %p5016_p7, %p5015_p2 }
  0x48   : > { %p5022_p5 = por %p5021_p0, %p5020_p13 }
  0x49   : > { %p5018_p12 = pneg %p5017_p9 }
  0x4b   : > { %p5023_p10 = pnand %p5022_p5, %p5018_p12 }
  0x4d   : > { %5026 = shalt.err (!%p5023_p10)
}
  0x4e   : > { %s5027_s22 = scalar_lea.vmem %s5282_s18, 1024  ;;  %s5123_s17 = smov [#allocation4]  }
  0x4f   : > { %p5028_p1 = scmp.ne.s32.totalorder %s5282_s18, %s5027_s22  ;;  %s5032_s1 = sshll.u32 %s5123_s17, 4  ;;  %s5033_s1 = int_to_ptr.vmem [resolvable:$false] %s5032_s1 }
  0x50   : > { %s5034_s23 = scalar_lea.vmem %s5033_s1, 2048  ;;  %p5035_p9 = scmp.lt.s32.totalorder %s5282_s18, %s5033_s1 }
  0x51   : > { %p5030_p6 = pnand %p5028_p1, %p5016_p7  ;;  %p5036_p3 = scmp.lt.s32.totalorder %s5034_s23, %s5027_s22 }
  0x53   : > { %p5031_p2 = pneg %p5030_p6  ;;  %p5037_p4 = por %p5036_p3, %p5035_p9 }
  0x55   : > { %p5038_p8 = pnand %p5037_p4, %p5031_p2 }
  0x57   : > { %5041 = shalt.err (!%p5038_p8)
}
  0x58   : > { %s6250_s16 = smov 4   ;;  %s6251_s10 = smov 64  }
  0x59   : > { %4677 = dma.hbm_to_vmem [thread:$0]  (!%p5278_p11), %s5276_s11, 1024, %s5282_s18, %s5284_s12, %s6251_s10, %s6251_s10, %s6250_s16  }
  0x5a   : > { %p6252_p1 = scmp.ne.s32.totalorder %s6245_s9, 0 }
  0x5c   : > { %293 = sbr.rel (%p6252_p1) target bundleno = 1125 (0x465), region = 48 }
  0x61   : > { %s5311_s17 = sand.u32 1, %s5106_s25   ;;  %p6253_p4 = scmp.ne.s32.totalorder %s6243_s30, 0 }
  0x62   : > { %s4090_s1 = sshll.u32 %s5311_s17, 6  ;;  %s296_s29 = scalar_lea.sflag [#allocation5], %s5311_s17 }
  0x63   : > { %s5315_s15 = scalar_lea.vmem [#allocation4], %s4090_s1 }
  0x64   : > { %5085 = dma.done.wait (%p6253_p4), %s296_s29, 1024  }
  0x65   : > { %5087 = vsyncadd (%p6253_p4), %s296_s29, 4294966272  ;;  %p6254_p6 = scmp.eq.s32.totalorder %s5188_s28, 0 }
  0x67   : > { %5089 = dma.done.wait (%p6254_p6), [#allocation8], 17024   ;;  %p6255_p8 = pmov %p6254_p6 }
  0x68   : > { %p6256_p3 = pmov %p6254_p6 }
  0x69   : > { %5091 = vsyncadd (%p6255_p8), [#allocation8], 4294950272 }
  0x6a   : > { %5093 = dma.done.wait (%p6256_p3), [#allocation11], 2048   ;;  %p6257_p11 = pmov %p6256_p3 }
  0x6b   : > { %vm411_vm0 = vcmask 387072   ;;  %v5124_v0 = vmov 0.0   ;;  %v4731_v1 = vld [vmem:[#allocation7 + $0x28] sm:$0xff]   ;;  %v4732_v2 = vld [vmem:[#allocation7 + $0x20] sm:$0xff]   ;;  %v4733_v3 = vld [vmem:[#allocation7 + $0x18] sm:$0xff]   ;;  %vm428_vm1 = vcmask 392192  }
  0x6c   : > { %5095 = vsyncadd (%p6257_p11), [#allocation11], 4294965248  ;;  %412 = vst.msk [vmem:[#allocation2 + $0x5] sm:$0x7] %vm411_vm0, %v5124_v0  ;;  %4488 = vmatprep.subr.bf16.mxu0 %v4731_v1  ;;  %4642 = vmatprep.subr.bf16.mxu1 %v4731_v1  ;;  %v4309_v4 = vld [vmem:[%s5315_s15] sm:$0xff]   ;;  %v4340_v6 = vld [vmem:[%s5315_s15 + $0x8] sm:$0xff]  }
  0x6d   : > { %413 = vst.msk [vmem:[#allocation2 + $0x25] sm:$0x7] %vm411_vm0, %v5124_v0  ;;  %414 = vst.msk [vmem:[#allocation2 + $0x45] sm:$0x7] %vm411_vm0, %v5124_v0  ;;  %4489 = vmatpush3.bf16.msra.mxu0 %v4731_v1  ;;  %4645 = vmatpush3.bf16.msra.mxu1 %v4731_v1  ;;  %v4343_v5 = vld [vmem:[%s5315_s15 + $0x20] sm:$0xff]   ;;  %v4310_v7 = vunpack.c.l.bf16 %v4309_v4  ;;  %v4311_v8 = vunpack.c.h.bf16 %v4309_v4  ;;  %v4344_v11 = vld [vmem:[%s5315_s15 + $0x28] sm:$0xff]   ;;  %v4314_v12 = vunpack.c.l.bf16 %v4340_v6  ;;  %v4315_v13 = vunpack.c.h.bf16 %v4340_v6 }
  0x6e   : > { %415 = vst.msk [vmem:[#allocation2 + $0x65] sm:$0x7] %vm411_vm0, %v5124_v0  ;;  %416 = vst.msk [vmem:[#allocation2 + $0x85] sm:$0x7] %vm411_vm0, %v5124_v0  ;;  %4490 = vmatprep.subr.bf16.mxu0 %v4732_v2  ;;  %4643 = vmatprep.subr.bf16.mxu1 %v4732_v2  ;;  %v4326_v9 = vunpack.c.l.bf16 %v4343_v5  ;;  %v4327_v10 = vunpack.c.h.bf16 %v4343_v5  ;;  %v4330_v14 = vunpack.c.l.bf16 %v4344_v11  ;;  %v4331_v15 = vunpack.c.h.bf16 %v4344_v11  ;;  %v4734_v16 = vld [vmem:[#allocation7 + $0x10] sm:$0xff]   ;;  %v4735_v17 = vld [vmem:[#allocation7 + $0x40] sm:$0xff]  }
  0x6f   : > { %417 = vst.msk [vmem:[#allocation2 + $0xa5] sm:$0x7] %vm411_vm0, %v5124_v0  ;;  %418 = vst.msk [vmem:[#allocation2 + $0xc5] sm:$0x7] %vm411_vm0, %v5124_v0  ;;  %v4341_v18 = vld [vmem:[%s5315_s15 + $0x10] sm:$0xff]   ;;  %v4342_v24 = vld [vmem:[%s5315_s15 + $0x18] sm:$0xff]  }
  0x70   : > { %419 = vst.msk [vmem:[#allocation2 + $0xe5] sm:$0x7] %vm411_vm0, %v5124_v0  ;;  %420 = vst.msk [vmem:[#allocation2 + $0x18] sm:$0x7] %vm411_vm0, %v5124_v0  ;;  %v4345_v19 = vld [vmem:[%s5315_s15 + $0x30] sm:$0xff]   ;;  %v4318_v20 = vunpack.c.l.bf16 %v4341_v18  ;;  %v4319_v21 = vunpack.c.h.bf16 %v4341_v18  ;;  %v4346_v25 = vld [vmem:[%s5315_s15 + $0x38] sm:$0xff]   ;;  %v4322_v26 = vunpack.c.l.bf16 %v4342_v24  ;;  %v4323_v27 = vunpack.c.h.bf16 %v4342_v24 }
  0x71   : > { %421 = vst.msk [vmem:[#allocation2 + $0x38] sm:$0x7] %vm411_vm0, %v5124_v0  ;;  %422 = vst.msk [vmem:[#allocation2 + $0x58] sm:$0x7] %vm411_vm0, %v5124_v0  ;;  %4491 = vmatpush3.bf16.msra.mxu0 %v4732_v2  ;;  %4646 = vmatpush3.bf16.msra.mxu1 %v4732_v2  ;;  %v4334_v22 = vunpack.c.l.bf16 %v4345_v19  ;;  %v4335_v23 = vunpack.c.h.bf16 %v4345_v19  ;;  %v4338_v28 = vunpack.c.l.bf16 %v4346_v25  ;;  %v4339_v29 = vunpack.c.h.bf16 %v4346_v25  ;;  %v4737_v41 = vld [vmem:[#allocation7 + $0x38] sm:$0xff]   ;;  %v4736_v43 = vld [vmem:[#allocation7 + $0x8] sm:$0xff]  }
  0x72   : > { %423 = vst.msk [vmem:[#allocation2 + $0x78] sm:$0x7] %vm411_vm0, %v5124_v0  ;;  %424 = vst.msk [vmem:[#allocation2 + $0x98] sm:$0x7] %vm411_vm0, %v5124_v0  ;;  %4492 = vmatprep.subr.bf16.mxu0 %v4733_v3  ;;  %4644 = vmatprep.subr.bf16.mxu1 %v4733_v3  ;;  %v4739_v54 = vld [vmem:[#allocation7 + $0x30] sm:$0xff]   ;;  %v4738_v55 = vld [vmem:[#allocation7] sm:$0xff]  }
  0x73   : > { %425 = vst.msk [vmem:[#allocation2 + $0xb8] sm:$0x7] %vm411_vm0, %v5124_v0  ;;  %426 = vst.msk [vmem:[#allocation2 + $0xd8] sm:$0x7] %vm411_vm0, %v5124_v0  ;;  %v4741_v1 = vld [vmem:[#allocation7 + $0x70] sm:$0xff]   ;;  %v4743_v18 = vld [vmem:[#allocation7 + $0x68] sm:$0xff]  }
  0x74   : > { %427 = vst.msk [vmem:[#allocation2 + $0xf8] sm:$0x7] %vm411_vm0, %v5124_v0  ;;  %1752 = vst [vmem:[#allocation3 + $0x5] sm:$0x7] %v5124_v0  ;;  %v4745_v24 = vld [vmem:[#allocation7 + $0x60] sm:$0xff]   ;;  %v4744_v25 = vld [vmem:[#allocation7 + $0x48] sm:$0xff]  }
  0x75   : > { %1753 = vst [vmem:[#allocation3 + $0x25] sm:$0x7] %v5124_v0  ;;  %1754 = vst [vmem:[#allocation3 + $0x45] sm:$0x7] %v5124_v0  ;;  %4493 = vmatpush3.bf16.msra.mxu0 %v4733_v3  ;;  %4647 = vmatpush3.bf16.msra.mxu1 %v4733_v3  ;;  %s4094_s14 = sshll.u32 %s5311_s17, 3  ;;  %vm3944_vm2 = vcmask 1041409  }
  0x76   : > { %1755 = vst [vmem:[#allocation3 + $0x65] sm:$0x7] %v5124_v0  ;;  %1756 = vst [vmem:[#allocation3 + $0x85] sm:$0x7] %v5124_v0  ;;  %4510 = vmatprep.subr.bf16.mxu1 %v4734_v16  ;;  %4532 = vmatprep.subr.bf16.mxu0 %v4735_v17  ;;  %vm3947_vm3 = vcmask 1042434   ;;  %vm3950_vm4 = vcmask 1043459  }
  0x77   : > { %1757 = vst [vmem:[#allocation3 + $0xa5] sm:$0x7] %v5124_v0  ;;  %1758 = vst [vmem:[#allocation3 + $0xc5] sm:$0x7] %v5124_v0  ;;  %vm3953_vm5 = vcmask 1044484   ;;  %vm3956_vm6 = vcmask 1045509  }
  0x78   : > { %1759 = vst [vmem:[#allocation3 + $0xe5] sm:$0x7] %v5124_v0  ;;  %1760 = vst [vmem:[#allocation3 + $0x18] sm:$0x7] %v5124_v0  ;;  %vm3959_vm7 = vcmask 1046534   ;;  %s4303_s22 = sshll.u32 %s5188_s28, 7 }
  0x79   : > { %1761 = vst [vmem:[#allocation3 + $0x38] sm:$0x7] %v5124_v0  ;;  %1762 = vst [vmem:[#allocation3 + $0x58] sm:$0x7] %v5124_v0  ;;  %s341_s23 = scalar_lea.vmem [#allocation12], %s4094_s14  ;;  %vm3962_vm8 = vcmask 1047559   ;;  %s6189_s29 = scalar_lea.hbm %s6233_s7, %s4303_s22 }
  0x7a   : > { %1763 = vst [vmem:[#allocation3 + $0x78] sm:$0x7] %v5124_v0  ;;  %1764 = vst [vmem:[#allocation3 + $0x98] sm:$0x7] %v5124_v0  ;;  %s3980_s16 = sshll.u32 %s341_s23, 4  ;;  %s3967_s15 = scalar_lea.sflag [#allocation6], %s5311_s17  ;;  %s3981_s16 = int_to_ptr.vmem [resolvable:$true] %s3980_s16 }
  0x7b   : > { %1765 = vst [vmem:[#allocation3 + $0xb8] sm:$0x7] %v5124_v0  ;;  %1766 = vst [vmem:[#allocation3 + $0xd8] sm:$0x7] %v5124_v0  ;;  %s5042_s30 = scalar_lea.vmem %s3981_s16, 128  ;;  %p6359_p12 = scmp.ne.s32.totalorder %s6248_s21, 0 }
  0x7c   : > { %1767 = vst [vmem:[#allocation3 + $0xf8] sm:$0x7] %v5124_v0  ;;  %429 = vst.msk [vmem:[#allocation2 + $0x8] sm:$0xff] %vm428_vm1, %v4310_v7  ;;  %v4740_v0 = vld [vmem:[#allocation7 + $0x58] sm:$0xff]   ;;  %p5043_p7 = scmp.ne.s32.totalorder %s3981_s16, %s5042_s30  ;;  %s5126_s28 = smov [#allocation12]  }
  0x7d   : > { %430 = vst.msk [vmem:[#allocation2 + $0x10] sm:$0xff] %vm428_vm1, %v4311_v8  ;;  %437 = vst.msk [vmem:[#allocation2 + $0x88] sm:$0xff] %vm428_vm1, %v4326_v9  ;;  %s5046_s9 = sshll.u32 %s5126_s28, 4  ;;  %s5047_s9 = int_to_ptr.vmem [resolvable:$false] %s5046_s9 }
  0x7e   : > { %438 = vst.msk [vmem:[#allocation2 + $0x90] sm:$0xff] %vm428_vm1, %v4327_v10  ;;  %431 = vst.msk [vmem:[#allocation2 + $0x28] sm:$0xff] %vm428_vm1, %v4314_v12  ;;  %p5044_p13 = pnand %p5043_p7, %p6359_p12  ;;  %s5048_s11 = scalar_lea.vmem %s5047_s9, 256 }
  0x7f   : > { %432 = vst.msk [vmem:[#allocation2 + $0x30] sm:$0xff] %vm428_vm1, %v4315_v13  ;;  %439 = vst.msk [vmem:[#allocation2 + $0xa8] sm:$0xff] %vm428_vm1, %v4330_v14  ;;  %v4742_v14 = vld [vmem:[#allocation7 + $0x50] sm:$0xff]   ;;  %p5049_p5 = scmp.lt.s32.totalorder %s3981_s16, %s5047_s9  ;;  %p5050_p10 = scmp.lt.s32.totalorder %s5048_s11, %s5042_s30 }
  0x80   : > { %440 = vst.msk [vmem:[#allocation2 + $0xb0] sm:$0xff] %vm428_vm1, %v4331_v15  ;;  %433 = vst.msk [vmem:[#allocation2 + $0x48] sm:$0xff] %vm428_vm1, %v4318_v20  ;;  %p5045_p0 = pneg %p5044_p13 }
  0x81   : > { %434 = vst.msk [vmem:[#allocation2 + $0x50] sm:$0xff] %vm428_vm1, %v4319_v21  ;;  %441 = vst.msk [vmem:[#allocation2 + $0xc8] sm:$0xff] %vm428_vm1, %v4334_v22  ;;  %p5051_p2 = por %p5050_p10, %p5049_p5 }
  0x82   : > { %442 = vst.msk [vmem:[#allocation2 + $0xd0] sm:$0xff] %vm428_vm1, %v4335_v23  ;;  %435 = vst.msk [vmem:[#allocation2 + $0x68] sm:$0xff] %vm428_vm1, %v4322_v26 }
  0x83   : > { %436 = vst.msk [vmem:[#allocation2 + $0x70] sm:$0xff] %vm428_vm1, %v4323_v27  ;;  %443 = vst.msk [vmem:[#allocation2 + $0xe8] sm:$0xff] %vm428_vm1, %v4338_v28  ;;  %v475_v30 = vld [vmem:[#allocation2 + $0x6] sm:$0xff]  ;;  %p5052_p9 = pnand %p5051_p2, %p5045_p0 }
  0x84   : > { %444 = vst.msk [vmem:[#allocation2 + $0xf0] sm:$0xff] %vm428_vm1, %v4339_v29  ;;  %v476_v31 = vld [vmem:[#allocation2 + $0xe] sm:$0xff]  ;;  %v483_v32 = vld [vmem:[#allocation2 + $0x86] sm:$0xff] }
  0x85   : > { %v491_v33 = vpack.c.bf16 %v476_v31, %v475_v30  ;;  %v484_v34 = vld [vmem:[#allocation2 + $0x8e] sm:$0xff]  ;;  %v477_v35 = vld [vmem:[#allocation2 + $0x26] sm:$0xff] }
  0x86   : > { %v478_v36 = vld [vmem:[#allocation2 + $0x2e] sm:$0xff]  ;;  %v495_v37 = vpack.c.bf16 %v484_v34, %v483_v32  ;;  %v485_v39 = vld [vmem:[#allocation2 + $0xa6] sm:$0xff] }
  0x87   : > { %v492_v38 = vpack.c.bf16 %v478_v36, %v477_v35  ;;  %v486_v40 = vld [vmem:[#allocation2 + $0xae] sm:$0xff]  ;;  %4494 = vmatprep.mubr.msk.bf16.mxu0 %vm428_vm1, %v491_v33  ;;  %v479_v44 = vld [vmem:[#allocation2 + $0x46] sm:$0xff] }
  0x88   : > { %v496_v42 = vpack.c.bf16 %v486_v40, %v485_v39  ;;  %4502 = vmatprep.mubr.msk.bf16.mxu1 %vm428_vm1, %v495_v37  ;;  %v480_v45 = vld [vmem:[#allocation2 + $0x4e] sm:$0xff]  ;;  %v487_v46 = vld [vmem:[#allocation2 + $0xc6] sm:$0xff] }
  0x89   : > { %4495 = vmatmul.mubr.msk.bf16.vlgmr.msra.gmra.mxu0 %vm428_vm1, %v492_v38  ;;  %v493_v47 = vpack.c.bf16 %v480_v45, %v479_v44  ;;  %v488_v48 = vld [vmem:[#allocation2 + $0xce] sm:$0xff]  ;;  %v481_v49 = vld [vmem:[#allocation2 + $0x66] sm:$0xff] }
  0x8a   : > { %4503 = vmatmul.mubr.msk.bf16.vlgmr.msra.gmra.mxu1 %vm428_vm1, %v496_v42  ;;  %4533 = vmatpush3.bf16.msra.mxu0 %v4735_v17  ;;  %v482_v50 = vld [vmem:[#allocation2 + $0x6e] sm:$0xff]  ;;  %v497_v51 = vpack.c.bf16 %v488_v48, %v487_v46  ;;  %v489_v52 = vld [vmem:[#allocation2 + $0xe6] sm:$0xff] }
  0x8b   : > { %4511 = vmatpush3.bf16.msra.mxu1 %v4734_v16  ;;  %v490_v53 = vld [vmem:[#allocation2 + $0xee] sm:$0xff]  ;;  %4534 = vmatprep.subr.bf16.mxu0 %v4737_v41  ;;  %v445_v56 = vld [vmem:[#allocation2 + $0x5] sm:$0xff]  ;;  %v494_v58 = vpack.c.bf16 %v482_v50, %v481_v49 }
  0x8c   : > { %4512 = vmatprep.subr.bf16.mxu1 %v4736_v43  ;;  %4498 = vmatprep.mubr.msk.bf16.mxu0 %vm428_vm1, %v493_v47  ;;  %v446_v57 = vld [vmem:[#allocation2 + $0xd] sm:$0xff]  ;;  %v498_v61 = vpack.c.bf16 %v490_v53, %v489_v52  ;;  %v447_v4 = vld [vmem:[#allocation2 + $0x25] sm:$0xff] }
  0x8d   : > { %4506 = vmatprep.mubr.msk.bf16.mxu1 %vm428_vm1, %v497_v51  ;;  %v784_v59 = vld [vmem:[#allocation2 + $0x7] sm:$0xff]  ;;  %v785_v60 = vld [vmem:[#allocation2 + $0xf] sm:$0xff]  ;;  %v461_v62 = vpack.c.bf16 %v446_v57, %v445_v56 }
  0x8e   : > { %4535 = vmatpush3.bf16.msra.mxu0 %v4737_v41  ;;  %v800_v63 = vpack.c.bf16 %v785_v60, %v784_v59  ;;  %v786_v2 = vld [vmem:[#allocation2 + $0x27] sm:$0xff]  ;;  %v787_v3 = vld [vmem:[#allocation2 + $0x2f] sm:$0xff] }
  0x8f   : > { %4513 = vmatpush3.bf16.msra.mxu1 %v4736_v43  ;;  %4536 = vmatprep.subr.bf16.mxu0 %v4739_v54  ;;  %v448_v5 = vld [vmem:[#allocation2 + $0x2d] sm:$0xff]  ;;  %v449_v6 = vld [vmem:[#allocation2 + $0x45] sm:$0xff]  ;;  %v801_v9 = vpack.c.bf16 %v787_v3, %v786_v2 }
  0x90   : > { %4514 = vmatprep.subr.bf16.mxu1 %v4738_v55  ;;  %v450_v7 = vld [vmem:[#allocation2 + $0x4d] sm:$0xff]  ;;  %v462_v11 = vpack.c.bf16 %v448_v5, %v447_v4  ;;  %v451_v15 = vld [vmem:[#allocation2 + $0x65] sm:$0xff]  ;;  %v4749_v4 = vld [vmem:[#allocation7 + $0x98] sm:$0xff]  }
  0x91   : > { %4499 = vmatmul.mubr.msk.bf16.gmra.mxu0 %vm428_vm1, %v494_v58  ;;  %v788_v8 = vld [vmem:[#allocation2 + $0x47] sm:$0xff]  ;;  %v789_v10 = vld [vmem:[#allocation2 + $0x4f] sm:$0xff]  ;;  %v463_v12 = vpack.c.bf16 %v450_v7, %v449_v6 }
  0x92   : > { %4507 = vmatmul.mubr.msk.bf16.gmra.mxu1 %vm428_vm1, %v498_v61  ;;  %4537 = vmatpush3.bf16.msra.mxu0 %v4739_v54  ;;  %v802_v13 = vpack.c.bf16 %v789_v10, %v788_v8  ;;  %v452_v16 = vld [vmem:[#allocation2 + $0x6d] sm:$0xff]  ;;  %v453_v20 = vld [vmem:[#allocation2 + $0x85] sm:$0xff] }
  0x93   : > { %4515 = vmatpush3.bf16.msra.mxu1 %v4738_v55  ;;  %4516 = vmatprep.mubr.msk.bf16.mxu1 %vm428_vm1, %v461_v62  ;;  %v790_v17 = vld [vmem:[#allocation2 + $0x67] sm:$0xff]  ;;  %v791_v19 = vld [vmem:[#allocation2 + $0x6f] sm:$0xff]  ;;  %v464_v27 = vpack.c.bf16 %v452_v16, %v451_v15  ;;  %v4750_v15 = vld [vmem:[#allocation7 + $0x78] sm:$0xff]  }
  0x94   : > { %4538 = vmatprep.mubr.msk.bf16.mxu0 %vm428_vm1, %v800_v63  ;;  %4554 = vmatprep.subr.bf16.mxu1 %v4740_v0  ;;  %v454_v21 = vld [vmem:[#allocation2 + $0x8d] sm:$0xff]  ;;  %v803_v26 = vpack.c.bf16 %v791_v19, %v790_v17  ;;  %v455_v32 = vld [vmem:[#allocation2 + $0xa5] sm:$0xff] }
  0x95   : > { %4576 = vmatprep.subr.bf16.mxu0 %v4741_v1  ;;  %v792_v22 = vld [vmem:[#allocation2 + $0x87] sm:$0xff]  ;;  %v793_v23 = vld [vmem:[#allocation2 + $0x8f] sm:$0xff]  ;;  %v465_v29 = vpack.c.bf16 %v454_v21, %v453_v20 }
  0x96   : > { %v804_v28 = vpack.c.bf16 %v793_v23, %v792_v22  ;;  %v794_v30 = vld [vmem:[#allocation2 + $0xa7] sm:$0xff]  ;;  %v795_v34 = vld [vmem:[#allocation2 + $0xaf] sm:$0xff] }
  0x97   : > { %v5383_v31 = vld [vmem:[#allocation7 + $0x88] sm:$0xff]   ;;  %v4747_v33 = vld [vmem:[#allocation7 + $0xa0] sm:$0xff]   ;;  %v805_v40 = vpack.c.bf16 %v795_v34, %v794_v30  ;;  %v1157_v49 = vld [vmem:[#allocation2 + $0x11] sm:$0xff] }
  0x98   : > { %v456_v35 = vld [vmem:[#allocation2 + $0xad] sm:$0xff]  ;;  %v457_v38 = vld [vmem:[#allocation2 + $0xc5] sm:$0xff] }
  0x99   : > { %4539 = vmatmul.mubr.msk.bf16.vlgmr.msra.gmra.mxu0 %vm428_vm1, %v801_v9  ;;  %v796_v36 = vld [vmem:[#allocation2 + $0xc7] sm:$0xff]  ;;  %v797_v37 = vld [vmem:[#allocation2 + $0xcf] sm:$0xff]  ;;  %v466_v41 = vpack.c.bf16 %v456_v35, %v455_v32 }
  0x9a   : > { %4517 = vmatmul.mubr.msk.bf16.vlgmr.msra.gmra.mxu1 %vm428_vm1, %v462_v11  ;;  %4577 = vmatpush3.bf16.msra.mxu0 %v4741_v1  ;;  %v458_v39 = vld [vmem:[#allocation2 + $0xcd] sm:$0xff]  ;;  %v806_v42 = vpack.c.bf16 %v797_v37, %v796_v36  ;;  %v459_v44 = vld [vmem:[#allocation2 + $0xe5] sm:$0xff] }
  0x9b   : > { %4555 = vmatpush3.bf16.msra.mxu1 %v4740_v0  ;;  %4520 = vmatprep.mubr.msk.bf16.mxu1 %vm428_vm1, %v463_v12  ;;  %v467_v43 = vpack.c.bf16 %v458_v39, %v457_v38  ;;  %v798_v45 = vld [vmem:[#allocation2 + $0xe7] sm:$0xff]  ;;  %v799_v46 = vld [vmem:[#allocation2 + $0xef] sm:$0xff] }
  0x9c   : > { %4542 = vmatprep.mubr.msk.bf16.mxu0 %vm428_vm1, %v802_v13  ;;  %4556 = vmatprep.subr.bf16.mxu1 %v4742_v14  ;;  %v460_v47 = vld [vmem:[#allocation2 + $0xed] sm:$0xff]  ;;  %v807_v52 = vpack.c.bf16 %v799_v46, %v798_v45  ;;  %v4748_v2 = vld [vmem:[#allocation7 + $0x80] sm:$0xff]  }
  0x9d   : > { %4578 = vmatprep.subr.bf16.mxu0 %v4743_v18  ;;  %v1156_v48 = vld [vmem:[#allocation2 + $0x9] sm:$0xff]  ;;  %v468_v53 = vpack.c.bf16 %v460_v47, %v459_v44  ;;  %v1159_v57 = vld [vmem:[#allocation2 + $0x31] sm:$0xff] }
  0x9e   : > { %4579 = vmatpush3.bf16.msra.mxu0 %v4743_v18  ;;  %v970_v50 = vld [vmem:[#allocation2 + $0x8] sm:$0xff]  ;;  %v971_v51 = vld [vmem:[#allocation2 + $0x10] sm:$0xff]  ;;  %v1172_v54 = vpack.c.bf16 %v1157_v49, %v1156_v48 }
  0x9f   : > { %4557 = vmatpush3.bf16.msra.mxu1 %v4742_v14  ;;  %4580 = vmatprep.subr.bf16.mxu0 %v4745_v24  ;;  %v986_v55 = vpack.c.bf16 %v971_v51, %v970_v50  ;;  %v1158_v56 = vld [vmem:[#allocation2 + $0x29] sm:$0xff]  ;;  %v1161_v63 = vld [vmem:[#allocation2 + $0x51] sm:$0xff] }
  0xa0   : > { %4558 = vmatprep.subr.bf16.mxu1 %v4744_v25  ;;  %v972_v58 = vld [vmem:[#allocation2 + $0x28] sm:$0xff]  ;;  %v973_v59 = vld [vmem:[#allocation2 + $0x30] sm:$0xff]  ;;  %v1173_v0 = vpack.c.bf16 %v1159_v57, %v1158_v56 }
  0xa1   : > { %4543 = vmatmul.mubr.msk.bf16.gmra.mxu0 %vm428_vm1, %v803_v26  ;;  %v974_v60 = vld [vmem:[#allocation2 + $0x48] sm:$0xff]  ;;  %v975_v61 = vld [vmem:[#allocation2 + $0x50] sm:$0xff]  ;;  %v987_v1 = vpack.c.bf16 %v973_v59, %v972_v58 }
  0xa2   : > { %4521 = vmatmul.mubr.msk.bf16.gmra.mxu1 %vm428_vm1, %v464_v27  ;;  %4546 = vmatprep.mubr.msk.bf16.mxu0 %vm428_vm1, %v804_v28  ;;  %v1160_v62 = vld [vmem:[#allocation2 + $0x49] sm:$0xff]  ;;  %v988_v3 = vpack.c.bf16 %v975_v61, %v974_v60  ;;  %v1163_v7 = vld [vmem:[#allocation2 + $0x71] sm:$0xff] }
  0xa3   : > { %4524 = vmatprep.mubr.msk.bf16.mxu1 %vm428_vm1, %v465_v29  ;;  %4559 = vmatpush3.bf16.msra.mxu1 %v4744_v25  ;;  %v1174_v5 = vpack.c.bf16 %v1161_v63, %v1160_v62  ;;  %v1162_v6 = vld [vmem:[#allocation2 + $0x69] sm:$0xff]  ;;  %v1165_v11 = vld [vmem:[#allocation2 + $0x91] sm:$0xff] }
  0xa4   : > { %4581 = vmatpush3.bf16.msra.mxu0 %v4745_v24  ;;  %4598 = vmatprep.subr.bf16.mxu1 %v5383_v31  ;;  %v976_v8 = vld [vmem:[#allocation2 + $0x68] sm:$0xff]  ;;  %v977_v9 = vld [vmem:[#allocation2 + $0x70] sm:$0xff]  ;;  %v1175_v16 = vpack.c.bf16 %v1163_v7, %v1162_v6 }
  0xa5   : > { %4620 = vmatprep.subr.bf16.mxu0 %v4747_v33  ;;  %v1164_v10 = vld [vmem:[#allocation2 + $0x89] sm:$0xff]  ;;  %v989_v17 = vpack.c.bf16 %v977_v9, %v976_v8  ;;  %v1167_v21 = vld [vmem:[#allocation2 + $0xb1] sm:$0xff] }
  0xa6   : > { %v4751_v12 = vld [vmem:[#allocation7 + $0x90] sm:$0xff]   ;;  %v978_v13 = vld [vmem:[#allocation2 + $0x88] sm:$0xff]  ;;  %v1176_v18 = vpack.c.bf16 %v1165_v11, %v1164_v10 }
  0xa7   : > { %v979_v14 = vld [vmem:[#allocation2 + $0x90] sm:$0xff]  ;;  %v980_v22 = vld [vmem:[#allocation2 + $0xa8] sm:$0xff] }
  0xa8   : > { %v990_v19 = vpack.c.bf16 %v979_v14, %v978_v13  ;;  %v1166_v20 = vld [vmem:[#allocation2 + $0xa9] sm:$0xff]  ;;  %v1169_v25 = vld [vmem:[#allocation2 + $0xd1] sm:$0xff] }
  0xa9   : > { %4547 = vmatmul.mubr.msk.bf16.gmra.mxu0 %vm428_vm1, %v805_v40  ;;  %v981_v23 = vld [vmem:[#allocation2 + $0xb0] sm:$0xff]  ;;  %v982_v26 = vld [vmem:[#allocation2 + $0xc8] sm:$0xff]  ;;  %v1177_v28 = vpack.c.bf16 %v1167_v21, %v1166_v20 }
  0xaa   : > { %4525 = vmatmul.mubr.msk.bf16.gmra.mxu1 %vm428_vm1, %v466_v41  ;;  %4550 = vmatprep.mubr.msk.bf16.mxu0 %vm428_vm1, %v806_v42  ;;  %v1168_v24 = vld [vmem:[#allocation2 + $0xc9] sm:$0xff]  ;;  %v991_v29 = vpack.c.bf16 %v981_v23, %v980_v22  ;;  %v1529_v37 = vld [vmem:[#allocation2 + $0x13] sm:$0xff]  ;;  %v4754_v22 = vld [vmem:[#allocation9 + $0xf4] ss:$8 sps:$4 sm:$0xff]  }
  0xab   : > { %4528 = vmatprep.mubr.msk.bf16.mxu1 %vm428_vm1, %v467_v43  ;;  %v983_v27 = vld [vmem:[#allocation2 + $0xd0] sm:$0xff]  ;;  %v1178_v30 = vpack.c.bf16 %v1169_v25, %v1168_v24  ;;  %v984_v34 = vld [vmem:[#allocation2 + $0xe8] sm:$0xff]  ;;  %v4757_v23 = vld [vmem:[#allocation9 + $0x74] ss:$8 sps:$4 sm:$0xff]  }
  0xac   : > { %v1170_v32 = vld [vmem:[#allocation2 + $0xe9] sm:$0xff]  ;;  %v1343_v39 = vld [vmem:[#allocation2 + $0x12] sm:$0xff] }
  0xad   : > { %v985_v35 = vld [vmem:[#allocation2 + $0xf0] sm:$0xff]  ;;  %v4752_v24 = vld [vmem:[#allocation9 + $0xf0] ss:$8 sps:$4 sm:$0xff]  }
  0xae   : > { %v1528_v36 = vld [vmem:[#allocation2 + $0xb] sm:$0xff]  ;;  %v993_v41 = vpack.c.bf16 %v985_v35, %v984_v34  ;;  %v1531_v45 = vld [vmem:[#allocation2 + $0x33] sm:$0xff] }
  0xaf   : > { %v1342_v38 = vld [vmem:[#allocation2 + $0xa] sm:$0xff]  ;;  %v1544_v42 = vpack.c.bf16 %v1529_v37, %v1528_v36  ;;  %v1345_v47 = vld [vmem:[#allocation2 + $0x32] sm:$0xff] }
  0xb0   : > { %v1358_v43 = vpack.c.bf16 %v1343_v39, %v1342_v38  ;;  %v1530_v44 = vld [vmem:[#allocation2 + $0x2b] sm:$0xff]  ;;  %v1533_v49 = vld [vmem:[#allocation2 + $0x53] sm:$0xff]  ;;  %v4778_v38 = vld [vmem:[#allocation9 + $0xb4] ss:$8 sps:$4 sm:$0xff]  }
  0xb1   : > { %4551 = vmatmul.mubr.msk.bf16.gmra.mxu0 %vm428_vm1, %v807_v52  ;;  %v1344_v46 = vld [vmem:[#allocation2 + $0x2a] sm:$0xff]  ;;  %v1347_v51 = vld [vmem:[#allocation2 + $0x52] sm:$0xff]  ;;  %v1545_v52 = vpack.c.bf16 %v1531_v45, %v1530_v44  ;;  %v4781_v39 = vld [vmem:[#allocation9 + $0x34] ss:$8 sps:$4 sm:$0xff]  }
  0xb2   : > { %4529 = vmatmul.mubr.msk.bf16.gmra.mxu1 %vm428_vm1, %v468_v53  ;;  %4582 = vmatprep.mubr.msk.bf16.mxu0 %vm428_vm1, %v1172_v54  ;;  %v1532_v48 = vld [vmem:[#allocation2 + $0x4b] sm:$0xff]  ;;  %v1359_v53 = vpack.c.bf16 %v1345_v47, %v1344_v46  ;;  %v1535_v57 = vld [vmem:[#allocation2 + $0x73] sm:$0xff]  ;;  %v4790_v46 = vld [vmem:[#allocation9 + $0x94] ss:$8 sps:$4 sm:$0xff]  }
  0xb3   : > { %4560 = vmatprep.mubr.msk.bf16.mxu1 %vm428_vm1, %v986_v55  ;;  %v1346_v50 = vld [vmem:[#allocation2 + $0x4a] sm:$0xff]  ;;  %v1546_v54 = vpack.c.bf16 %v1533_v49, %v1532_v48  ;;  %v1349_v59 = vld [vmem:[#allocation2 + $0x72] sm:$0xff]  ;;  %v4793_v47 = vld [vmem:[#allocation9 + $0x14] ss:$8 sps:$4 sm:$0xff]  }
  0xb4   : > { %v1360_v55 = vpack.c.bf16 %v1347_v51, %v1346_v50  ;;  %v1534_v56 = vld [vmem:[#allocation2 + $0x6b] sm:$0xff]  ;;  %v1537_v61 = vld [vmem:[#allocation2 + $0x93] sm:$0xff] }
  0xb5   : > { %v1348_v58 = vld [vmem:[#allocation2 + $0x6a] sm:$0xff]  ;;  %v1351_v63 = vld [vmem:[#allocation2 + $0x92] sm:$0xff] }
  0xb6   : > { %v1536_v60 = vld [vmem:[#allocation2 + $0x8b] sm:$0xff]  ;;  %v1541_v9 = vld [vmem:[#allocation2 + $0xd3] sm:$0xff] }
  0xb7   : > { %v1350_v62 = vld [vmem:[#allocation2 + $0x8a] sm:$0xff]  ;;  %v1353_v7 = vld [vmem:[#allocation2 + $0xb2] sm:$0xff] }
  0xb8   : > { %v1352_v6 = vld [vmem:[#allocation2 + $0xaa] sm:$0xff]  ;;  %v1355_v11 = vld [vmem:[#allocation2 + $0xd2] sm:$0xff] }
  0xb9   : > { %4583 = vmatmul.mubr.msk.bf16.vlgmr.msra.gmra.mxu0 %vm428_vm1, %v1173_v0  ;;  %v1547_v0 = vpack.c.bf16 %v1535_v57, %v1534_v56  ;;  %v1540_v8 = vld [vmem:[#allocation2 + $0xcb] sm:$0xff]  ;;  %v1363_v13 = vpack.c.bf16 %v1353_v7, %v1352_v6  ;;  %v4755_v25 = vld [vmem:[#allocation9 + $0x70] ss:$8 sps:$4 sm:$0xff]  }
  0xba   : > { %4561 = vmatmul.mubr.msk.bf16.vlgmr.msra.gmra.mxu1 %vm428_vm1, %v987_v1  ;;  %4621 = vmatpush3.bf16.msra.mxu0 %v4747_v33  ;;  %v1171_v33 = vld [vmem:[#allocation2 + $0xf1] sm:$0xff]  ;;  %v1361_v1 = vpack.c.bf16 %v1349_v59, %v1348_v58  ;;  %v1550_v14 = vpack.c.bf16 %v1541_v9, %v1540_v8 }
  0xbb   : > { %4599 = vmatpush3.bf16.msra.mxu1 %v5383_v31  ;;  %4564 = vmatprep.mubr.msk.bf16.mxu1 %vm428_vm1, %v988_v3  ;;  %v992_v31 = vpack.c.bf16 %v983_v27, %v982_v26  ;;  %v1179_v40 = vpack.c.bf16 %v1171_v33, %v1170_v32  ;;  %v1362_v3 = vpack.c.bf16 %v1351_v63, %v1350_v62  ;;  %v1354_v10 = vld [vmem:[#allocation2 + $0xca] sm:$0xff]  ;;  %v4764_v32 = vld [vmem:[#allocation9 + $0xd0] ss:$8 sps:$4 sm:$0xff]  }
  0xbc   : > { %4586 = vmatprep.mubr.msk.bf16.mxu0 %vm428_vm1, %v1174_v5  ;;  %4600 = vmatprep.subr.bf16.mxu1 %v4748_v2  ;;  %v1539_v5 = vld [vmem:[#allocation2 + $0xb3] sm:$0xff] }
  0xbd   : > { %4622 = vmatprep.subr.bf16.mxu0 %v4749_v4  ;;  %v4760_v26 = vld [vmem:[#allocation9 + $0xe4] ss:$8 sps:$4 sm:$0xff]   ;;  %v4767_v33 = vld [vmem:[#allocation9 + $0x50] ss:$8 sps:$4 sm:$0xff]   ;;  %v4770_v36 = vld [vmem:[#allocation9 + $0xc0] ss:$8 sps:$4 sm:$0xff]  }
  0xbe   : > { %4623 = vmatpush3.bf16.msra.mxu0 %v4749_v4  ;;  %v1538_v4 = vld [vmem:[#allocation2 + $0xab] sm:$0xff]  ;;  %v4788_v48 = vld [vmem:[#allocation9 + $0x90] ss:$8 sps:$4 sm:$0xff]  }
  0xbf   : > { %4601 = vmatpush3.bf16.msra.mxu1 %v4748_v2  ;;  %4624 = vmatprep.subr.bf16.mxu0 %v4751_v12  ;;  %v1548_v2 = vpack.c.bf16 %v1537_v61, %v1536_v60  ;;  %v4763_v27 = vld [vmem:[#allocation9 + $0x64] ss:$8 sps:$4 sm:$0xff]   ;;  %v4773_v37 = vld [vmem:[#allocation9 + $0x40] ss:$8 sps:$4 sm:$0xff]   ;;  %v4791_v49 = vld [vmem:[#allocation9 + $0x10] ss:$8 sps:$4 sm:$0xff]  }
  0xc0   : > { %4602 = vmatprep.subr.bf16.mxu1 %v4750_v15  ;;  %v4772_v34 = vld [vmem:[#allocation9 + $0xc4] ss:$8 sps:$4 sm:$0xff]   ;;  %v4782_v44 = vld [vmem:[#allocation9 + $0xa0] ss:$8 sps:$4 sm:$0xff]  }
  0xc1   : > { %4587 = vmatmul.mubr.msk.bf16.gmra.mxu0 %vm428_vm1, %v1175_v16  ;;  %v1542_v16 = vld [vmem:[#allocation2 + $0xeb] sm:$0xff] }
  0xc2   : > { %4565 = vmatmul.mubr.msk.bf16.gmra.mxu1 %vm428_vm1, %v989_v17  ;;  %4590 = vmatprep.mubr.msk.bf16.mxu0 %vm428_vm1, %v1176_v18  ;;  %v1543_v17 = vld [vmem:[#allocation2 + $0xf3] sm:$0xff]  ;;  %v1356_v18 = vld [vmem:[#allocation2 + $0xea] sm:$0xff] }
  0xc3   : > { %4568 = vmatprep.mubr.msk.bf16.mxu1 %vm428_vm1, %v990_v19  ;;  %4603 = vmatpush3.bf16.msra.mxu1 %v4750_v15  ;;  %v1364_v15 = vpack.c.bf16 %v1355_v11, %v1354_v10  ;;  %v1357_v19 = vld [vmem:[#allocation2 + $0xf2] sm:$0xff]  ;;  %v1551_v20 = vpack.c.bf16 %v1543_v17, %v1542_v16 }
  0xc4   : > { %4625 = vmatpush3.bf16.msra.mxu0 %v4751_v12  ;;  %v1549_v12 = vpack.c.bf16 %v1539_v5, %v1538_v4  ;;  %v1365_v21 = vpack.c.bf16 %v1357_v19, %v1356_v18  ;;  %1945 = vmatprep.subr.bf16.mxu1 %v4754_v22  ;;  %v4775_v35 = vld [vmem:[#allocation9 + $0x44] ss:$8 sps:$4 sm:$0xff]   ;;  %v4785_v45 = vld [vmem:[#allocation9 + $0x20] ss:$8 sps:$4 sm:$0xff]  }
  0xc5   : > { %2138 = vmatprep.subr.bf16.mxu0 %v4757_v23  ;;  %v4796_v50 = vld [vmem:[#allocation9 + $0x84] ss:$8 sps:$4 sm:$0xff]  }
  0xc6   : > { %v4799_v51 = vld [vmem:[#allocation9 + $0x4] ss:$8 sps:$4 sm:$0xff]  }
  0xc9   : > { %4591 = vmatmul.mubr.msk.bf16.gmra.mxu0 %vm428_vm1, %v1177_v28  ;;  %v4758_v28 = vld [vmem:[#allocation9 + $0xe0] ss:$8 sps:$4 sm:$0xff]  }
  0xca   : > { %4569 = vmatmul.mubr.msk.bf16.gmra.mxu1 %vm428_vm1, %v991_v29  ;;  %4594 = vmatprep.mubr.msk.bf16.mxu0 %vm428_vm1, %v1178_v30  ;;  %v4761_v29 = vld [vmem:[#allocation9 + $0x60] ss:$8 sps:$4 sm:$0xff]   ;;  %v4766_v30 = vld [vmem:[#allocation9 + $0xd4] ss:$8 sps:$4 sm:$0xff]  }
  0xcb   : > { %4572 = vmatprep.mubr.msk.bf16.mxu1 %vm428_vm1, %v992_v31  ;;  %v4769_v31 = vld [vmem:[#allocation9 + $0x54] ss:$8 sps:$4 sm:$0xff]  }
  0xd1   : > { %4595 = vmatmul.mubr.msk.bf16.gmra.mxu0 %vm428_vm1, %v1179_v40  ;;  %v4776_v40 = vld [vmem:[#allocation9 + $0xb0] ss:$8 sps:$4 sm:$0xff]  }
  0xd2   : > { %4573 = vmatmul.mubr.msk.bf16.gmra.mxu1 %vm428_vm1, %v993_v41  ;;  %4626 = vmatprep.mubr.msk.bf16.mxu0 %vm428_vm1, %v1544_v42  ;;  %v4779_v41 = vld [vmem:[#allocation9 + $0x30] ss:$8 sps:$4 sm:$0xff]   ;;  %v4784_v42 = vld [vmem:[#allocation9 + $0xa4] ss:$8 sps:$4 sm:$0xff]  }
  0xd3   : > { %4604 = vmatprep.mubr.msk.bf16.mxu1 %vm428_vm1, %v1358_v43  ;;  %v4787_v43 = vld [vmem:[#allocation9 + $0x24] ss:$8 sps:$4 sm:$0xff]  }
  0xd9   : > { %4627 = vmatmul.mubr.msk.bf16.vlgmr.msra.gmra.mxu0 %vm428_vm1, %v1545_v52  ;;  %v4794_v52 = vld [vmem:[#allocation9 + $0x80] ss:$8 sps:$4 sm:$0xff]  }
  0xda   : > { %4605 = vmatmul.mubr.msk.bf16.vlgmr.msra.gmra.mxu1 %vm428_vm1, %v1359_v53  ;;  %4630 = vmatprep.mubr.msk.bf16.mxu0 %vm428_vm1, %v1546_v54  ;;  %v4797_v53 = vld [vmem:[#allocation9] ss:$8 sps:$4 sm:$0xff]   ;;  %v6240_v54 = vmov 0  }
  0xdb   : > { %4608 = vmatprep.mubr.msk.bf16.mxu1 %vm428_vm1, %v1360_v55  ;;  %1946 = vmatpush1.bf16.msra.mxu1 %v4752_v24  ;;  %v4802_v55 = vld [vmem:[#allocation9 + $0x174] ss:$8 sps:$4 sm:$0xff]  }
  0xdc   : > { %2139 = vmatpush1.bf16.msra.mxu0 %v4755_v25  ;;  %1947 = vmatprep.subr.bf16.mxu1 %v4760_v26 }
  0xdd   : > { %2140 = vmatprep.subr.bf16.mxu0 %v4763_v27 }
  0xdf   : > { %1948 = vmatpush1.bf16.msra.mxu1 %v4758_v28 }
  0xe0   : > { %2141 = vmatpush1.bf16.msra.mxu0 %v4761_v29  ;;  %1949 = vmatprep.subr.bf16.mxu1 %v4766_v30 }
  0xe1   : > { %4631 = vmatmul.mubr.msk.bf16.gmra.mxu0 %vm428_vm1, %v1547_v0  ;;  %2142 = vmatprep.subr.bf16.mxu0 %v4769_v31 }
  0xe2   : > { %4609 = vmatmul.mubr.msk.bf16.gmra.mxu1 %vm428_vm1, %v1361_v1  ;;  %4634 = vmatprep.mubr.msk.bf16.mxu0 %vm428_vm1, %v1548_v2  ;;  %v4817_v2 = vld [vmem:[#allocation9 + $0x1f4] ss:$8 sps:$4 sm:$0xff]  }
  0xe3   : > { %4612 = vmatprep.mubr.msk.bf16.mxu1 %vm428_vm1, %v1362_v3  ;;  %1950 = vmatpush1.bf16.msra.mxu1 %v4764_v32 }
  0xe4   : > { %2143 = vmatpush1.bf16.msra.mxu0 %v4767_v33  ;;  %1951 = vmatprep.subr.bf16.mxu1 %v4772_v34 }
  0xe5   : > { %2144 = vmatprep.subr.bf16.mxu0 %v4775_v35 }
  0xe7   : > { %1952 = vmatpush1.bf16.msra.mxu1 %v4770_v36 }
  0xe8   : > { %2145 = vmatpush1.bf16.msra.mxu0 %v4773_v37  ;;  %1953 = vmatprep.subr.bf16.mxu1 %v4778_v38 }
  0xe9   : > { %4635 = vmatmul.mubr.msk.bf16.gmra.mxu0 %vm428_vm1, %v1549_v12  ;;  %2146 = vmatprep.subr.bf16.mxu0 %v4781_v39 }
  0xea   : > { %4613 = vmatmul.mubr.msk.bf16.gmra.mxu1 %vm428_vm1, %v1363_v13  ;;  %4638 = vmatprep.mubr.msk.bf16.mxu0 %vm428_vm1, %v1550_v14 }
  0xeb   : > { %4616 = vmatprep.mubr.msk.bf16.mxu1 %vm428_vm1, %v1364_v15  ;;  %1954 = vmatpush1.bf16.msra.mxu1 %v4776_v40 }
  0xec   : > { %2147 = vmatpush1.bf16.msra.mxu0 %v4779_v41  ;;  %1955 = vmatprep.subr.bf16.mxu1 %v4784_v42 }
  0xed   : > { %2148 = vmatprep.subr.bf16.mxu0 %v4787_v43 }
  0xef   : > { %1956 = vmatpush1.bf16.msra.mxu1 %v4782_v44 }
  0xf0   : > { %2149 = vmatpush1.bf16.msra.mxu0 %v4785_v45  ;;  %1957 = vmatprep.subr.bf16.mxu1 %v4790_v46 }
  0xf1   : > { %4639 = vmatmul.mubr.msk.bf16.gmra.mxu0 %vm428_vm1, %v1551_v20  ;;  %2150 = vmatprep.subr.bf16.mxu0 %v4793_v47 }
  0xf2   : > { %4617 = vmatmul.mubr.msk.bf16.gmra.mxu1 %vm428_vm1, %v1365_v21  ;;  %2170 = vmatprep.mubr.bf16.mxu0 %v6240_v54 }
  0xf3   : > { %1958 = vmatpush1.bf16.msra.mxu1 %v4788_v48  ;;  %1977 = vmatprep.mubr.bf16.mxu1 %v6240_v54 }
  0xf4   : > { %2151 = vmatpush1.bf16.msra.mxu0 %v4791_v49  ;;  %1959 = vmatprep.subr.bf16.mxu1 %v4796_v50 }
  0xf5   : > { %2152 = vmatprep.subr.bf16.mxu0 %v4799_v51 }
  0xf7   : > { %1960 = vmatpush1.bf16.msra.mxu1 %v4794_v52 }
  0xf8   : > { %2153 = vmatpush1.bf16.msra.mxu0 %v4797_v53  ;;  %2372 = vmatprep.subr.bf16.mxu1 %v4802_v55 }
  0xf9   : > { %2638 = vmatprep.subr.bf16.mxu0 %v4817_v2 }
 0x149   : > { %v5431_v56 = vpop.f32.mrf.mxu0 }
 0x14a   : > { %v5433_v57 = vpop.f32.mrf.mxu1 }
 0x14b   : > { %v5435_v58 = vpop.f32.mrf.mxu0 }
 0x14c   : > { %v5437_v59 = vpop.f32.mrf.mxu1 }
 0x14d   : > { %v5439_v60 = vpop.f32.mrf.mxu0 }
 0x14e   : > { %v5441_v61 = vpop.f32.mrf.mxu1 }
 0x14f   : > { %v5443_v62 = vpop.f32.mrf.mxu0 }
 0x150   : > { %v5445_v63 = vpop.f32.mrf.mxu1 }
 0x151   : > { %v5447_v0 = vpop.f32.mrf.mxu0 }
 0x152   : > { %v5449_v1 = vpop.f32.mrf.mxu1 }
 0x153   : > { %v5451_v3 = vpop.f32.mrf.mxu0 }
 0x154   : > { %v5453_v4 = vpop.f32.mrf.mxu1 }
 0x155   : > { %v5455_v5 = vpop.f32.mrf.mxu0 }
 0x156   : > { %v5457_v6 = vpop.f32.mrf.mxu1 }
 0x157   : > { %6258 = vst [vmem:[#allocation17_spill] sm:$0xff] %v5457_v6  ;;  %v5459_v7 = vpop.f32.mrf.mxu0 }
 0x158   : > { %v5461_v8 = vpop.f32.mrf.mxu1 }
 0x159   : > { %6259 = vst [vmem:[#allocation18_spill] sm:$0xff] %v5461_v8  ;;  %v4540_v9 = vpop.f32.mrf.mxu0 }
 0x15a   : > { %v4518_v10 = vpop.f32.mrf.mxu1 }
 0x15b   : > { %v891_v11 = vpop.f32.mrf.mxu0 }
 0x15c   : > { %v721_v12 = vpop.f32.mrf.mxu1 }
 0x15d   : > { %v5463_v13 = vpop.f32.mrf.mxu0 }
 0x15e   : > { %v4519_v14 = vpop.f32.mrf.mxu1 }
 0x15f   : > { %v5465_v15 = vpop.f32.mrf.mxu0 }
 0x160   : > { %v724_v16 = vpop.f32.mrf.mxu1 }
 0x161   : > { %v5467_v17 = vpop.f32.mrf.mxu0 }
 0x162   : > { %v4522_v18 = vpop.f32.mrf.mxu1 }
 0x163   : > { %v5469_v19 = vpop.f32.mrf.mxu0 }
 0x164   : > { %v737_v20 = vpop.f32.mrf.mxu1 }
 0x165   : > { %v5471_v21 = vpop.f32.mrf.mxu0 }
 0x166   : > { %v5473_v22 = vpop.f32.mrf.mxu1 }
 0x167   : > { %v5475_v23 = vpop.f32.mrf.mxu0 }
 0x168   : > { %v5477_v24 = vpop.f32.mrf.mxu1 }
 0x169   : > { %v5479_v25 = vpop.f32.mrf.mxu0 }
 0x16a   : > { %v5481_v26 = vpop.f32.mrf.mxu1 }
 0x16b   : > { %v5483_v27 = vpop.f32.mrf.mxu0 }
 0x16c   : > { %v5485_v28 = vpop.f32.mrf.mxu1 }
 0x16d   : > { %v5487_v29 = vpop.f32.mrf.mxu0 }
 0x16e   : > { %v5489_v30 = vpop.f32.mrf.mxu1 }
 0x16f   : > { %v5491_v31 = vpop.f32.mrf.mxu0 }
 0x170   : > { %6260 = vst [vmem:[#allocation19_spill] sm:$0xff] %v5491_v31  ;;  %v5493_v32 = vpop.f32.mrf.mxu1 }
 0x171   : > { %v5495_v33 = vpop.f32.mrf.mxu0 }
 0x172   : > { %6261 = vst [vmem:[#allocation20_spill] sm:$0xff] %v5495_v33  ;;  %v5497_v34 = vpop.f32.mrf.mxu1 }
 0x173   : > { %v5499_v35 = vpop.f32.mrf.mxu0 }
 0x174   : > { %6262 = vst [vmem:[#allocation21_spill] sm:$0xff] %v5499_v35  ;;  %v5501_v36 = vpop.f32.mrf.mxu1  ;;  %v730_v35 = vadd.f32 %v4518_v10, %v5431_v56  ;;  %v725_v56 = vadd.f32 %v724_v16, %v5443_v62  ;;  %v749_v62 = vadd.f32 %v5473_v22, %v5455_v5 }
 0x175   : > { %v5503_v37 = vpop.f32.mrf.mxu0 }
 0x176   : > { %6263 = vst [vmem:[#allocation22_spill] sm:$0xff] %v5503_v37  ;;  %v5505_v38 = vpop.f32.mrf.mxu1 }
 0x177   : > { %6264 = vst [vmem:[#allocation23_spill] sm:$0xff] %v5505_v38  ;;  %v5507_v39 = vpop.f32.mrf.mxu0 }
 0x178   : > { %6265 = vst [vmem:[#allocation24_spill] sm:$0xff] %v5507_v39  ;;  %v5509_v40 = vpop.f32.mrf.mxu1 }
 0x179   : > { %6266 = vst [vmem:[#allocation25_spill] sm:$0xff] %v5509_v40  ;;  %v4584_v41 = vpop.f32.mrf.mxu0 }
 0x17a   : > { %v4562_v42 = vpop.f32.mrf.mxu1 }
 0x17b   : > { %v1263_v43 = vpop.f32.mrf.mxu0 }
 0x17c   : > { %v1077_v44 = vpop.f32.mrf.mxu1 }
 0x17d   : > { %v4585_v45 = vpop.f32.mrf.mxu0 }
 0x17e   : > { %v4563_v46 = vpop.f32.mrf.mxu1 }
 0x17f   : > { %v5511_v47 = vpop.f32.mrf.mxu0 }
 0x180   : > { %v1080_v48 = vpop.f32.mrf.mxu1 }
 0x181   : > { %v5513_v49 = vpop.f32.mrf.mxu0 }
 0x182   : > { %v4566_v50 = vpop.f32.mrf.mxu1 }
 0x183   : > { %v5515_v51 = vpop.f32.mrf.mxu0 }
 0x184   : > { %v1093_v52 = vpop.f32.mrf.mxu1 }
 0x185   : > { %v5517_v53 = vpop.f32.mrf.mxu0 }
 0x186   : > { %6267 = vst [vmem:[#allocation26_spill] sm:$0xff] %v5517_v53  ;;  %v5519_v55 = vpop.f32.mrf.mxu1 }
 0x187   : > { %v5521_v2 = vpop.f32.mrf.mxu0 }
 0x188   : > { %6268 = vst [vmem:[#allocation27_spill] sm:$0xff] %v5521_v2  ;;  %v5523_v54 = vpop.f32.mrf.mxu1  ;;  %v722_v2 = vadd.f32 %v721_v12, %v5435_v58 }
 0x189   : > { %v5525_v39 = vpop.f32.mrf.mxu0 }
 0x18a   : > { %6269 = vst [vmem:[#allocation28_spill] sm:$0xff] %v5525_v39  ;;  %v5527_v37 = vpop.f32.mrf.mxu1 }
 0x18b   : > { %6270 = vst [vmem:[#allocation29_spill] sm:$0xff] %v5527_v37  ;;  %v5529_v40 = vpop.f32.mrf.mxu0  ;;  %v956_v37 = vadd.f32 %v4540_v9, %v730_v35 }
 0x18c   : > { %6271 = vst [vmem:[#allocation30_spill] sm:$0xff] %v5529_v40  ;;  %v5531_v8 = vpop.f32.mrf.mxu1  ;;  %v733_v40 = vadd.f32 %v4519_v14, %v5439_v60  ;;  %v738_v60 = vadd.f32 %v737_v20, %v5451_v3  ;;  %v754_v3 = vadd.f32 %v5485_v28, %v5437_v59 }
 0x18d   : > { %6272 = vst [vmem:[#allocation31_spill] sm:$0xff] %v5531_v8  ;;  %v5533_v38 = vpop.f32.mrf.mxu0  ;;  %v1142_v10 = vadd.f32 %v4562_v42, %v956_v37 }
 0x18e   : > { %6273 = vst [vmem:[#allocation32_spill] sm:$0xff] %v5533_v38  ;;  %v5535_v6 = vpop.f32.mrf.mxu1  ;;  %v957_v12 = vadd.f32 %v5463_v13, %v733_v40  ;;  %v741_v13 = vadd.f32 %v5477_v24, %v5459_v7  ;;  %v958_v5 = vadd.f32 %v5469_v19, %v738_v60  ;;  %v961_v24 = vadd.f32 %v5471_v21, %v749_v62 }
 0x18f   : > { %6274 = vst [vmem:[#allocation33_spill] sm:$0xff] %v5535_v6  ;;  %v5538_v33 = vpop.f32.mrf.mxu0  ;;  %v954_v6 = vadd.f32 %v891_v11, %v722_v2  ;;  %v955_v11 = vadd.f32 %v5465_v15, %v725_v56  ;;  %v1328_v16 = vadd.f32 %v4584_v41, %v1142_v10  ;;  %v765_v21 = vadd.f32 %v5489_v30, %v5441_v61 }
 0x190   : > { %6275 = vst [vmem:[#allocation34_spill] sm:$0xff] %v5538_v33  ;;  %v5540_v53 = vpop.f32.mrf.mxu1  ;;  %v1143_v35 = vadd.f32 %v4563_v46, %v957_v12  ;;  %v959_v28 = vadd.f32 %v5475_v23, %v741_v13  ;;  %v1144_v19 = vadd.f32 %v1093_v52, %v958_v5  ;;  %v778_v60 = vadd.f32 %v5497_v34, %v5449_v1  ;;  %v6279_v1 = vld [vmem:[#allocation26_spill] sm:$0xff]  ;;  %v6283_v5 = vld [vmem:[#allocation27_spill] sm:$0xff] }
 0x191   : > { %6276 = vst [vmem:[#allocation35_spill] sm:$0xff] %v5540_v53  ;;  %v5543_v31 = vpop.f32.mrf.mxu0  ;;  %v746_v53 = vadd.f32 %v4522_v18, %v5447_v0  ;;  %v1141_v15 = vadd.f32 %v1080_v48, %v955_v11  ;;  %v770_v61 = vadd.f32 %v5501_v36, %v5453_v4 }
 0x192   : > { %6277 = vst [vmem:[#allocation36_spill] sm:$0xff] %v5543_v31  ;;  %v5545_v39 = vpop.f32.mrf.mxu1  ;;  %v1140_v31 = vadd.f32 %v1077_v44, %v954_v6  ;;  %v762_v6 = vadd.f32 %v5481_v26, %v5433_v57  ;;  %v1329_v57 = vadd.f32 %v4585_v45, %v1143_v35  ;;  %v757_v45 = vadd.f32 %v5493_v32, %v5445_v63  ;;  %v6280_v13 = vld [vmem:[#allocation29_spill] sm:$0xff] }
 0x193   : > { %v5548_v8 = vpop.f32.mrf.mxu0  ;;  %v960_v0 = vadd.f32 %v5467_v17, %v746_v53  ;;  %v5578_v17 = vld [vmem:[%s6228_s2] ss:$0 sm:$0xff]  ;;  %v1327_v46 = vadd.f32 %v5511_v47, %v1141_v15  ;;  %v1330_v30 = vadd.f32 %v5515_v51, %v1144_v19  ;;  %v1145_v63 = vadd.f32 %v5523_v54, %v959_v28  ;;  %v6286_v19 = vld [vmem:[#allocation23_spill] sm:$0xff] }
 0x194   : > { %v5550_v38 = vpop.f32.mrf.mxu1  ;;  %v1326_v20 = vadd.f32 %v1263_v43, %v1140_v31  ;;  %v964_v31 = vadd.f32 %v5479_v25, %v762_v6  ;;  %v962_v43 = vadd.f32 %v5483_v27, %v754_v3  ;;  %v1147_v25 = vadd.f32 %v5519_v55, %v961_v24 }
 0x195   : > { %v5553_v33 = vpop.f32.mrf.mxu0  ;;  %v1146_v22 = vadd.f32 %v4566_v50, %v960_v0  ;;  %v965_v35 = vadd.f32 %v5487_v29, %v765_v21  ;;  %v1331_v29 = vadd.f32 %v6283_v5, %v1145_v63 }
 0x196   : > { %v5556_v58 = vpop.f32.mrf.mxu1  ;;  %v1333_v34 = vadd.f32 %v6279_v1, %v1147_v25  ;;  %v1150_v4 = vadd.f32 %v6280_v13, %v964_v31  ;;  %v6285_v31 = vld [vmem:[#allocation17_spill] sm:$0xff] }
 0x197   : > { %v5559_v9 = vpop.f32.mrf.mxu0  ;;  %v1332_v23 = vadd.f32 %v5513_v49, %v1146_v22  ;;  %v6284_v22 = vld [vmem:[#allocation31_spill] sm:$0xff] }
 0x198   : > { %v5562_v14 = vpop.f32.mrf.mxu1 }
 0x199   : > { %v4628_v37 = vpop.f32.mrf.mxu0 }
 0x19a   : > { %v4606_v18 = vpop.f32.mrf.mxu1 }
 0x19b   : > { %v1514_v40 = vadd.f32 %v4606_v18, %v1328_v16  ;;  %v1635_v42 = vpop.f32.mrf.mxu0 }
 0x19c   : > { %v1449_v7 = vpop.f32.mrf.mxu1 }
 0x19d   : > { %v1700_v26 = vadd.f32 %v4628_v37, %v1514_v40  ;;  %v1512_v41 = vadd.f32 %v1449_v7, %v1326_v20  ;;  %v4629_v59 = vpop.f32.mrf.mxu0  ;;  %v6278_v37 = vld [vmem:[#allocation19_spill] sm:$0xff]  ;;  %v6281_v20 = vld [vmem:[#allocation20_spill] sm:$0xff]  ;;  %v6282_v40 = vld [vmem:[#allocation21_spill] sm:$0xff]  ;;  %v1148_v7 = vadd.f32 %v6284_v22, %v962_v43 }
 0x19e   : > { %v4607_v44 = vpop.f32.mrf.mxu1  ;;  %v963_v0 = vadd.f32 %v6278_v37, %v757_v45  ;;  %v968_v15 = vadd.f32 %v6281_v20, %v778_v60  ;;  %v6296_v20 = vld [vmem:[#allocation34_spill] sm:$0xff]  ;;  %v6297_v22 = vld [vmem:[#allocation36_spill] sm:$0xff] }
 0x19f   : > { %v1722_v48 = vadd.f32 %v5578_v17, %v1700_v26  ;;  %v1698_v50 = vadd.f32 %v1635_v42, %v1512_v41  ;;  %v1515_v53 = vadd.f32 %v4607_v44, %v1329_v57  ;;  %v1638_v2 = vpop.f32.mrf.mxu0  ;;  %v966_v42 = vadd.f32 %v6282_v40, %v770_v61  ;;  %v6292_v61 = vld [vmem:[#allocation35_spill] sm:$0xff] }
 0x1a0   : > { %v1452_v27 = vpop.f32.mrf.mxu1  ;;  %v781_v44 = vadd.f32 %v6286_v19, %v6285_v31  ;;  %v1154_v1 = vadd.f32 %v5545_v39, %v968_v15 }
 0x1a1   : > { %v1738_v52 = vmax.f32 %v1722_v48, 0.0  ;;  %v1720_v56 = vadd.f32 %v5578_v17, %v1698_v50  ;;  %v1701_v47 = vadd.f32 %v4629_v59, %v1515_v53  ;;  %v1513_v10 = vadd.f32 %v1452_v27, %v1327_v46  ;;  %v4632_v12 = vpop.f32.mrf.mxu0  ;;  %v6287_v46 = vld [vmem:[#allocation28_spill] sm:$0xff]  ;;  %v6288_v50 = vld [vmem:[#allocation33_spill] sm:$0xff] }
 0x1a2   : > { %v4610_v32 = vpop.f32.mrf.mxu1  ;;  %v1336_v48 = vadd.f32 %v6287_v46, %v1150_v4  ;;  %v1151_v53 = vadd.f32 %v6288_v50, %v965_v35  ;;  %v6293_v35 = vld [vmem:[#allocation32_spill] sm:$0xff] }
 0x1a3   : > { %1770 = vst [vmem:[#allocation3 + $0x28] sm:$0xff] %v1738_v52  ;;  %v1736_v49 = vmax.f32 %v1720_v56, 0.0  ;;  %v1723_v55 = vadd.f32 %v5578_v17, %v1701_v47  ;;  %v1699_v11 = vadd.f32 %v1638_v2, %v1513_v10  ;;  %v1518_v62 = vadd.f32 %v4610_v32, %v1332_v23  ;;  %v1651_v16 = vpop.f32.mrf.mxu0  ;;  %v6289_v56 = vld [vmem:[#allocation18_spill] sm:$0xff]  ;;  %v6290_v47 = vld [vmem:[#allocation25_spill] sm:$0xff] }
 0x1a4   : > { %v1465_v36 = vpop.f32.mrf.mxu1  ;;  %v773_v10 = vadd.f32 %v6290_v47, %v6289_v56  ;;  %v1337_v37 = vadd.f32 %v6293_v35, %v1151_v53  ;;  %v4800_v53 = vld [vmem:[#allocation9 + $0x170] ss:$8 sps:$4 sm:$0xff]   ;;  %v4803_v35 = vld [vmem:[#allocation9 + $0x160] ss:$8 sps:$4 sm:$0xff]  }
 0x1a5   : > { %1768 = vst [vmem:[#allocation3 + $0x8] sm:$0xff] %v1736_v49  ;;  %v1739_v51 = vmax.f32 %v1723_v55, 0.0  ;;  %v1721_v54 = vadd.f32 %v5578_v17, %v1699_v11  ;;  %v1516_v6 = vadd.f32 %v1465_v36, %v1330_v30  ;;  %v1704_v3 = vadd.f32 %v4632_v12, %v1518_v62  ;;  %v4633_v18 = vpop.f32.mrf.mxu0  ;;  %v6291_v12 = vld [vmem:[#allocation30_spill] sm:$0xff] }
 0x1a6   : > { %v4611_v24 = vpop.f32.mrf.mxu1  ;;  %v1334_v60 = vadd.f32 %v6291_v12, %v1148_v7  ;;  %v1149_v30 = vadd.f32 %v6292_v61, %v963_v0  ;;  %v1340_v7 = vadd.f32 %v6297_v22, %v1154_v1 }
 0x1a7   : > { %1771 = vst [vmem:[#allocation3 + $0x30] sm:$0xff] %v1739_v51  ;;  %v1737_v57 = vmax.f32 %v1721_v54, 0.0  ;;  %v1726_v26 = vadd.f32 %v5578_v17, %v1704_v3  ;;  %v1519_v41 = vadd.f32 %v4611_v24, %v1333_v34  ;;  %v1702_v59 = vadd.f32 %v1651_v16, %v1516_v6  ;;  %v1654_v28 = vpop.f32.mrf.mxu0  ;;  %v6294_v54 = vld [vmem:[#allocation22_spill] sm:$0xff]  ;;  %v6295_v3 = vld [vmem:[#allocation24_spill] sm:$0xff] }
 0x1a8   : > { %v1468_v2 = vpop.f32.mrf.mxu1  ;;  %v5614_v21 = vpack.c.bf16 %v1739_v51, %v1738_v52  ;;  %v1152_v34 = vadd.f32 %v5550_v38, %v966_v42  ;;  %v969_v6 = vadd.f32 %v6294_v54, %v781_v44  ;;  %v1335_v40 = vadd.f32 %v6296_v20, %v1149_v30  ;;  %v4820_v30 = vld [vmem:[#allocation9 + $0x1e4] ss:$8 sps:$4 sm:$0xff]  }
 0x1a9   : > { %1769 = vst [vmem:[#allocation3 + $0x10] sm:$0xff] %v1737_v57  ;;  %v1742_v43 = vmax.f32 %v1726_v26, 0.0  ;;  %v1724_v45 = vadd.f32 %v5578_v17, %v1702_v59  ;;  %v1517_v23 = vadd.f32 %v1468_v2, %v1331_v29  ;;  %v1705_v25 = vadd.f32 %v4633_v18, %v1519_v41  ;;  %v4636_v27 = vpop.f32.mrf.mxu0 }
 0x1aa   : > { %v4614_v63 = vpop.f32.mrf.mxu1  ;;  %v5621_v32 = vpack.c.bf16 %v1737_v57, %v1736_v49  ;;  %v967_v18 = vadd.f32 %v6295_v3, %v773_v10  ;;  %v1338_v24 = vadd.f32 %v5548_v8, %v1152_v34  ;;  %v1155_v57 = vadd.f32 %v5556_v58, %v969_v6 }
 0x1ab   : > { %1774 = vst [vmem:[#allocation3 + $0x68] sm:$0xff] %v1742_v43  ;;  %v1740_v52 = vmax.f32 %v1724_v45, 0.0  ;;  %v1727_v55 = vadd.f32 %v5578_v17, %v1705_v25  ;;  %v1522_v11 = vadd.f32 %v4614_v63, %v1336_v48  ;;  %v1703_v62 = vadd.f32 %v1654_v28, %v1517_v23  ;;  %v1667_v16 = vpop.f32.mrf.mxu0  ;;  %v4805_v25 = vld [vmem:[#allocation9 + $0x164] ss:$8 sps:$4 sm:$0xff]  }
 0x1ac   : > { %v1481_v13 = vpop.f32.mrf.mxu1  ;;  %v1824_v48 = vld [vmem:[#allocation3 + $0x6] sm:$0xff]  ;;  %v1153_v8 = vadd.f32 %v5562_v14, %v967_v18  ;;  %v1341_v61 = vadd.f32 %v5553_v33, %v1155_v57 }
 0x1ad   : > { %1772 = vst [vmem:[#allocation3 + $0x48] sm:$0xff] %v1740_v52  ;;  %v1743_v4 = vmax.f32 %v1727_v55, 0.0  ;;  %v1725_v0 = vadd.f32 %v5578_v17, %v1703_v62  ;;  %v1520_v49 = vadd.f32 %v1481_v13, %v1334_v60  ;;  %v1708_v36 = vadd.f32 %v4636_v27, %v1522_v11  ;;  %v4637_v51 = vpop.f32.mrf.mxu0  ;;  %v1784_v50 = vld [vmem:[#allocation3 + $0x5] sm:$0xff]  ;;  %v4815_v60 = vld [vmem:[#allocation9 + $0x1f0] ss:$8 sps:$4 sm:$0xff]  }
 0x1ae   : > { %v4615_v5 = vpop.f32.mrf.mxu1  ;;  %v4808_v33 = vld [vmem:[#allocation9 + $0x154] ss:$8 sps:$4 sm:$0xff]  }
 0x1af   : > { %1775 = vst [vmem:[#allocation3 + $0x70] sm:$0xff] %v1743_v4  ;;  %v1741_v29 = vmax.f32 %v1725_v0, 0.0  ;;  %v5632_v39 = vadd.f32 %v5578_v17, %v1708_v36  ;;  %v1523_v38 = vadd.f32 %v4615_v5, %v1337_v37  ;;  %v1706_v15 = vadd.f32 %v1667_v16, %v1520_v49  ;;  %v1670_v42 = vpop.f32.mrf.mxu0  ;;  %v1827_v49 = vld [vmem:[#allocation3 + $0x2e] sm:$0xff]  ;;  %v1826_v5 = vld [vmem:[#allocation3 + $0x26] sm:$0xff] }
 0x1b0   : > { %v1484_v26 = vpop.f32.mrf.mxu1  ;;  %v1825_v41 = vld [vmem:[#allocation3 + $0xe] sm:$0xff]  ;;  %v5637_v28 = vpack.c.bf16 %v1743_v4, %v1742_v43  ;;  %v6298_v16 = vmov 0   ;;  %v1339_v37 = vadd.f32 %v5559_v9, %v1153_v8 }
 0x1b1   : > { %v1785_v59 = vld [vmem:[#allocation3 + $0xd] sm:$0xff]  ;;  %1773 = vst [vmem:[#allocation3 + $0x50] sm:$0xff] %v1741_v29  ;;  %v1746_v31 = vmax.f32 %v5632_v39, 0.0  ;;  %v5641_v19 = vadd.f32 %v5578_v17, %v1706_v15  ;;  %v1521_v44 = vadd.f32 %v1484_v26, %v1335_v40  ;;  %v1709_v46 = vadd.f32 %v4637_v51, %v1523_v38  ;;  %v4640_v2 = vpop.f32.mrf.mxu0  ;;  %v4806_v15 = vld [vmem:[#allocation9 + $0x150] ss:$8 sps:$4 sm:$0xff]  }
 0x1b2   : > { %v4618_v58 = vpop.f32.mrf.mxu1  ;;  %v1840_v45 = vpack.c.bf16 %v1825_v41, %v1824_v48  ;;  %v1800_v23 = vpack.c.bf16 %v1785_v59, %v1784_v50  ;;  %v5644_v43 = vpack.c.bf16 %v1741_v29, %v1740_v52  ;;  %v1787_v36 = vld [vmem:[#allocation3 + $0x2d] sm:$0xff]  ;;  %v1786_v29 = vld [vmem:[#allocation3 + $0x25] sm:$0xff]  ;;  %v1841_v39 = vpack.c.bf16 %v1827_v49, %v1826_v5  ;;  %v4824_v41 = vld [vmem:[#allocation9 + $0x1d0] ss:$8 sps:$4 sm:$0xff]  }
 0x1b3   : > { %1778 = vst [vmem:[#allocation3 + $0xa8] sm:$0xff] %v1746_v31  ;;  %v1744_v27 = vmax.f32 %v5641_v19, 0.0  ;;  %v1731_v56 = vadd.f32 %v5578_v17, %v1709_v46  ;;  %v1526_v47 = vadd.f32 %v4618_v58, %v1340_v7  ;;  %v1707_v10 = vadd.f32 %v1670_v42, %v1521_v44  ;;  %v1683_v12 = vpop.f32.mrf.mxu0  ;;  %v4818_v51 = vld [vmem:[#allocation9 + $0x1e0] ss:$8 sps:$4 sm:$0xff]   ;;  %v4826_v42 = vld [vmem:[#allocation9 + $0x1d4] ss:$8 sps:$4 sm:$0xff]  }
 0x1b4   : > { %1978 = vmatmul.mubr.bf16.vlgmr.msra.gmra.mxu1 %v1840_v45  ;;  %2171 = vmatmul.mubr.bf16.vlgmr.msra.gmra.mxu0 %v1800_v23  ;;  %v1497_v14 = vpop.f32.mrf.mxu1  ;;  %v1801_v38 = vpack.c.bf16 %v1787_v36, %v1786_v29  ;;  %v4811_v26 = vld [vmem:[#allocation9 + $0x144] ss:$8 sps:$4 sm:$0xff]   ;;  %v4809_v44 = vld [vmem:[#allocation9 + $0x140] ss:$8 sps:$4 sm:$0xff]   ;;  %v4814_v46 = vld [vmem:[#allocation9 + $0x134] ss:$8 sps:$4 sm:$0xff]  }
 0x1b5   : > { %1776 = vst [vmem:[#allocation3 + $0x88] sm:$0xff] %v1744_v27  ;;  %v1747_v63 = vmax.f32 %v1731_v56, 0.0  ;;  %v1729_v52 = vadd.f32 %v5578_v17, %v1707_v10  ;;  %v1524_v55 = vadd.f32 %v1497_v14, %v1338_v24  ;;  %v1712_v11 = vadd.f32 %v4640_v2, %v1526_v47  ;;  %2373 = vmatpush1.bf16.msra.mxu1 %v4800_v53  ;;  %v4641_v62 = vpop.f32.mrf.mxu0  ;;  %v4829_v59 = vld [vmem:[#allocation9 + $0x1c4] ss:$8 sps:$4 sm:$0xff]   ;;  %v4827_v2 = vld [vmem:[#allocation9 + $0x1c0] ss:$8 sps:$4 sm:$0xff]  }
 0x1b6   : > { %1987 = vmatprep.mubr.bf16.mxu1 %v6298_v16  ;;  %v4619_v1 = vpop.f32.mrf.mxu1  ;;  %2180 = vmatprep.mubr.bf16.mxu0 %v6298_v16  ;;  %v1788_v58 = vld [vmem:[#allocation3 + $0x45] sm:$0xff]  ;;  %v4833_v10 = vld [vmem:[#allocation9 + $0x1b0] ss:$8 sps:$4 sm:$0xff]   ;;  %v1831_v14 = vld [vmem:[#allocation3 + $0x6e] sm:$0xff] }
 0x1b7   : > { %2374 = vmatprep.subr.bf16.mxu1 %v4805_v25  ;;  %1779 = vst [vmem:[#allocation3 + $0xb0] sm:$0xff] %v1747_v63  ;;  %v1745_v34 = vmax.f32 %v1729_v52, 0.0  ;;  %v1734_v13 = vadd.f32 %v5578_v17, %v1712_v11  ;;  %v1527_v4 = vadd.f32 %v4619_v1, %v1341_v61  ;;  %v1710_v0 = vadd.f32 %v1683_v12, %v1524_v55  ;;  %v1686_v6 = vpop.f32.mrf.mxu0  ;;  %v4835_v56 = vld [vmem:[#allocation9 + $0x1b4] ss:$8 sps:$4 sm:$0xff]   ;;  %v4823_v47 = vld [vmem:[#allocation9 + $0x124] ss:$8 sps:$4 sm:$0xff]  }
 0x1b8   : > { %2639 = vmatpush1.bf16.msra.mxu0 %v4815_v60  ;;  %v1500_v54 = vpop.f32.mrf.mxu1  ;;  %v5654_v3 = vpack.c.bf16 %v1747_v63, %v1746_v31  ;;  %v1829_v50 = vld [vmem:[#allocation3 + $0x4e] sm:$0xff]  ;;  %v4832_v61 = vld [vmem:[#allocation9 + $0x114] ss:$8 sps:$4 sm:$0xff]  }
 0x1b9   : > { %2640 = vmatprep.subr.bf16.mxu0 %v4820_v30  ;;  %1777 = vst [vmem:[#allocation3 + $0x90] sm:$0xff] %v1745_v34  ;;  %v1750_v9 = vmax.f32 %v1734_v13, 0.0  ;;  %v1732_v18 = vadd.f32 %v5578_v17, %v1710_v0  ;;  %v1525_v20 = vadd.f32 %v1500_v54, %v1339_v37  ;;  %v1713_v40 = vadd.f32 %v4641_v62, %v1527_v4  ;;  %v1789_v53 = vld [vmem:[#allocation3 + $0x4d] sm:$0xff]  ;;  %v1790_v55 = vld [vmem:[#allocation3 + $0x65] sm:$0xff] }
 0x1ba   : > { %2375 = vmatpush1.bf16.msra.mxu1 %v4803_v35  ;;  %v5657_v22 = vpack.c.bf16 %v1745_v34, %v1744_v27  ;;  %v1802_v25 = vpack.c.bf16 %v1789_v53, %v1788_v58  ;;  %v4812_v27 = vld [vmem:[#allocation9 + $0x130] ss:$8 sps:$4 sm:$0xff]   ;;  %v4838_v12 = vld [vmem:[#allocation9 + $0x1a4] ss:$8 sps:$4 sm:$0xff]   ;;  %v4821_v60 = vld [vmem:[#allocation9 + $0x120] ss:$8 sps:$4 sm:$0xff]  }
 0x1bb   : > { %2376 = vmatprep.subr.bf16.mxu1 %v4808_v33  ;;  %1782 = vst [vmem:[#allocation3 + $0xe8] sm:$0xff] %v1750_v9  ;;  %v1748_v7 = vmax.f32 %v1732_v18, 0.0  ;;  %v1735_v24 = vadd.f32 %v5578_v17, %v1713_v40  ;;  %v1711_v57 = vadd.f32 %v1686_v6, %v1525_v20  ;;  %v1791_v30 = vld [vmem:[#allocation3 + $0x6d] sm:$0xff]  ;;  %v4830_v35 = vld [vmem:[#allocation9 + $0x110] ss:$8 sps:$4 sm:$0xff]   ;;  %v1794_v29 = vld [vmem:[#allocation3 + $0xa5] sm:$0xff] }
 0x1bc   : > { %2641 = vmatpush1.bf16.msra.mxu0 %v4818_v51  ;;  %1988 = vmatmul.mubr.bf16.gmra.mxu1 %v1841_v39  ;;  %v4836_v63 = vld [vmem:[#allocation9 + $0x1a0] ss:$8 sps:$4 sm:$0xff]   ;;  %v1803_v62 = vpack.c.bf16 %v1791_v30, %v1790_v55  ;;  %v4844_v37 = vld [vmem:[#allocation9 + $0x194] ss:$8 sps:$4 sm:$0xff]   ;;  %v4841_v1 = vld [vmem:[#allocation9 + $0x104] ss:$8 sps:$4 sm:$0xff]  }
 0x1bd   : > { %2181 = vmatmul.mubr.bf16.gmra.mxu0 %v1801_v38  ;;  %1780 = vst [vmem:[#allocation3 + $0xc8] sm:$0xff] %v1748_v7  ;;  %v1751_v31 = vmax.f32 %v1735_v24, 0.0  ;;  %v1733_v19 = vadd.f32 %v5578_v17, %v1711_v57  ;;  %1997 = vmatprep.mubr.bf16.mxu1 %v6298_v16  ;;  %v1828_v17 = vld [vmem:[#allocation3 + $0x46] sm:$0xff]  ;;  %v4842_v33 = vld [vmem:[#allocation9 + $0x190] ss:$8 sps:$4 sm:$0xff]  }
 0x1be   : > { %2190 = vmatprep.mubr.bf16.mxu0 %v6298_v16  ;;  %2377 = vmatpush1.bf16.msra.mxu1 %v4806_v15  ;;  %v1842_v23 = vpack.c.bf16 %v1829_v50, %v1828_v17  ;;  %v1830_v52 = vld [vmem:[#allocation3 + $0x66] sm:$0xff]  ;;  %v1835_v20 = vld [vmem:[#allocation3 + $0xae] sm:$0xff]  ;;  %v4848_v53 = vld [vmem:[#allocation9 + $0x270] ss:$8 sps:$4 sm:$0xff]  }
 0x1bf   : > { %2642 = vmatprep.subr.bf16.mxu0 %v4826_v42  ;;  %1783 = vst [vmem:[#allocation3 + $0xf0] sm:$0xff] %v1751_v31  ;;  %v1749_v48 = vmax.f32 %v1733_v19, 0.0  ;;  %2378 = vmatprep.subr.bf16.mxu1 %v4811_v26  ;;  %v5663_v8 = vpack.c.bf16 %v1751_v31, %v1750_v9  ;;  %v1843_v11 = vpack.c.bf16 %v1831_v14, %v1830_v52  ;;  %v4847_v34 = vld [vmem:[#allocation9 + $0x184] ss:$8 sps:$4 sm:$0xff]   ;;  %v4839_v13 = vld [vmem:[#allocation9 + $0x100] ss:$8 sps:$4 sm:$0xff]  }
 0x1c0   : > { %2643 = vmatpush1.bf16.msra.mxu0 %v4824_v41  ;;  %v4845_v4 = vld [vmem:[#allocation9 + $0x180] ss:$8 sps:$4 sm:$0xff]   ;;  %v4850_v36 = vld [vmem:[#allocation9 + $0x274] ss:$8 sps:$4 sm:$0xff]   ;;  %v4853_v17 = vld [vmem:[#allocation9 + $0x264] ss:$8 sps:$4 sm:$0xff]  }
 0x1c1   : > { %2644 = vmatprep.subr.bf16.mxu0 %v4829_v59  ;;  %1781 = vst [vmem:[#allocation3 + $0xd0] sm:$0xff] %v1749_v48  ;;  %v5665_v45 = vpack.c.bf16 %v1749_v48, %v1748_v7  ;;  %v1833_v0 = vld [vmem:[#allocation3 + $0x8e] sm:$0xff]  ;;  %v1832_v51 = vld [vmem:[#allocation3 + $0x86] sm:$0xff]  ;;  %v4863_v58 = vld [vmem:[#allocation9 + $0x2f0] ss:$8 sps:$4 sm:$0xff]  }
 0x1c2   : > { %2379 = vmatpush1.bf16.msra.mxu1 %v4809_v44  ;;  %v1793_v49 = vld [vmem:[#allocation3 + $0x8d] sm:$0xff]  ;;  %v1792_v54 = vld [vmem:[#allocation3 + $0x85] sm:$0xff]  ;;  %v1844_v6 = vpack.c.bf16 %v1833_v0, %v1832_v51  ;;  %v4872_v14 = vld [vmem:[#allocation9 + $0x2d0] ss:$8 sps:$4 sm:$0xff]  }
 0x1c3   : > { %2380 = vmatprep.subr.bf16.mxu1 %v4814_v46  ;;  %v1804_v9 = vpack.c.bf16 %v1793_v49, %v1792_v54  ;;  %v4865_v18 = vld [vmem:[#allocation9 + $0x2f4] ss:$8 sps:$4 sm:$0xff]   ;;  %v1795_v40 = vld [vmem:[#allocation3 + $0xad] sm:$0xff]  ;;  %v4878_v54 = vld [vmem:[#allocation9 + $0x210] ss:$8 sps:$4 sm:$0xff]  }
 0x1c4   : > { %2645 = vmatpush1.bf16.msra.mxu0 %v4827_v2  ;;  %1998 = vmatmul.mubr.bf16.gmra.mxu1 %v1842_v23  ;;  %v1834_v5 = vld [vmem:[#allocation3 + $0xa6] sm:$0xff]  ;;  %v1805_v38 = vpack.c.bf16 %v1795_v40, %v1794_v29  ;;  %v2252_v48 = vld [vmem:[#allocation3 + $0xf] sm:$0xff] }
 0x1c5   : > { %2191 = vmatmul.mubr.bf16.gmra.mxu0 %v1802_v25  ;;  %2007 = vmatprep.mubr.bf16.mxu1 %v6298_v16  ;;  %v1845_v39 = vpack.c.bf16 %v1835_v20, %v1834_v5  ;;  %v1836_v7 = vld [vmem:[#allocation3 + $0xc6] sm:$0xff]  ;;  %v2256_v52 = vld [vmem:[#allocation3 + $0x4f] sm:$0xff] }
 0x1c6   : > { %2200 = vmatprep.mubr.bf16.mxu0 %v6298_v16  ;;  %2381 = vmatpush1.bf16.msra.mxu1 %v4812_v27  ;;  %v1796_v24 = vld [vmem:[#allocation3 + $0xc5] sm:$0xff]  ;;  %v1839_v41 = vld [vmem:[#allocation3 + $0xee] sm:$0xff] }
 0x1c7   : > { %2646 = vmatprep.subr.bf16.mxu0 %v4835_v56  ;;  %2382 = vmatprep.subr.bf16.mxu1 %v4823_v47  ;;  %v1799_v59 = vld [vmem:[#allocation3 + $0xed] sm:$0xff]  ;;  %v1798_v19 = vld [vmem:[#allocation3 + $0xe5] sm:$0xff] }
 0x1c8   : > { %2647 = vmatpush1.bf16.msra.mxu0 %v4833_v10  ;;  %v1837_v15 = vld [vmem:[#allocation3 + $0xce] sm:$0xff]  ;;  %v1838_v31 = vld [vmem:[#allocation3 + $0xe6] sm:$0xff]  ;;  %v1807_v46 = vpack.c.bf16 %v1799_v59, %v1798_v19 }
 0x1c9   : > { %2648 = vmatprep.subr.bf16.mxu0 %v4838_v12  ;;  %v1797_v42 = vld [vmem:[#allocation3 + $0xcd] sm:$0xff]  ;;  %v1846_v57 = vpack.c.bf16 %v1837_v15, %v1836_v7  ;;  %v1847_v44 = vpack.c.bf16 %v1839_v41, %v1838_v31  ;;  %v4856_v27 = vld [vmem:[#allocation9 + $0x254] ss:$8 sps:$4 sm:$0xff]  }
 0x1ca   : > { %2383 = vmatpush1.bf16.msra.mxu1 %v4821_v60  ;;  %v1806_v26 = vpack.c.bf16 %v1797_v42, %v1796_v24  ;;  %v2251_v50 = vld [vmem:[#allocation3 + $0x7] sm:$0xff]  ;;  %v2254_v56 = vld [vmem:[#allocation3 + $0x2f] sm:$0xff]  ;;  %v4854_v60 = vld [vmem:[#allocation9 + $0x250] ss:$8 sps:$4 sm:$0xff]  }
 0x1cb   : > { %2384 = vmatprep.subr.bf16.mxu1 %v4832_v61  ;;  %v2267_v2 = vpack.c.bf16 %v2252_v48, %v2251_v50  ;;  %v4868_v23 = vld [vmem:[#allocation9 + $0x2e4] ss:$8 sps:$4 sm:$0xff]   ;;  %v4851_v25 = vld [vmem:[#allocation9 + $0x260] ss:$8 sps:$4 sm:$0xff]   ;;  %v4874_v61 = vld [vmem:[#allocation9 + $0x2d4] ss:$8 sps:$4 sm:$0xff]  }
 0x1cc   : > { %2649 = vmatpush1.bf16.msra.mxu0 %v4836_v63  ;;  %2008 = vmatmul.mubr.bf16.gmra.mxu1 %v1843_v11  ;;  %v4866_v47 = vld [vmem:[#allocation9 + $0x2e0] ss:$8 sps:$4 sm:$0xff]   ;;  %v4877_v30 = vld [vmem:[#allocation9 + $0x2c4] ss:$8 sps:$4 sm:$0xff]   ;;  %v4862_v55 = vld [vmem:[#allocation9 + $0x234] ss:$8 sps:$4 sm:$0xff]  }
 0x1cd   : > { %2201 = vmatmul.mubr.bf16.gmra.mxu0 %v1803_v62  ;;  %2017 = vmatprep.mubr.bf16.mxu1 %v6298_v16  ;;  %v2253_v10 = vld [vmem:[#allocation3 + $0x27] sm:$0xff]  ;;  %v2260_v40 = vld [vmem:[#allocation3 + $0x8f] sm:$0xff] }
 0x1ce   : > { %2210 = vmatprep.mubr.bf16.mxu0 %v6298_v16  ;;  %2385 = vmatpush1.bf16.msra.mxu1 %v4830_v35  ;;  %v2268_v12 = vpack.c.bf16 %v2254_v56, %v2253_v10  ;;  %v4857_v63 = vld [vmem:[#allocation9 + $0x240] ss:$8 sps:$4 sm:$0xff]   ;;  %v4880_v0 = vld [vmem:[#allocation9 + $0x214] ss:$8 sps:$4 sm:$0xff]   ;;  %v4901_v48 = vld [vmem:[#allocation9 + $0x364] ss:$8 sps:$4 sm:$0xff]  }
 0x1cf   : > { %2650 = vmatprep.subr.bf16.mxu0 %v4844_v37  ;;  %2386 = vmatprep.subr.bf16.mxu1 %v4841_v1  ;;  %v4875_v11 = vld [vmem:[#allocation9 + $0x2c0] ss:$8 sps:$4 sm:$0xff]   ;;  %v4860_v37 = vld [vmem:[#allocation9 + $0x230] ss:$8 sps:$4 sm:$0xff]   ;;  %v4883_v1 = vld [vmem:[#allocation9 + $0x2b4] ss:$8 sps:$4 sm:$0xff]  }
 0x1d0   : > { %2651 = vmatpush1.bf16.msra.mxu0 %v4842_v33  ;;  %v2255_v62 = vld [vmem:[#allocation3 + $0x47] sm:$0xff]  ;;  %v4881_v33 = vld [vmem:[#allocation9 + $0x2b0] ss:$8 sps:$4 sm:$0xff]   ;;  %v2264_v7 = vld [vmem:[#allocation3 + $0xcf] sm:$0xff] }
 0x1d1   : > { %2652 = vmatprep.subr.bf16.mxu0 %v4847_v34  ;;  %v2269_v35 = vpack.c.bf16 %v2256_v52, %v2255_v62  ;;  %v4886_v34 = vld [vmem:[#allocation9 + $0x2a4] ss:$8 sps:$4 sm:$0xff]   ;;  %v4884_v49 = vld [vmem:[#allocation9 + $0x2a0] ss:$8 sps:$4 sm:$0xff]   ;;  %v4898_v29 = vld [vmem:[#allocation9 + $0x374] ss:$8 sps:$4 sm:$0xff]  }
 0x1d2   : > { %2387 = vmatpush1.bf16.msra.mxu1 %v4839_v13  ;;  %v4869_v13 = vld [vmem:[#allocation9 + $0x220] ss:$8 sps:$4 sm:$0xff]   ;;  %v4907_v56 = vld [vmem:[#allocation9 + $0x344] ss:$8 sps:$4 sm:$0xff]  }
 0x1d3   : > { %2904 = vmatprep.subr.bf16.mxu1 %v4850_v36  ;;  %v2257_v36 = vld [vmem:[#allocation3 + $0x67] sm:$0xff]  ;;  %v2784_v59 = vld [vmem:[#allocation3 + $0x11] sm:$0xff] }
 0x1d4   : > { %2653 = vmatpush1.bf16.msra.mxu0 %v4845_v4  ;;  %2018 = vmatmul.mubr.bf16.gmra.mxu1 %v1844_v6  ;;  %v2258_v4 = vld [vmem:[#allocation3 + $0x6f] sm:$0xff]  ;;  %v4892_v6 = vld [vmem:[#allocation9 + $0x294] ss:$8 sps:$4 sm:$0xff]  }
 0x1d5   : > { %2211 = vmatmul.mubr.bf16.gmra.mxu0 %v1804_v9  ;;  %2027 = vmatprep.mubr.bf16.mxu1 %v6298_v16  ;;  %v2270_v51 = vpack.c.bf16 %v2258_v4, %v2257_v36  ;;  %v4890_v9 = vld [vmem:[#allocation9 + $0x290] ss:$8 sps:$4 sm:$0xff]   ;;  %v4887_v20 = vld [vmem:[#allocation9 + $0x200] ss:$8 sps:$4 sm:$0xff]   ;;  %v4913_v52 = vld [vmem:[#allocation9 + $0x324] ss:$8 sps:$4 sm:$0xff]  }
 0x1d6   : > { %2220 = vmatprep.mubr.bf16.mxu0 %v6298_v16  ;;  %3170 = vmatprep.subr.bf16.mxu0 %v4865_v18  ;;  %v4895_v18 = vld [vmem:[#allocation9 + $0x284] ss:$8 sps:$4 sm:$0xff]   ;;  %v4893_v5 = vld [vmem:[#allocation9 + $0x280] ss:$8 sps:$4 sm:$0xff]  }
 0x1d7   : > { %v2261_v15 = vld [vmem:[#allocation3 + $0xa7] sm:$0xff]  ;;  %v3050_v19 = vld [vmem:[#allocation3 + $0x12] sm:$0xff] }
 0x1d8   : > { %v2263_v24 = vld [vmem:[#allocation3 + $0xc7] sm:$0xff]  ;;  %v2788_v10 = vld [vmem:[#allocation3 + $0x51] sm:$0xff] }
 0x1d9   : > { %v3049_v31 = vld [vmem:[#allocation3 + $0xa] sm:$0xff] }
 0x1da   : > { %v4899_v50 = vld [vmem:[#allocation9 + $0x360] ss:$8 sps:$4 sm:$0xff]  }
 0x1db   : > { %v4911_v62 = vld [vmem:[#allocation9 + $0x320] ss:$8 sps:$4 sm:$0xff]  }
 0x1dc   : > { %2028 = vmatmul.mubr.bf16.gmra.mxu1 %v1845_v39  ;;  %v2259_v39 = vld [vmem:[#allocation3 + $0x87] sm:$0xff] }
 0x1dd   : > { %2221 = vmatmul.mubr.bf16.gmra.mxu0 %v1805_v38  ;;  %2037 = vmatprep.mubr.bf16.mxu1 %v6298_v16  ;;  %v2271_v38 = vpack.c.bf16 %v2260_v40, %v2259_v39  ;;  %v2791_v4 = vld [vmem:[#allocation3 + $0x89] sm:$0xff]  ;;  %v2796_v39 = vld [vmem:[#allocation3 + $0xd1] sm:$0xff] }
 0x1de   : > { %2230 = vmatprep.mubr.bf16.mxu0 %v6298_v16  ;;  %v3057_v36 = vld [vmem:[#allocation3 + $0x8a] sm:$0xff] }
 0x1e4   : > { %2038 = vmatmul.mubr.bf16.gmra.mxu1 %v1846_v57  ;;  %v2273_v57 = vpack.c.bf16 %v2264_v7, %v2263_v24  ;;  %v2797_v7 = vld [vmem:[#allocation3 + $0xe9] sm:$0xff]  ;;  %v2798_v24 = vld [vmem:[#allocation3 + $0xf1] sm:$0xff] }
 0x1e5   : > { %2231 = vmatmul.mubr.bf16.gmra.mxu0 %v1806_v26  ;;  %2047 = vmatprep.mubr.bf16.mxu1 %v6298_v16  ;;  %v2265_v26 = vld [vmem:[#allocation3 + $0xe7] sm:$0xff] }
 0x1e6   : > { %2240 = vmatprep.mubr.bf16.mxu0 %v6298_v16 }
 0x1ec   : > { %2048 = vmatmul.mubr.bf16.gmra.mxu1 %v1847_v44  ;;  %v4896_v44 = vld [vmem:[#allocation9 + $0x370] ss:$8 sps:$4 sm:$0xff]  }
 0x1ed   : > { %2241 = vmatmul.mubr.bf16.gmra.mxu0 %v1807_v46  ;;  %2404 = vmatprep.mubr.bf16.mxu1 %v6298_v16  ;;  %v3065_v46 = vpack.c.bf16 %v3050_v19, %v3049_v31 }
 0x1ee   : > { %2670 = vmatprep.mubr.bf16.mxu0 %v6298_v16 }
 0x1f4   : > { %2405 = vmatmul.mubr.bf16.vlgmr.msra.gmra.mxu1 %v2267_v2  ;;  %v2786_v2 = vld [vmem:[#allocation3 + $0x31] sm:$0xff] }
 0x1f5   : > { %2671 = vmatmul.mubr.bf16.vlgmr.msra.gmra.mxu0 %v5621_v32  ;;  %2905 = vmatpush1.bf16.msra.mxu1 %v4848_v53  ;;  %v4859_v32 = vld [vmem:[#allocation9 + $0x244] ss:$8 sps:$4 sm:$0xff]   ;;  %v4904_v53 = vld [vmem:[#allocation9 + $0x354] ss:$8 sps:$4 sm:$0xff]  }
 0x1f6   : > { %2414 = vmatprep.mubr.bf16.mxu1 %v6298_v16  ;;  %2680 = vmatprep.mubr.bf16.mxu0 %v6298_v16 }
 0x1f7   : > { %2906 = vmatprep.subr.bf16.mxu1 %v4853_v17  ;;  %3171 = vmatpush1.bf16.msra.mxu0 %v4863_v58  ;;  %v3051_v17 = vld [vmem:[#allocation3 + $0x2a] sm:$0xff]  ;;  %v3052_v58 = vld [vmem:[#allocation3 + $0x32] sm:$0xff] }
 0x1f8   : > { %3172 = vmatprep.subr.bf16.mxu0 %v4868_v23 }
 0x1f9   : > { %2907 = vmatpush1.bf16.msra.mxu1 %v4851_v25  ;;  %v3066_v25 = vpack.c.bf16 %v3052_v58, %v3051_v17 }
 0x1fa   : > { %2908 = vmatprep.subr.bf16.mxu1 %v4856_v27  ;;  %v4902_v27 = vld [vmem:[#allocation9 + $0x350] ss:$8 sps:$4 sm:$0xff]  }
 0x1fb   : > { %3173 = vmatpush1.bf16.msra.mxu0 %v4866_v47  ;;  %v2787_v47 = vld [vmem:[#allocation3 + $0x49] sm:$0xff] }
 0x1fc   : > { %2415 = vmatmul.mubr.bf16.gmra.mxu1 %v2268_v12  ;;  %3174 = vmatprep.subr.bf16.mxu0 %v4874_v61  ;;  %v4905_v12 = vld [vmem:[#allocation9 + $0x340] ss:$8 sps:$4 sm:$0xff]  }
 0x1fd   : > { %2681 = vmatmul.mubr.bf16.gmra.mxu0 %v5614_v21  ;;  %2424 = vmatprep.mubr.bf16.mxu1 %v6298_v16  ;;  %v4871_v21 = vld [vmem:[#allocation9 + $0x224] ss:$8 sps:$4 sm:$0xff]  }
 0x1fe   : > { %2690 = vmatprep.mubr.bf16.mxu0 %v6298_v16  ;;  %2909 = vmatpush1.bf16.msra.mxu1 %v4854_v60  ;;  %v3053_v60 = vld [vmem:[#allocation3 + $0x4a] sm:$0xff]  ;;  %v3054_v61 = vld [vmem:[#allocation3 + $0x52] sm:$0xff] }
 0x1ff   : > { %2910 = vmatprep.subr.bf16.mxu1 %v4859_v32  ;;  %3175 = vmatpush1.bf16.msra.mxu0 %v4872_v14  ;;  %v4910_v32 = vld [vmem:[#allocation9 + $0x334] ss:$8 sps:$4 sm:$0xff]   ;;  %v2801_v14 = vpack.c.bf16 %v2788_v10, %v2787_v47 }
 0x200   : > { %3176 = vmatprep.subr.bf16.mxu0 %v4877_v30  ;;  %v3067_v30 = vpack.c.bf16 %v3054_v61, %v3053_v60 }
 0x202   : > { %2911 = vmatpush1.bf16.msra.mxu1 %v4857_v63  ;;  %v4908_v63 = vld [vmem:[#allocation9 + $0x330] ss:$8 sps:$4 sm:$0xff]  }
 0x203   : > { %2912 = vmatprep.subr.bf16.mxu1 %v4862_v55  ;;  %3177 = vmatpush1.bf16.msra.mxu0 %v4875_v11  ;;  %v2789_v55 = vld [vmem:[#allocation3 + $0x69] sm:$0xff]  ;;  %v2790_v11 = vld [vmem:[#allocation3 + $0x71] sm:$0xff] }
 0x204   : > { %2425 = vmatmul.mubr.bf16.gmra.mxu1 %v2269_v35  ;;  %3178 = vmatprep.subr.bf16.mxu0 %v4883_v1  ;;  %v3055_v35 = vld [vmem:[#allocation3 + $0x6a] sm:$0xff]  ;;  %v4916_v1 = vld [vmem:[#allocation9 + $0x314] ss:$8 sps:$4 sm:$0xff]  }
 0x205   : > { %2691 = vmatmul.mubr.bf16.gmra.mxu0 %v5644_v43  ;;  %2434 = vmatprep.mubr.bf16.mxu1 %v6298_v16  ;;  %v4889_v43 = vld [vmem:[#allocation9 + $0x204] ss:$8 sps:$4 sm:$0xff]  }
 0x206   : > { %2700 = vmatprep.mubr.bf16.mxu0 %v6298_v16  ;;  %2913 = vmatpush1.bf16.msra.mxu1 %v4860_v37  ;;  %v3056_v37 = vld [vmem:[#allocation3 + $0x72] sm:$0xff] }
 0x207   : > { %2914 = vmatprep.subr.bf16.mxu1 %v4871_v21  ;;  %3179 = vmatpush1.bf16.msra.mxu0 %v4881_v33  ;;  %v2802_v21 = vpack.c.bf16 %v2790_v11, %v2789_v55  ;;  %v3068_v33 = vpack.c.bf16 %v3056_v37, %v3055_v35 }
 0x208   : > { %3180 = vmatprep.subr.bf16.mxu0 %v4886_v34  ;;  %v4914_v34 = vld [vmem:[#allocation9 + $0x310] ss:$8 sps:$4 sm:$0xff]  }
 0x20a   : > { %2915 = vmatpush1.bf16.msra.mxu1 %v4869_v13  ;;  %v4919_v13 = vld [vmem:[#allocation9 + $0x304] ss:$8 sps:$4 sm:$0xff]  }
 0x20b   : > { %2916 = vmatprep.subr.bf16.mxu1 %v4880_v0  ;;  %3181 = vmatpush1.bf16.msra.mxu0 %v4884_v49  ;;  %v4917_v0 = vld [vmem:[#allocation9 + $0x300] ss:$8 sps:$4 sm:$0xff]  }
 0x20c   : > { %2435 = vmatmul.mubr.bf16.gmra.mxu1 %v2270_v51  ;;  %3182 = vmatprep.subr.bf16.mxu0 %v4892_v6  ;;  %v2792_v49 = vld [vmem:[#allocation3 + $0x91] sm:$0xff] }
 0x20d   : > { %2701 = vmatmul.mubr.bf16.gmra.mxu0 %v5637_v28  ;;  %2444 = vmatprep.mubr.bf16.mxu1 %v6298_v16  ;;  %v2262_v28 = vld [vmem:[#allocation3 + $0xaf] sm:$0xff] }
 0x20e   : > { %2710 = vmatprep.mubr.bf16.mxu0 %v6298_v16  ;;  %2917 = vmatpush1.bf16.msra.mxu1 %v4878_v54  ;;  %v2272_v42 = vpack.c.bf16 %v2262_v28, %v2261_v15  ;;  %v3058_v51 = vld [vmem:[#allocation3 + $0x92] sm:$0xff]  ;;  %v2803_v54 = vpack.c.bf16 %v2792_v49, %v2791_v4  ;;  %v4921_v49 = vld [vmem:[#allocation10 + $0x38] sm:$0xff]  }
 0x20f   : > { %2918 = vmatprep.subr.bf16.mxu1 %v4889_v43  ;;  %3183 = vmatpush1.bf16.msra.mxu0 %v4890_v9  ;;  %v3069_v6 = vpack.c.bf16 %v3058_v51, %v3057_v36  ;;  %v2793_v43 = vld [vmem:[#allocation3 + $0xa9] sm:$0xff]  ;;  %v2794_v9 = vld [vmem:[#allocation3 + $0xb1] sm:$0xff] }
 0x210   : > { %3184 = vmatprep.subr.bf16.mxu0 %v4895_v18  ;;  %v3059_v18 = vld [vmem:[#allocation3 + $0xaa] sm:$0xff]  ;;  %v2804_v40 = vpack.c.bf16 %v2794_v9, %v2793_v43  ;;  %v3062_v28 = vld [vmem:[#allocation3 + $0xd2] sm:$0xff] }
 0x211   : > { %v3322_v4 = vld [vmem:[#allocation3 + $0x73] sm:$0xff] }
 0x212   : > { %2919 = vmatpush1.bf16.msra.mxu1 %v4887_v20  ;;  %v3060_v20 = vld [vmem:[#allocation3 + $0xb2] sm:$0xff] }
 0x213   : > { %3185 = vmatpush1.bf16.msra.mxu0 %v4893_v5  ;;  %3436 = vmatprep.subr.bf16.mxu1 %v4898_v29  ;;  %v3070_v5 = vpack.c.bf16 %v3060_v20, %v3059_v18  ;;  %v2795_v29 = vld [vmem:[#allocation3 + $0xc9] sm:$0xff] }
 0x214   : > { %2445 = vmatmul.mubr.bf16.gmra.mxu1 %v2271_v38  ;;  %v3061_v38 = vld [vmem:[#allocation3 + $0xca] sm:$0xff]  ;;  %v2805_v15 = vpack.c.bf16 %v2796_v39, %v2795_v29 }
 0x215   : > { %2711 = vmatmul.mubr.bf16.gmra.mxu0 %v5657_v22  ;;  %2454 = vmatprep.mubr.bf16.mxu1 %v6298_v16  ;;  %v2266_v22 = vld [vmem:[#allocation3 + $0xef] sm:$0xff] }
 0x216   : > { %2720 = vmatprep.mubr.bf16.mxu0 %v6298_v16  ;;  %v2274_v41 = vpack.c.bf16 %v2266_v22, %v2265_v26  ;;  %v3064_v22 = vld [vmem:[#allocation3 + $0xf2] sm:$0xff]  ;;  %v2806_v26 = vpack.c.bf16 %v2798_v24, %v2797_v7 }
 0x217   : > { %v3323_v39 = vld [vmem:[#allocation3 + $0x8b] sm:$0xff] }
 0x21c   : > { %2455 = vmatmul.mubr.bf16.gmra.mxu1 %v2272_v42  ;;  %v3071_v42 = vpack.c.bf16 %v3062_v28, %v3061_v38  ;;  %v3324_v28 = vld [vmem:[#allocation3 + $0x93] sm:$0xff] }
 0x21d   : > { %2721 = vmatmul.mubr.bf16.gmra.mxu0 %v5654_v3  ;;  %2464 = vmatprep.mubr.bf16.mxu1 %v6298_v16  ;;  %v2783_v3 = vld [vmem:[#allocation3 + $0x9] sm:$0xff] }
 0x21e   : > { %2730 = vmatprep.mubr.bf16.mxu0 %v6298_v16 }
 0x224   : > { %2465 = vmatmul.mubr.bf16.gmra.mxu1 %v2273_v57  ;;  %v3063_v57 = vld [vmem:[#allocation3 + $0xea] sm:$0xff] }
 0x225   : > { %2731 = vmatmul.mubr.bf16.gmra.mxu0 %v5665_v45  ;;  %2474 = vmatprep.mubr.bf16.mxu1 %v6298_v16  ;;  %v2799_v45 = vpack.c.bf16 %v2784_v59, %v2783_v3  ;;  %v3315_v3 = vld [vmem:[#allocation3 + $0xb] sm:$0xff]  ;;  %v3316_v59 = vld [vmem:[#allocation3 + $0x13] sm:$0xff] }
 0x226   : > { %2740 = vmatprep.mubr.bf16.mxu0 %v6298_v16  ;;  %v3331_v31 = vpack.c.bf16 %v3316_v59, %v3315_v3 }
 0x22c   : > { %2475 = vmatmul.mubr.bf16.gmra.mxu1 %v2274_v41  ;;  %v3072_v41 = vpack.c.bf16 %v3064_v22, %v3063_v57 }
 0x22d   : > { %2741 = vmatmul.mubr.bf16.gmra.mxu0 %v5663_v8  ;;  %2936 = vmatprep.mubr.bf16.mxu1 %v6298_v16  ;;  %v2785_v8 = vld [vmem:[#allocation3 + $0x29] sm:$0xff] }
 0x22e   : > { %3202 = vmatprep.mubr.bf16.mxu0 %v6298_v16  ;;  %v2800_v23 = vpack.c.bf16 %v2786_v2, %v2785_v8  ;;  %v3317_v8 = vld [vmem:[#allocation3 + $0x2b] sm:$0xff] }
 0x234   : > { %2937 = vmatmul.mubr.bf16.vlgmr.msra.gmra.mxu1 %v2799_v45 }
 0x235   : > { %3203 = vmatmul.mubr.bf16.vlgmr.msra.gmra.mxu0 %v3065_v46  ;;  %3437 = vmatpush1.bf16.msra.mxu1 %v4896_v44 }
 0x236   : > { %2946 = vmatprep.mubr.bf16.mxu1 %v6298_v16  ;;  %3212 = vmatprep.mubr.bf16.mxu0 %v6298_v16 }
 0x237   : > { %3438 = vmatprep.subr.bf16.mxu1 %v4901_v48 }
 0x239   : > { %3439 = vmatpush1.bf16.msra.mxu1 %v4899_v50 }
 0x23a   : > { %3440 = vmatprep.subr.bf16.mxu1 %v4904_v53  ;;  %v3318_v53 = vld [vmem:[#allocation3 + $0x33] sm:$0xff] }
 0x23c   : > { %2947 = vmatmul.mubr.bf16.gmra.mxu1 %v2800_v23 }
 0x23d   : > { %3213 = vmatmul.mubr.bf16.gmra.mxu0 %v3066_v25  ;;  %2956 = vmatprep.mubr.bf16.mxu1 %v6298_v16 }
 0x23e   : > { %3222 = vmatprep.mubr.bf16.mxu0 %v6298_v16  ;;  %3441 = vmatpush1.bf16.msra.mxu1 %v4902_v27  ;;  %v3332_v27 = vpack.c.bf16 %v3318_v53, %v3317_v8  ;;  %v3326_v8 = vld [vmem:[#allocation3 + $0xb3] sm:$0xff] }
 0x23f   : > { %3442 = vmatprep.subr.bf16.mxu1 %v4907_v56  ;;  %v4924_v53 = vld [vmem:[#allocation10 + $0x68] sm:$0xff]  }
 0x242   : > { %3443 = vmatpush1.bf16.msra.mxu1 %v4905_v12 }
 0x243   : > { %3444 = vmatprep.subr.bf16.mxu1 %v4910_v32  ;;  %v3319_v32 = vld [vmem:[#allocation3 + $0x4b] sm:$0xff] }
 0x244   : > { %2957 = vmatmul.mubr.bf16.gmra.mxu1 %v2801_v14  ;;  %v3320_v14 = vld [vmem:[#allocation3 + $0x53] sm:$0xff] }
 0x245   : > { %3223 = vmatmul.mubr.bf16.gmra.mxu0 %v3067_v30  ;;  %2966 = vmatprep.mubr.bf16.mxu1 %v6298_v16 }
 0x246   : > { %3232 = vmatprep.mubr.bf16.mxu0 %v6298_v16  ;;  %3445 = vmatpush1.bf16.msra.mxu1 %v4908_v63 }
 0x247   : > { %3446 = vmatprep.subr.bf16.mxu1 %v4913_v52 }
 0x24a   : > { %3447 = vmatpush1.bf16.msra.mxu1 %v4911_v62  ;;  %v3333_v62 = vpack.c.bf16 %v3320_v14, %v3319_v32 }
 0x24b   : > { %3448 = vmatprep.subr.bf16.mxu1 %v4916_v1 }
 0x24c   : > { %2967 = vmatmul.mubr.bf16.gmra.mxu1 %v2802_v21 }
 0x24d   : > { %3233 = vmatmul.mubr.bf16.gmra.mxu0 %v3068_v33  ;;  %2976 = vmatprep.mubr.bf16.mxu1 %v6298_v16 }
 0x24e   : > { %3242 = vmatprep.mubr.bf16.mxu0 %v6298_v16  ;;  %3449 = vmatpush1.bf16.msra.mxu1 %v4914_v34  ;;  %v3321_v34 = vld [vmem:[#allocation3 + $0x6b] sm:$0xff] }
 0x24f   : > { %3450 = vmatprep.subr.bf16.mxu1 %v4919_v13  ;;  %v3334_v9 = vpack.c.bf16 %v3322_v4, %v3321_v34  ;;  %v4926_v34 = vld [vmem:[#allocation10 + $0x60] sm:$0xff]  }
 0x250   : > { %v4927_v4 = vld [vmem:[#allocation10 + $0x20] sm:$0xff]  }
 0x252   : > { %3451 = vmatpush1.bf16.msra.mxu1 %v4917_v0  ;;  %v4920_v0 = vld [vmem:[#allocation10 + $0x78] sm:$0xff]  }
 0x253   : > { %4424 = vmatprep.subr.bf16.mxu0 %v4920_v0 }
 0x254   : > { %2977 = vmatmul.mubr.bf16.gmra.mxu1 %v2803_v54  ;;  %4425 = vmatpush3.bf16.msra.mxu0 %v4921_v49 }
 0x255   : > { %3243 = vmatmul.mubr.bf16.gmra.mxu0 %v3069_v6  ;;  %2986 = vmatprep.mubr.bf16.mxu1 %v6298_v16 }
 0x256   : > { %3252 = vmatprep.mubr.bf16.mxu0 %v6298_v16 }
 0x25c   : > { %2987 = vmatmul.mubr.bf16.gmra.mxu1 %v2804_v40 }
 0x25d   : > { %3253 = vmatmul.mubr.bf16.gmra.mxu0 %v3070_v5  ;;  %2996 = vmatprep.mubr.bf16.mxu1 %v6298_v16 }
 0x25e   : > { %3262 = vmatprep.mubr.bf16.mxu0 %v6298_v16 }
 0x264   : > { %2997 = vmatmul.mubr.bf16.gmra.mxu1 %v2805_v15  ;;  %v4922_v15 = vld [vmem:[#allocation10 + $0x70] sm:$0xff]  }
 0x265   : > { %3263 = vmatmul.mubr.bf16.gmra.mxu0 %v3071_v42  ;;  %3006 = vmatprep.mubr.bf16.mxu1 %v6298_v16  ;;  %v4923_v42 = vld [vmem:[#allocation10 + $0x30] sm:$0xff]  }
 0x266   : > { %3272 = vmatprep.mubr.bf16.mxu0 %v6298_v16  ;;  %4426 = vmatprep.subr.bf16.mxu0 %v4922_v15 }
 0x267   : > { %4427 = vmatpush3.bf16.msra.mxu0 %v4923_v42  ;;  %v3329_v42 = vld [vmem:[#allocation3 + $0xeb] sm:$0xff] }
 0x268   : > { %4428 = vmatprep.subr.bf16.mxu0 %v4924_v53 }
 0x26c   : > { %3007 = vmatmul.mubr.bf16.gmra.mxu1 %v2806_v26 }
 0x26d   : > { %3273 = vmatmul.mubr.bf16.gmra.mxu0 %v3072_v41  ;;  %3468 = vmatprep.mubr.bf16.mxu1 %v6298_v16  ;;  %v3335_v41 = vpack.c.bf16 %v3324_v28, %v3323_v39 }
 0x274   : > { %v1979_v19 = vpop.f32.mrf.mxu1  ;;  %v2172_v44 = vpop.f32.mrf.mxu0  ;;  %3469 = vmatmul.mubr.bf16.vlgmr.msra.gmra.mxu1 %v3331_v31 }
 0x275   : > { %v5718_v45 = vadd.f32 %v2172_v44, %v1979_v19  ;;  %3478 = vmatprep.mubr.bf16.mxu1 %v6298_v16 }
 0x276   : > { %v1981_v46 = vpop.f32.mrf.mxu1  ;;  %v2174_v48 = vpop.f32.mrf.mxu0 }
 0x277   : > { %v5721_v50 = vadd.f32 %v2174_v48, %v1981_v46  ;;  %v3325_v46 = vld [vmem:[#allocation3 + $0xab] sm:$0xff] }
 0x278   : > { %v1983_v2 = vpop.f32.mrf.mxu1  ;;  %v2176_v17 = vpop.f32.mrf.mxu0 }
 0x279   : > { %v5723_v58 = vadd.f32 %v2176_v17, %v1983_v2  ;;  %v4925_v2 = vld [vmem:[#allocation10 + $0x28] sm:$0xff]  }
 0x27a   : > { %v5725_v23 = vpop.f32.mrf.mxu1  ;;  %v5727_v25 = vpop.f32.mrf.mxu0  ;;  %4429 = vmatpush3.bf16.msra.mxu0 %v4925_v2 }
 0x27b   : > { %4430 = vmatprep.subr.bf16.mxu0 %v4926_v34 }
 0x27c   : > { %v1989_v56 = vpop.f32.mrf.mxu1  ;;  %3479 = vmatmul.mubr.bf16.gmra.mxu1 %v3332_v27 }
 0x27d   : > { %v2182_v47 = vpop.f32.mrf.mxu0  ;;  %3488 = vmatprep.mubr.bf16.mxu1 %v6298_v16 }
 0x27e   : > { %v5729_v10 = vadd.f32 %v2182_v47, %v1989_v56  ;;  %v1991_v12 = vpop.f32.mrf.mxu1  ;;  %4431 = vmatpush3.bf16.msra.mxu0 %v4927_v4 }
 0x27f   : > { %v2184_v60 = vpop.f32.mrf.mxu0 }
 0x280   : > { %v5732_v61 = vadd.f32 %v2184_v60, %v1991_v12  ;;  %v1993_v30 = vpop.f32.mrf.mxu1  ;;  %v3336_v60 = vpack.c.bf16 %v3326_v8, %v3325_v46 }
 0x281   : > { %v2186_v63 = vpop.f32.mrf.mxu0 }
 0x282   : > { %v5734_v52 = vadd.f32 %v2186_v63, %v1993_v30  ;;  %v5736_v55 = vpop.f32.mrf.mxu1 }
 0x283   : > { %v5738_v11 = vpop.f32.mrf.mxu0 }
 0x284   : > { %v1999_v35 = vpop.f32.mrf.mxu1  ;;  %3489 = vmatmul.mubr.bf16.gmra.mxu1 %v3333_v62 }
 0x285   : > { %v2192_v37 = vpop.f32.mrf.mxu0  ;;  %3498 = vmatprep.mubr.bf16.mxu1 %v6298_v16 }
 0x286   : > { %v5740_v1 = vadd.f32 %v2192_v37, %v1999_v35  ;;  %v2001_v21 = vpop.f32.mrf.mxu1  ;;  %v3327_v37 = vld [vmem:[#allocation3 + $0xcb] sm:$0xff] }
 0x287   : > { %v2194_v33 = vpop.f32.mrf.mxu0 }
 0x288   : > { %v5743_v13 = vadd.f32 %v2194_v33, %v2001_v21  ;;  %v2003_v36 = vpop.f32.mrf.mxu1  ;;  %v3328_v33 = vld [vmem:[#allocation3 + $0xd3] sm:$0xff] }
 0x289   : > { %v2196_v51 = vpop.f32.mrf.mxu0 }
 0x28a   : > { %v5745_v54 = vadd.f32 %v2196_v51, %v2003_v36  ;;  %v5747_v6 = vpop.f32.mrf.mxu1 }
 0x28b   : > { %v5749_v43 = vpop.f32.mrf.mxu0 }
 0x28c   : > { %v2009_v18 = vpop.f32.mrf.mxu1  ;;  %3499 = vmatmul.mubr.bf16.gmra.mxu1 %v3334_v9 }
 0x28d   : > { %v2202_v20 = vpop.f32.mrf.mxu0  ;;  %3508 = vmatprep.mubr.bf16.mxu1 %v6298_v16 }
 0x28e   : > { %v5751_v40 = vadd.f32 %v2202_v20, %v2009_v18  ;;  %v2011_v5 = vpop.f32.mrf.mxu1  ;;  %v3337_v18 = vpack.c.bf16 %v3328_v33, %v3327_v37 }
 0x28f   : > { %v2204_v29 = vpop.f32.mrf.mxu0 }
 0x290   : > { %v5754_v38 = vadd.f32 %v2204_v29, %v2011_v5  ;;  %v2013_v7 = vpop.f32.mrf.mxu1 }
 0x291   : > { %v2206_v24 = vpop.f32.mrf.mxu0 }
 0x292   : > { %v5756_v57 = vadd.f32 %v2206_v24, %v2013_v7  ;;  %v5758_v22 = vpop.f32.mrf.mxu1  ;;  %v3330_v24 = vld [vmem:[#allocation3 + $0xf3] sm:$0xff] }
 0x293   : > { %v5760_v26 = vpop.f32.mrf.mxu0  ;;  %v3338_v53 = vpack.c.bf16 %v3330_v24, %v3329_v42  ;;  %v2179_v42 = vadd.f32 %v5727_v25, %v5725_v23 }
 0x294   : > { %v2019_v3 = vpop.f32.mrf.mxu1  ;;  %3509 = vmatmul.mubr.bf16.gmra.mxu1 %v3335_v41  ;;  %v4928_v41 = vld [vmem:[#allocation10 + $0x58] sm:$0xff]  }
 0x295   : > { %v2212_v59 = vpop.f32.mrf.mxu0  ;;  %3518 = vmatprep.mubr.bf16.mxu1 %v6298_v16  ;;  %4432 = vmatprep.subr.bf16.mxu0 %v4928_v41 }
 0x296   : > { %v5762_v31 = vadd.f32 %v2212_v59, %v2019_v3  ;;  %v2021_v19 = vpop.f32.mrf.mxu1  ;;  %v4929_v3 = vld [vmem:[#allocation10 + $0x18] sm:$0xff]  }
 0x297   : > { %v2214_v44 = vpop.f32.mrf.mxu0  ;;  %4433 = vmatpush3.bf16.msra.mxu0 %v4929_v3  ;;  %v4932_v3 = vld [vmem:[#allocation10 + $0x48] sm:$0xff]  }
 0x298   : > { %v5765_v48 = vadd.f32 %v2214_v44, %v2021_v19  ;;  %v2023_v17 = vpop.f32.mrf.mxu1 }
 0x299   : > { %v2216_v27 = vpop.f32.mrf.mxu0 }
 0x29a   : > { %v5767_v56 = vadd.f32 %v2216_v27, %v2023_v17  ;;  %v2025_v47 = vpop.f32.mrf.mxu1 }
 0x29b   : > { %v2218_v12 = vpop.f32.mrf.mxu0 }
 0x29c   : > { %v5769_v32 = vadd.f32 %v2218_v12, %v2025_v47  ;;  %v2029_v14 = vpop.f32.mrf.mxu1  ;;  %3519 = vmatmul.mubr.bf16.gmra.mxu1 %v3336_v60 }
 0x29d   : > { %v2222_v30 = vpop.f32.mrf.mxu0  ;;  %3528 = vmatprep.mubr.bf16.mxu1 %v6298_v16 }
 0x29e   : > { %v5771_v63 = vadd.f32 %v2222_v30, %v2029_v14  ;;  %v2031_v62 = vpop.f32.mrf.mxu1  ;;  %v4930_v14 = vld [vmem:[#allocation10 + $0x50] sm:$0xff]  }
 0x29f   : > { %v2224_v35 = vpop.f32.mrf.mxu0  ;;  %v4931_v30 = vld [vmem:[#allocation10 + $0x10] sm:$0xff]   ;;  %4434 = vmatprep.subr.bf16.mxu0 %v4930_v14 }
 0x2a0   : > { %v5774_v21 = vadd.f32 %v2224_v35, %v2031_v62  ;;  %v2033_v0 = vpop.f32.mrf.mxu1  ;;  %4435 = vmatpush3.bf16.msra.mxu0 %v4931_v30 }
 0x2a1   : > { %v2226_v49 = vpop.f32.mrf.mxu0  ;;  %4436 = vmatprep.subr.bf16.mxu0 %v4932_v3 }
 0x2a2   : > { %v5776_v36 = vadd.f32 %v2226_v49, %v2033_v0  ;;  %v2035_v51 = vpop.f32.mrf.mxu1 }
 0x2a3   : > { %v2228_v9 = vpop.f32.mrf.mxu0 }
 0x2a4   : > { %v5778_v20 = vadd.f32 %v2228_v9, %v2035_v51  ;;  %v2039_v5 = vpop.f32.mrf.mxu1  ;;  %3529 = vmatmul.mubr.bf16.gmra.mxu1 %v3337_v18 }
 0x2a5   : > { %v2232_v29 = vpop.f32.mrf.mxu0  ;;  %3538 = vmatprep.mubr.bf16.mxu1 %v6298_v16 }
 0x2a6   : > { %v5780_v39 = vadd.f32 %v2232_v29, %v2039_v5  ;;  %v2041_v28 = vpop.f32.mrf.mxu1 }
 0x2a7   : > { %v2234_v15 = vpop.f32.mrf.mxu0 }
 0x2a8   : > { %v5783_v7 = vadd.f32 %v2234_v15, %v2041_v28  ;;  %v2043_v59 = vpop.f32.mrf.mxu1 }
 0x2a9   : > { %v2236_v19 = vpop.f32.mrf.mxu0 }
 0x2aa   : > { %v5785_v44 = vadd.f32 %v2236_v19, %v2043_v59  ;;  %v2045_v46 = vpop.f32.mrf.mxu1  ;;  %v4933_v59 = vld [vmem:[#allocation10 + $0x8] sm:$0xff]  }
 0x2ab   : > { %v2238_v8 = vpop.f32.mrf.mxu0  ;;  %4437 = vmatpush3.bf16.msra.mxu0 %v4933_v59 }
 0x2ac   : > { %v5787_v2 = vadd.f32 %v2238_v8, %v2045_v46  ;;  %v2049_v16 = vpop.f32.mrf.mxu1  ;;  %3539 = vmatmul.mubr.bf16.gmra.mxu1 %v3338_v53 }
 0x2ad   : > { %v2242_v17 = vpop.f32.mrf.mxu0 }
 0x2ae   : > { %v5789_v27 = vadd.f32 %v2242_v17, %v2049_v16  ;;  %v2051_v47 = vpop.f32.mrf.mxu1 }
 0x2af   : > { %v2244_v12 = vpop.f32.mrf.mxu0 }
 0x2b0   : > { %v5791_v60 = vadd.f32 %v2244_v12, %v2051_v47  ;;  %v2053_v62 = vpop.f32.mrf.mxu1  ;;  %v2189_v12 = vadd.f32 %v5738_v11, %v5736_v55 }
 0x2b1   : > { %v2246_v35 = vpop.f32.mrf.mxu0 }
 0x2b2   : > { %v5793_v37 = vadd.f32 %v2246_v35, %v2053_v62  ;;  %v2055_v33 = vpop.f32.mrf.mxu1  ;;  %v4934_v62 = vld [vmem:[#allocation10 + $0x40] sm:$0xff]  }
 0x2b3   : > { %v2248_v34 = vpop.f32.mrf.mxu0  ;;  %v4935_v35 = vld [vmem:[#allocation10] sm:$0xff]   ;;  %4438 = vmatprep.subr.bf16.mxu0 %v4934_v62 }
 0x2b4   : > { %v5795_v4 = vadd.f32 %v2248_v34, %v2055_v33  ;;  %v2406_v0 = vpop.f32.mrf.mxu1  ;;  %4439 = vmatpush3.bf16.msra.mxu0 %v4935_v35 }
 0x2b5   : > { %v2672_v49 = vpop.f32.mrf.mxu0  ;;  %v2485_v51 = vadd.f32 %v2406_v0, %v5718_v45 }
 0x2b6   : > { %v2408_v9 = vpop.f32.mrf.mxu1 }
 0x2b7   : > { %v2674_v18 = vpop.f32.mrf.mxu0  ;;  %v5798_v5 = vadd.f32 %v2672_v49, %v2485_v51  ;;  %v2486_v29 = vadd.f32 %v2408_v9, %v5721_v50 }
 0x2b8   : > { %v2410_v28 = vpop.f32.mrf.mxu1 }
 0x2b9   : > { %v5801_v15 = vpop.f32.mrf.mxu0  ;;  %v5805_v24 = vadd.f32 %v2674_v18, %v2486_v29  ;;  %v5808_v41 = vadd.f32 %v2410_v28, %v5723_v58  ;;  %v2199_v29 = vadd.f32 %v5749_v43, %v5747_v6 }
 0x2ba   : > { %v2412_v45 = vpop.f32.mrf.mxu1 }
 0x2bb   : > { %v5810_v19 = vpop.f32.mrf.mxu0  ;;  %v5812_v46 = vadd.f32 %v2412_v45, %v2179_v42 }
 0x2bc   : > { %v2416_v50 = vpop.f32.mrf.mxu1 }
 0x2bd   : > { %v2682_v8 = vpop.f32.mrf.mxu0  ;;  %v2489_v53 = vadd.f32 %v2416_v50, %v5729_v10 }
 0x2be   : > { %v2418_v16 = vpop.f32.mrf.mxu1 }
 0x2bf   : > { %v2684_v23 = vpop.f32.mrf.mxu0  ;;  %v5815_v25 = vadd.f32 %v2682_v8, %v2489_v53  ;;  %v2490_v58 = vadd.f32 %v2418_v16, %v5732_v61 }
 0x2c0   : > { %v2420_v17 = vpop.f32.mrf.mxu1 }
 0x2c1   : > { %v5818_v47 = vpop.f32.mrf.mxu0  ;;  %v5822_v14 = vadd.f32 %v2684_v23, %v2490_v58  ;;  %v5825_v30 = vadd.f32 %v2420_v17, %v5734_v52 }
 0x2c2   : > { %v2422_v10 = vpop.f32.mrf.mxu1 }
 0x2c3   : > { %v5827_v33 = vpop.f32.mrf.mxu0  ;;  %v5829_v34 = vadd.f32 %v2422_v10, %v2189_v12 }
 0x2c4   : > { %v2426_v61 = vpop.f32.mrf.mxu1 }
 0x2c5   : > { %v2692_v0 = vpop.f32.mrf.mxu0  ;;  %v2493_v49 = vadd.f32 %v2426_v61, %v5740_v1 }
 0x2c6   : > { %v2428_v51 = vpop.f32.mrf.mxu1 }
 0x2c7   : > { %v2694_v55 = vpop.f32.mrf.mxu0  ;;  %v5832_v11 = vadd.f32 %v2692_v0, %v2493_v49  ;;  %v2494_v52 = vadd.f32 %v2428_v51, %v5743_v13 }
 0x2c8   : > { %v2430_v9 = vpop.f32.mrf.mxu1 }
 0x2c9   : > { %v5835_v18 = vpop.f32.mrf.mxu0  ;;  %v5839_v28 = vadd.f32 %v2694_v55, %v2494_v52  ;;  %v5842_v42 = vadd.f32 %v2430_v9, %v5745_v54  ;;  %v2209_v54 = vadd.f32 %v5760_v26, %v5758_v22 }
 0x2ca   : > { %v2432_v3 = vpop.f32.mrf.mxu1 }
 0x2cb   : > { %v5844_v59 = vpop.f32.mrf.mxu0  ;;  %v5846_v1 = vadd.f32 %v2432_v3, %v2199_v29 }
 0x2cc   : > { %v2436_v45 = vpop.f32.mrf.mxu1 }
 0x2cd   : > { %v2702_v50 = vpop.f32.mrf.mxu0  ;;  %v2497_v13 = vadd.f32 %v2436_v45, %v5751_v40 }
 0x2ce   : > { %v2438_v8 = vpop.f32.mrf.mxu1 }
 0x2cf   : > { %v2704_v53 = vpop.f32.mrf.mxu0  ;;  %v5849_v16 = vadd.f32 %v2702_v50, %v2497_v13  ;;  %v2498_v6 = vadd.f32 %v2438_v8, %v5754_v38 }
 0x2d0   : > { %v2440_v43 = vpop.f32.mrf.mxu1 }
 0x2d1   : > { %v5852_v23 = vpop.f32.mrf.mxu0  ;;  %v5856_v58 = vadd.f32 %v2704_v53, %v2498_v6  ;;  %v5859_v17 = vadd.f32 %v2440_v43, %v5756_v57 }
 0x2d2   : > { %v2442_v12 = vpop.f32.mrf.mxu1 }
 0x2d3   : > { %v5861_v62 = vpop.f32.mrf.mxu0  ;;  %v5863_v40 = vadd.f32 %v2442_v12, %v2209_v54 }
 0x2d4   : > { %v2446_v35 = vpop.f32.mrf.mxu1 }
 0x2d5   : > { %v2712_v10 = vpop.f32.mrf.mxu0  ;;  %v2501_v38 = vadd.f32 %v2446_v35, %v5762_v31 }
 0x2d6   : > { %v2448_v61 = vpop.f32.mrf.mxu1 }
 0x2d7   : > { %v2714_v0 = vpop.f32.mrf.mxu0  ;;  %v5866_v49 = vadd.f32 %v2712_v10, %v2501_v38  ;;  %v2502_v22 = vadd.f32 %v2448_v61, %v5765_v48 }
 0x2d8   : > { %v2450_v26 = vpop.f32.mrf.mxu1 }
 0x2d9   : > { %v5869_v51 = vpop.f32.mrf.mxu0  ;;  %v5871_v57 = vadd.f32 %v2714_v0, %v2502_v22  ;;  %v5874_v55 = vadd.f32 %v2450_v26, %v5767_v56 }
 0x2da   : > { %v2452_v52 = vpop.f32.mrf.mxu1 }
 0x2db   : > { %v5876_v9 = vpop.f32.mrf.mxu0  ;;  %v5879_v29 = vadd.f32 %v2452_v52, %v5769_v32 }
 0x2dc   : > { %6299 = vst [vmem:[#allocation19_spill] sm:$0xff] %v5876_v9  ;;  %v2456_v31 = vpop.f32.mrf.mxu1 }
 0x2dd   : > { %6300 = vst [vmem:[#allocation26_spill] sm:$0xff] %v5879_v29  ;;  %v2722_v3 = vpop.f32.mrf.mxu0  ;;  %v2505_v45 = vadd.f32 %v2456_v31, %v5771_v63 }
 0x2de   : > { %v2458_v50 = vpop.f32.mrf.mxu1 }
 0x2df   : > { %v2724_v48 = vpop.f32.mrf.mxu0  ;;  %v5882_v13 = vadd.f32 %v2722_v3, %v2505_v45  ;;  %v2506_v8 = vadd.f32 %v2458_v50, %v5774_v21 }
 0x2e0   : > { %v2460_v53 = vpop.f32.mrf.mxu1 }
 0x2e1   : > { %v5885_v6 = vpop.f32.mrf.mxu0  ;;  %v5887_v56 = vadd.f32 %v2724_v48, %v2506_v8  ;;  %v5890_v43 = vadd.f32 %v2460_v53, %v5776_v36 }
 0x2e2   : > { %6301 = vst [vmem:[#allocation29_spill] sm:$0xff] %v5885_v6  ;;  %v2462_v32 = vpop.f32.mrf.mxu1 }
 0x2e3   : > { %6302 = vst [vmem:[#allocation20_spill] sm:$0xff] %v5890_v43  ;;  %v5892_v54 = vpop.f32.mrf.mxu0  ;;  %v5895_v12 = vadd.f32 %v2462_v32, %v5778_v20 }
 0x2e4   : > { %6303 = vst [vmem:[#allocation21_spill] sm:$0xff] %v5892_v54  ;;  %v2466_v63 = vpop.f32.mrf.mxu1 }
 0x2e5   : > { %6304 = vst [vmem:[#allocation27_spill] sm:$0xff] %v5895_v12  ;;  %v2732_v35 = vpop.f32.mrf.mxu0  ;;  %v2509_v10 = vadd.f32 %v2466_v63, %v5780_v39 }
 0x2e6   : > { %v2468_v38 = vpop.f32.mrf.mxu1 }
 0x2e7   : > { %v2734_v21 = vpop.f32.mrf.mxu0  ;;  %v5898_v61 = vadd.f32 %v2732_v35, %v2509_v10  ;;  %v2510_v0 = vadd.f32 %v2468_v38, %v5783_v7 }
 0x2e8   : > { %v2470_v22 = vpop.f32.mrf.mxu1 }
 0x2e9   : > { %v5901_v26 = vpop.f32.mrf.mxu0  ;;  %v5903_v36 = vadd.f32 %v2734_v21, %v2510_v0  ;;  %v5906_v52 = vadd.f32 %v2470_v22, %v5785_v44 }
 0x2ea   : > { %6305 = vst [vmem:[#allocation31_spill] sm:$0xff] %v5901_v26  ;;  %v2472_v20 = vpop.f32.mrf.mxu1 }
 0x2eb   : > { %6306 = vst [vmem:[#allocation17_spill] sm:$0xff] %v5906_v52  ;;  %v5908_v31 = vpop.f32.mrf.mxu0  ;;  %v5911_v3 = vadd.f32 %v2472_v20, %v5787_v2 }
 0x2ec   : > { %6307 = vst [vmem:[#allocation23_spill] sm:$0xff] %v5908_v31  ;;  %v2476_v39 = vpop.f32.mrf.mxu1 }
 0x2ed   : > { %6308 = vst [vmem:[#allocation28_spill] sm:$0xff] %v5911_v3  ;;  %v2742_v45 = vpop.f32.mrf.mxu0  ;;  %v2513_v50 = vadd.f32 %v2476_v39, %v5789_v27 }
 0x2ee   : > { %v2478_v48 = vpop.f32.mrf.mxu1 }
 0x2ef   : > { %v2744_v7 = vpop.f32.mrf.mxu0  ;;  %v5914_v8 = vadd.f32 %v2742_v45, %v2513_v50  ;;  %v2514_v53 = vadd.f32 %v2478_v48, %v5791_v60 }
 0x2f0   : > { %v2480_v32 = vpop.f32.mrf.mxu1 }
 0x2f1   : > { %v5917_v63 = vpop.f32.mrf.mxu0  ;;  %v5919_v44 = vadd.f32 %v2744_v7, %v2514_v53  ;;  %v5922_v35 = vadd.f32 %v2480_v32, %v5793_v37 }
 0x2f2   : > { %6309 = vst [vmem:[#allocation33_spill] sm:$0xff] %v5917_v63  ;;  %v2482_v2 = vpop.f32.mrf.mxu1 }
 0x2f3   : > { %6310 = vst [vmem:[#allocation18_spill] sm:$0xff] %v5922_v35  ;;  %v5924_v10 = vpop.f32.mrf.mxu0  ;;  %v5927_v38 = vadd.f32 %v2482_v2, %v5795_v4 }
 0x2f4   : > { %6311 = vst [vmem:[#allocation25_spill] sm:$0xff] %v5924_v10  ;;  %v2938_v27 = vpop.f32.mrf.mxu1 }
 0x2f5   : > { %6312 = vst [vmem:[#allocation30_spill] sm:$0xff] %v5927_v38  ;;  %v5929_v21 = vpop.f32.mrf.mxu0  ;;  %v5932_v0 = vadd.f32 %v2938_v27, %v5798_v5 }
 0x2f6   : > { %v2940_v60 = vpop.f32.mrf.mxu1 }
 0x2f7   : > { %v5935_v22 = vadd.f32 %v2940_v60, %v5805_v24  ;;  %v5937_v20 = vpop.f32.mrf.mxu0 }
 0x2f8   : > { %v5939_v37 = vpop.f32.mrf.mxu1 }
 0x2f9   : > { %v5943_v45 = vpop.f32.mrf.mxu0 }
 0x2fa   : > { %v5941_v39 = vpop.f32.mrf.mxu1 }
 0x2fb   : > { %v5951_v7 = vpop.f32.mrf.mxu0 }
 0x2fc   : > { %v2948_v4 = vpop.f32.mrf.mxu1 }
 0x2fd   : > { %v5946_v50 = vadd.f32 %v2948_v4, %v5815_v25  ;;  %v5957_v32 = vpop.f32.mrf.mxu0 }
 0x2fe   : > { %v2950_v48 = vpop.f32.mrf.mxu1 }
 0x2ff   : > { %v5949_v5 = vadd.f32 %v2950_v48, %v5822_v14  ;;  %v5965_v4 = vpop.f32.mrf.mxu0 }
 0x300   : > { %v5953_v24 = vpop.f32.mrf.mxu1 }
 0x301   : > { %v5971_v10 = vpop.f32.mrf.mxu0 }
 0x302   : > { %v5955_v53 = vpop.f32.mrf.mxu1 }
 0x304   : > { %v2958_v2 = vpop.f32.mrf.mxu1 }
 0x305   : > { %v5960_v27 = vadd.f32 %v2958_v2, %v5832_v11  ;;  %v5979_v2 = vpop.f32.mrf.mxu0 }
 0x306   : > { %v2960_v60 = vpop.f32.mrf.mxu1 }
 0x307   : > { %v5963_v25 = vadd.f32 %v2960_v60, %v5839_v28  ;;  %v5985_v31 = vpop.f32.mrf.mxu0 }
 0x308   : > { %v5967_v14 = vpop.f32.mrf.mxu1 }
 0x30a   : > { %v5969_v48 = vpop.f32.mrf.mxu1 }
 0x30c   : > { %v2968_v38 = vpop.f32.mrf.mxu1 }
 0x30d   : > { %v5974_v63 = vadd.f32 %v2968_v38, %v5849_v16  ;;  %v5993_v38 = vpop.f32.mrf.mxu0 }
 0x30e   : > { %v2970_v35 = vpop.f32.mrf.mxu1 }
 0x30f   : > { %v5977_v11 = vadd.f32 %v2970_v35, %v5856_v58  ;;  %v5999_v54 = vpop.f32.mrf.mxu0 }
 0x310   : > { %v5981_v28 = vpop.f32.mrf.mxu1 }
 0x312   : > { %v5983_v60 = vpop.f32.mrf.mxu1 }
 0x314   : > { %v2978_v3 = vpop.f32.mrf.mxu1 }
 0x315   : > { %v5988_v26 = vadd.f32 %v2978_v3, %v5866_v49  ;;  %v6007_v3 = vpop.f32.mrf.mxu0 }
 0x316   : > { %v2980_v52 = vpop.f32.mrf.mxu1 }
 0x317   : > { %6313 = vst [vmem:[#allocation35_spill] sm:$0xff] %v5988_v26  ;;  %v5991_v16 = vadd.f32 %v2980_v52, %v5871_v57 }
 0x318   : > { %v5995_v58 = vpop.f32.mrf.mxu1 }
 0x319   : > { %6314 = vst [vmem:[#allocation32_spill] sm:$0xff] %v5991_v16  ;;  %6315 = vst [vmem:[#allocation22_spill] sm:$0xff] %v5995_v58  ;;  %v6013_v16 = vpop.f32.mrf.mxu0 }
 0x31a   : > { %v5997_v35 = vpop.f32.mrf.mxu1 }
 0x31b   : > { %6316 = vst [vmem:[#allocation24_spill] sm:$0xff] %v5997_v35 }
 0x31c   : > { %v2988_v12 = vpop.f32.mrf.mxu1 }
 0x31d   : > { %v6002_v6 = vadd.f32 %v2988_v12, %v5882_v13  ;;  %v6021_v12 = vpop.f32.mrf.mxu0 }
 0x31e   : > { %v2990_v43 = vpop.f32.mrf.mxu1 }
 0x31f   : > { %6317 = vst [vmem:[#allocation34_spill] sm:$0xff] %v6002_v6  ;;  %v6005_v49 = vadd.f32 %v2990_v43, %v5887_v56  ;;  %v3582_v43 = vlaneseq  ;;  %v6027_v6 = vpop.f32.mrf.mxu0 }
 0x320   : > { %v6009_v57 = vpop.f32.mrf.mxu1 }
 0x321   : > { %6318 = vst [vmem:[#allocation36_spill] sm:$0xff] %v6005_v49  ;;  %6319 = vst [vmem:[#allocation37_spill] sm:$0xff] %v6009_v57  ;;  %v3583_v9 = vshrl.u32 %v3582_v43, 7 }
 0x322   : > { %v6011_v52 = vpop.f32.mrf.mxu1 }
 0x323   : > { %6320 = vst [vmem:[#allocation38_spill] sm:$0xff] %v6011_v52 }
 0x324   : > { %v2998_v26 = vpop.f32.mrf.mxu1 }
 0x325   : > { %v6016_v35 = vadd.f32 %v2998_v26, %v5898_v61 }
 0x326   : > { %v3000_v58 = vpop.f32.mrf.mxu1 }
 0x327   : > { %6321 = vst [vmem:[#allocation39_spill] sm:$0xff] %v6016_v35  ;;  %v6019_v13 = vadd.f32 %v3000_v58, %v5903_v36  ;;  %v6035_v36 = vpop.f32.mrf.mxu0  ;;  %v3584_v35 = vsub.s32 0, %v3583_v9 }
 0x328   : > { %v6023_v56 = vpop.f32.mrf.mxu1 }
 0x329   : > { %6322 = vst [vmem:[#allocation40_spill] sm:$0xff] %v6019_v13  ;;  %6323 = vst [vmem:[#allocation41_spill] sm:$0xff] %v6023_v56  ;;  %v2753_v13 = vadd.f32 %v5801_v15, %v5808_v41  ;;  %v3284_v15 = vadd.f32 %v5937_v20, %v5935_v22 }
 0x32a   : > { %v6025_v49 = vpop.f32.mrf.mxu1 }
 0x32b   : > { %6324 = vst [vmem:[#allocation42_spill] sm:$0xff] %v6025_v49  ;;  %v3019_v43 = vadd.f32 %v5939_v37, %v2753_v13 }
 0x32c   : > { %v3008_v52 = vpop.f32.mrf.mxu1 }
 0x32d   : > { %v6030_v57 = vadd.f32 %v3008_v52, %v5914_v8  ;;  %v345_v8 = vld [vmem:[%s6230_s4] sm:$0x3]  ;;  %v2754_v52 = vadd.f32 %v5810_v19, %v5812_v46  ;;  %v3285_v19 = vadd.f32 %v5943_v45, %v3019_v43 }
 0x32e   : > { %v3010_v61 = vpop.f32.mrf.mxu1 }
 0x32f   : > { %6325 = vst [vmem:[#allocation43_spill] sm:$0xff] %v6030_v57  ;;  %v6033_v26 = vadd.f32 %v3010_v61, %v5919_v44  ;;  %v3283_v44 = vadd.f32 %v5929_v21, %v5932_v0  ;;  %v3588_v61 = vsub.s32 1, %v3583_v9  ;;  %v3020_v41 = vadd.f32 %v5941_v39, %v2754_v52 }
 0x330   : > { %v6037_v58 = vpop.f32.mrf.mxu1  ;;  %v2757_v9 = vadd.f32 %v5818_v47, %v5825_v30  ;;  %v2758_v39 = vadd.f32 %v5827_v33, %v5829_v34 }
 0x331   : > { %6326 = vst [vmem:[#allocation44_spill] sm:$0xff] %v6033_v26  ;;  %6327 = vst [vmem:[#allocation45_spill] sm:$0xff] %v6037_v58  ;;  %v6051_v26 = vpop.f32.mrf.mxu0  ;;  %v6056_v58 = vrot.slane %v345_v8, %v3584_v35  ;;  %v6059_v29 = vrot.slane %v345_v8, %v3588_v61  ;;  %v3286_v37 = vadd.f32 %v5951_v7, %v3020_v41 }
 0x332   : > { %v6041_v49 = vpop.f32.mrf.mxu1  ;;  %v3023_v35 = vadd.f32 %v5953_v24, %v2757_v9  ;;  %v3288_v7 = vadd.f32 %v5965_v4, %v5949_v5  ;;  %v2761_v5 = vadd.f32 %v5835_v18, %v5842_v42 }
 0x333   : > { %6328 = vst [vmem:[#allocation46_spill] sm:$0xff] %v6041_v49  ;;  %v6063_v21 = vpop.f32.mrf.mxu0 }
 0x334   : > { %v3470_v57 = vpop.f32.mrf.mxu1 }
 0x335   : > { %v3549_v49 = vadd.f32 %v3470_v57, %v3283_v44  ;;  %v3287_v57 = vadd.f32 %v5957_v32, %v5946_v50  ;;  %v3289_v50 = vadd.f32 %v5971_v10, %v3023_v35  ;;  %v2762_v10 = vadd.f32 %v5844_v59, %v5846_v1 }
 0x336   : > { %v3472_v56 = vpop.f32.mrf.mxu1 }
 0x337   : > { %v3550_v46 = vadd.f32 %v3472_v56, %v3284_v15  ;;  %v3592_v22 = vadd.f32 %v6056_v58, %v3549_v49  ;;  %v3024_v49 = vadd.f32 %v5955_v53, %v2758_v39  ;;  %v6077_v56 = vpop.f32.mrf.mxu0  ;;  %v3028_v39 = vadd.f32 %v5969_v48, %v2762_v10 }
 0x338   : > { %v3474_v0 = vpop.f32.mrf.mxu1 }
 0x339   : > { %v3551_v20 = vadd.f32 %v3474_v0, %v3285_v19  ;;  %v3593_v13 = vadd.f32 %v6059_v29, %v3550_v46  ;;  %v3624_v33 = vmax.f32 %v3592_v22, 0.0  ;;  %v6083_v4 = vpop.f32.mrf.mxu0  ;;  %v3290_v41 = vadd.f32 %v5979_v2, %v3024_v49 }
 0x33a   : > { %v3476_v45 = vpop.f32.mrf.mxu1  ;;  %v3027_v0 = vadd.f32 %v5967_v14, %v2761_v5  ;;  %v3291_v22 = vadd.f32 %v5985_v31, %v5960_v27  ;;  %v3292_v2 = vadd.f32 %v5993_v38, %v5963_v25  ;;  %v2765_v25 = vadd.f32 %v5852_v23, %v5859_v17 }
 0x33b   : > { %v3594_v47 = vadd.f32 %v6056_v58, %v3551_v20  ;;  %v3552_v30 = vadd.f32 %v3476_v45, %v3286_v37  ;;  %v3625_v44 = vmax.f32 %v3593_v13, 0.0  ;;  %v6097_v35 = vpop.f32.mrf.mxu0  ;;  %v3294_v49 = vadd.f32 %v6007_v3, %v3028_v39 }
 0x33c   : > { %v3480_v8 = vpop.f32.mrf.mxu1  ;;  %v3293_v27 = vadd.f32 %v5999_v54, %v3027_v0  ;;  %v2766_v54 = vadd.f32 %v5861_v62, %v5863_v40  ;;  %v3296_v3 = vadd.f32 %v6021_v12, %v5977_v11  ;;  %v2769_v11 = vadd.f32 %v5869_v51, %v5874_v55 }
 0x33d   : > { %v3626_v34 = vmax.f32 %v3594_v47, 0.0  ;;  %v3595_v24 = vadd.f32 %v6059_v29, %v3552_v30  ;;  %v3553_v52 = vadd.f32 %v3480_v8, %v3287_v57  ;;  %v6103_v48 = vpop.f32.mrf.mxu0 }
 0x33e   : > { %v3482_v32 = vpop.f32.mrf.mxu1 }
 0x33f   : > { %v3656_v43 = vpack.c.bf16 %v3626_v34, %v3624_v33  ;;  %v3627_v61 = vmax.f32 %v3595_v24, 0.0  ;;  %v3554_v15 = vadd.f32 %v3482_v32, %v3288_v7  ;;  %v3596_v19 = vadd.f32 %v6056_v58, %v3553_v52 }
 0x340   : > { %v3484_v53 = vpop.f32.mrf.mxu1  ;;  %v3031_v24 = vadd.f32 %v5981_v28, %v2765_v25 }
 0x341   : > { %v3555_v46 = vadd.f32 %v3484_v53, %v3289_v50  ;;  %v3657_v9 = vpack.c.bf16 %v3627_v61, %v3625_v44  ;;  %v3597_v18 = vadd.f32 %v6059_v29, %v3554_v15  ;;  %v3628_v1 = vmax.f32 %v3596_v19, 0.0 }
 0x342   : > { %v3486_v37 = vpop.f32.mrf.mxu1  ;;  %v3295_v50 = vadd.f32 %v6013_v16, %v5974_v63  ;;  %v3032_v44 = vadd.f32 %v5983_v60, %v2766_v54  ;;  %v3297_v16 = vadd.f32 %v6027_v6, %v3031_v24  ;;  %v6331_v6 = vld [vmem:[#allocation22_spill] sm:$0xff] }
 0x343   : > { %v3598_v42 = vadd.f32 %v6056_v58, %v3555_v46  ;;  %v3556_v20 = vadd.f32 %v3486_v37, %v3290_v41  ;;  %3800 = vmatprep.mubr.bf16.mxu0 %v3657_v9  ;;  %v3629_v13 = vmax.f32 %v3597_v18, 0.0  ;;  %v6329_v37 = vld [vmem:[#allocation26_spill] sm:$0xff] }
 0x344   : > { %v3490_v59 = vpop.f32.mrf.mxu1  ;;  %3801 = vmatmul.mubr.bf16.vlgmr.msra.gmra.mxu0 %v3656_v43  ;;  %v6117_v43 = vpop.f32.mrf.mxu0  ;;  %v3298_v46 = vadd.f32 %v6035_v36, %v3032_v44  ;;  %v6333_v36 = vld [vmem:[#allocation32_spill] sm:$0xff] }
 0x345   : > { %v3630_v14 = vmax.f32 %v3598_v42, 0.0  ;;  %v3599_v45 = vadd.f32 %v6059_v29, %v3556_v20  ;;  %v3557_v31 = vadd.f32 %v3490_v59, %v3291_v22  ;;  %v6330_v22 = vld [vmem:[#allocation19_spill] sm:$0xff]  ;;  %v3035_v42 = vadd.f32 %v6331_v6, %v2769_v11 }
 0x346   : > { %v3492_v57 = vpop.f32.mrf.mxu1  ;;  %v3260_v60 = vpop.f32.mrf.mxu0  ;;  %v2770_v18 = vadd.f32 %v6330_v22, %v6329_v37 }
 0x347   : > { %v3658_v47 = vpack.c.bf16 %v3630_v14, %v3628_v1  ;;  %v3631_v30 = vmax.f32 %v3599_v45, 0.0  ;;  %v3558_v7 = vadd.f32 %v3492_v57, %v3292_v2  ;;  %v3600_v8 = vadd.f32 %v6056_v58, %v3557_v31  ;;  %v6332_v2 = vld [vmem:[#allocation35_spill] sm:$0xff]  ;;  %v6334_v14 = vld [vmem:[#allocation24_spill] sm:$0xff] }
 0x348   : > { %v3494_v38 = vpop.f32.mrf.mxu1  ;;  %v3299_v39 = vadd.f32 %v6051_v26, %v6332_v2  ;;  %v3300_v1 = vadd.f32 %v6063_v21, %v6333_v36  ;;  %v3036_v45 = vadd.f32 %v6334_v14, %v2770_v18  ;;  %v3264_v31 = vpop.f32.mrf.mxu0  ;;  %v3301_v26 = vadd.f32 %v6077_v56, %v3035_v42  ;;  %v6339_v56 = vld [vmem:[#allocation37_spill] sm:$0xff]  ;;  %v6346_v14 = vld [vmem:[#allocation23_spill] sm:$0xff] }
 0x349   : > { %v3559_v33 = vadd.f32 %v3494_v38, %v3293_v27  ;;  %v3659_v34 = vpack.c.bf16 %v3631_v30, %v3629_v13  ;;  %v3601_v23 = vadd.f32 %v6059_v29, %v3558_v7  ;;  %v3632_v40 = vmax.f32 %v3600_v8, 0.0  ;;  %v6343_v42 = vld [vmem:[#allocation17_spill] sm:$0xff] }
 0x34a   : > { %v3496_v52 = vpop.f32.mrf.mxu1  ;;  %v3266_v54 = vpop.f32.mrf.mxu0 }
 0x34b   : > { %v3602_v17 = vadd.f32 %v6056_v58, %v3559_v33  ;;  %v3560_v32 = vadd.f32 %v3496_v52, %v3294_v49  ;;  %3808 = vmatprep.mubr.bf16.mxu0 %v3659_v34  ;;  %v3633_v5 = vmax.f32 %v3601_v23, 0.0  ;;  %v6335_v33 = vld [vmem:[#allocation20_spill] sm:$0xff]  ;;  %v6336_v34 = vld [vmem:[#allocation29_spill] sm:$0xff]  ;;  %v3302_v52 = vadd.f32 %v6083_v4, %v3036_v45 }
 0x34c   : > { %v3500_v62 = vpop.f32.mrf.mxu1  ;;  %3809 = vmatmul.mubr.bf16.gmra.mxu0 %v3658_v47  ;;  %v2773_v21 = vadd.f32 %v6336_v34, %v6335_v33  ;;  %v6341_v4 = vld [vmem:[#allocation36_spill] sm:$0xff] }
 0x34d   : > { %v3634_v28 = vmax.f32 %v3602_v17, 0.0  ;;  %v3603_v61 = vadd.f32 %v6059_v29, %v3560_v32  ;;  %v3561_v63 = vadd.f32 %v3500_v62, %v3295_v50  ;;  %v6337_v32 = vld [vmem:[#allocation27_spill] sm:$0xff] }
 0x34e   : > { %v3502_v15 = vpop.f32.mrf.mxu1  ;;  %v3039_v62 = vadd.f32 %v6339_v56, %v2773_v21  ;;  %v6352_v56 = vld [vmem:[#allocation33_spill] sm:$0xff] }
 0x34f   : > { %v3660_v53 = vpack.c.bf16 %v3634_v28, %v3632_v40  ;;  %v3635_v41 = vmax.f32 %v3603_v61, 0.0  ;;  %v3562_v19 = vadd.f32 %v3502_v15, %v3296_v3  ;;  %v3604_v9 = vadd.f32 %v6056_v58, %v3561_v63  ;;  %v6338_v3 = vld [vmem:[#allocation21_spill] sm:$0xff]  ;;  %v6340_v28 = vld [vmem:[#allocation34_spill] sm:$0xff] }
 0x350   : > { %v3504_v12 = vpop.f32.mrf.mxu1  ;;  %v2774_v44 = vadd.f32 %v6338_v3, %v6337_v32  ;;  %v3303_v61 = vadd.f32 %v6097_v35, %v6340_v28  ;;  %v3305_v35 = vadd.f32 %v6117_v43, %v3039_v62 }
 0x351   : > { %v3563_v10 = vadd.f32 %v3504_v12, %v3297_v16  ;;  %v3661_v0 = vpack.c.bf16 %v3635_v41, %v3633_v5  ;;  %v3605_v59 = vadd.f32 %v6059_v29, %v3562_v19  ;;  %v3636_v57 = vmax.f32 %v3604_v9, 0.0  ;;  %v3268_v19 = vpop.f32.mrf.mxu0 }
 0x352   : > { %v3506_v20 = vpop.f32.mrf.mxu1  ;;  %v3304_v5 = vadd.f32 %v6103_v48, %v6341_v4  ;;  %v6354_v4 = vld [vmem:[#allocation25_spill] sm:$0xff] }
 0x353   : > { %v3606_v51 = vadd.f32 %v6056_v58, %v3563_v10  ;;  %v3564_v55 = vadd.f32 %v3506_v20, %v3298_v46  ;;  %3816 = vmatprep.mubr.bf16.mxu0 %v3661_v0  ;;  %v3637_v25 = vmax.f32 %v3605_v59, 0.0  ;;  %v6344_v20 = vld [vmem:[#allocation31_spill] sm:$0xff]  ;;  %v3270_v2 = vpop.f32.mrf.mxu0 }
 0x354   : > { %v3510_v27 = vpop.f32.mrf.mxu1  ;;  %3817 = vmatmul.mubr.bf16.gmra.mxu0 %v3660_v53  ;;  %v6342_v53 = vld [vmem:[#allocation38_spill] sm:$0xff]  ;;  %v2777_v48 = vadd.f32 %v6344_v20, %v6343_v42 }
 0x355   : > { %v3638_v13 = vmax.f32 %v3606_v51, 0.0  ;;  %v3607_v47 = vadd.f32 %v6059_v29, %v3564_v55  ;;  %v3565_v30 = vadd.f32 %v3510_v27, %v3299_v39  ;;  %v3040_v41 = vadd.f32 %v6342_v53, %v2774_v44  ;;  %v6347_v27 = vld [vmem:[#allocation41_spill] sm:$0xff]  ;;  %v6351_v44 = vld [vmem:[#allocation18_spill] sm:$0xff] }
 0x356   : > { %v3512_v7 = vpop.f32.mrf.mxu1  ;;  %v3043_v43 = vadd.f32 %v6347_v27, %v2777_v48  ;;  %v2781_v62 = vadd.f32 %v6352_v56, %v6351_v44  ;;  %v6355_v53 = vld [vmem:[#allocation45_spill] sm:$0xff] }
 0x357   : > { %v3662_v38 = vpack.c.bf16 %v3638_v13, %v3636_v57  ;;  %v3639_v49 = vmax.f32 %v3607_v47, 0.0  ;;  %v3566_v8 = vadd.f32 %v3512_v7, %v3300_v1  ;;  %v3608_v50 = vadd.f32 %v6056_v58, %v3565_v30  ;;  %v6345_v1 = vld [vmem:[#allocation28_spill] sm:$0xff]  ;;  %v6348_v13 = vld [vmem:[#allocation39_spill] sm:$0xff] }
 0x358   : > { %v3514_v24 = vpop.f32.mrf.mxu1  ;;  %v3306_v59 = vadd.f32 %v3260_v60, %v3040_v41  ;;  %v2778_v45 = vadd.f32 %v6346_v14, %v6345_v1  ;;  %v3307_v47 = vadd.f32 %v3264_v31, %v6348_v13  ;;  %v3047_v41 = vadd.f32 %v6355_v53, %v2781_v62 }
 0x359   : > { %v3567_v23 = vadd.f32 %v3514_v24, %v3301_v26  ;;  %v3663_v17 = vpack.c.bf16 %v3639_v49, %v3637_v25  ;;  %v3609_v63 = vadd.f32 %v6059_v29, %v3566_v8  ;;  %v3640_v12 = vmax.f32 %v3608_v50, 0.0  ;;  %v6349_v25 = vld [vmem:[#allocation40_spill] sm:$0xff]  ;;  %v3274_v8 = vpop.f32.mrf.mxu0 }
 0x35a   : > { %v3516_v40 = vpop.f32.mrf.mxu1  ;;  %v3308_v60 = vadd.f32 %v3266_v54, %v6349_v25  ;;  %v3309_v50 = vadd.f32 %v3268_v19, %v3043_v43 }
 0x35b   : > { %v3610_v16 = vadd.f32 %v6056_v58, %v3567_v23  ;;  %v3568_v15 = vadd.f32 %v3516_v40, %v3302_v52  ;;  %3824 = vmatprep.mubr.bf16.mxu0 %v3663_v17  ;;  %v3641_v37 = vmax.f32 %v3609_v63, 0.0  ;;  %v3276_v54 = vpop.f32.mrf.mxu0 }
 0x35c   : > { %v3520_v11 = vpop.f32.mrf.mxu1  ;;  %3825 = vmatmul.mubr.bf16.gmra.mxu0 %v3662_v38  ;;  %v6350_v38 = vld [vmem:[#allocation42_spill] sm:$0xff] }
 0x35d   : > { %v3642_v46 = vmax.f32 %v3610_v16, 0.0  ;;  %v3611_v9 = vadd.f32 %v6059_v29, %v3568_v15  ;;  %v3569_v10 = vadd.f32 %v3520_v11, %v3303_v61  ;;  %v3044_v49 = vadd.f32 %v6350_v38, %v2778_v45  ;;  %v6353_v15 = vld [vmem:[#allocation30_spill] sm:$0xff]  ;;  %v6356_v11 = vld [vmem:[#allocation43_spill] sm:$0xff] }
 0x35e   : > { %v3522_v0 = vpop.f32.mrf.mxu1 }
 0x35f   : > { %v3664_v22 = vpack.c.bf16 %v3642_v46, %v3640_v12  ;;  %v3643_v18 = vmax.f32 %v3611_v9, 0.0  ;;  %v3570_v6 = vadd.f32 %v3522_v0, %v3304_v5  ;;  %v3612_v51 = vadd.f32 %v6056_v58, %v3569_v10 }
 0x360   : > { %v3524_v39 = vpop.f32.mrf.mxu1  ;;  %v3310_v28 = vadd.f32 %v3270_v2, %v3044_v49  ;;  %v2782_v5 = vadd.f32 %v6354_v4, %v6353_v15  ;;  %v3311_v12 = vadd.f32 %v3274_v8, %v6356_v11 }
 0x361   : > { %v3571_v55 = vadd.f32 %v3524_v39, %v3305_v35  ;;  %v3665_v36 = vpack.c.bf16 %v3643_v18, %v3641_v37  ;;  %v3613_v30 = vadd.f32 %v6059_v29, %v3570_v6  ;;  %v3644_v34 = vmax.f32 %v3612_v51, 0.0  ;;  %v6357_v35 = vld [vmem:[#allocation44_spill] sm:$0xff]  ;;  %v3278_v37 = vpop.f32.mrf.mxu0 }
 0x362   : > { %v3526_v57 = vpop.f32.mrf.mxu1  ;;  %v3312_v0 = vadd.f32 %v3276_v54, %v6357_v35  ;;  %v3313_v39 = vadd.f32 %v3278_v37, %v3047_v41 }
 0x363   : > { %v3614_v26 = vadd.f32 %v6056_v58, %v3571_v55  ;;  %v3572_v7 = vadd.f32 %v3526_v57, %v3306_v59  ;;  %3832 = vmatprep.mubr.bf16.mxu0 %v3665_v36  ;;  %v3645_v23 = vmax.f32 %v3613_v30, 0.0  ;;  %v3280_v14 = vpop.f32.mrf.mxu0 }
 0x364   : > { %v3530_v33 = vpop.f32.mrf.mxu1  ;;  %3833 = vmatmul.mubr.bf16.gmra.mxu0 %v3664_v22  ;;  %v6358_v22 = vld [vmem:[#allocation46_spill] sm:$0xff] }
 0x365   : > { %v3646_v21 = vmax.f32 %v3614_v26, 0.0  ;;  %v3615_v24 = vadd.f32 %v6059_v29, %v3572_v7  ;;  %v3573_v52 = vadd.f32 %v3530_v33, %v3307_v47  ;;  %v3048_v18 = vadd.f32 %v6358_v22, %v2782_v5 }
 0x366   : > { %v3532_v31 = vpop.f32.mrf.mxu1 }
 0x367   : > { %v3666_v17 = vpack.c.bf16 %v3646_v21, %v3644_v34  ;;  %v3647_v32 = vmax.f32 %v3615_v24, 0.0  ;;  %v3574_v3 = vadd.f32 %v3532_v31, %v3308_v60  ;;  %v3616_v61 = vadd.f32 %v6056_v58, %v3573_v52 }
 0x368   : > { %v3534_v40 = vpop.f32.mrf.mxu1  ;;  %v3314_v27 = vadd.f32 %v3280_v14, %v3048_v18 }
 0x369   : > { %v3575_v63 = vadd.f32 %v3534_v40, %v3309_v50  ;;  %v3667_v16 = vpack.c.bf16 %v3647_v32, %v3645_v23  ;;  %v3617_v46 = vadd.f32 %v6059_v29, %v3574_v3  ;;  %v3648_v42 = vmax.f32 %v3616_v61, 0.0 }
 0x36a   : > { %v3536_v19 = vpop.f32.mrf.mxu1 }
 0x36b   : > { %v3618_v9 = vadd.f32 %v6056_v58, %v3575_v63  ;;  %v3576_v10 = vadd.f32 %v3536_v19, %v3310_v28  ;;  %3840 = vmatprep.mubr.bf16.mxu0 %v3667_v16  ;;  %v3649_v51 = vmax.f32 %v3617_v46, 0.0 }
 0x36c   : > { %v3540_v6 = vpop.f32.mrf.mxu1  ;;  %3841 = vmatmul.mubr.bf16.gmra.mxu0 %v3666_v17 }
 0x36d   : > { %v3650_v20 = vmax.f32 %v3618_v9, 0.0  ;;  %v3619_v48 = vadd.f32 %v6059_v29, %v3576_v10  ;;  %v3577_v2 = vadd.f32 %v3540_v6, %v3311_v12 }
 0x36e   : > { %v3542_v59 = vpop.f32.mrf.mxu1 }
 0x36f   : > { %v3668_v55 = vpack.c.bf16 %v3650_v20, %v3648_v42  ;;  %v3651_v36 = vmax.f32 %v3619_v48, 0.0  ;;  %v3578_v1 = vadd.f32 %v3542_v59, %v3312_v0  ;;  %v3620_v43 = vadd.f32 %v6056_v58, %v3577_v2 }
 0x370   : > { %v3544_v45 = vpop.f32.mrf.mxu1 }
 0x371   : > { %v3579_v57 = vadd.f32 %v3544_v45, %v3313_v39  ;;  %v3669_v13 = vpack.c.bf16 %v3651_v36, %v3649_v51  ;;  %v3621_v30 = vadd.f32 %v6059_v29, %v3578_v1  ;;  %v3652_v25 = vmax.f32 %v3620_v43, 0.0 }
 0x372   : > { %v3546_v47 = vpop.f32.mrf.mxu1 }
 0x373   : > { %v3622_v26 = vadd.f32 %v6056_v58, %v3579_v57  ;;  %v3580_v7 = vadd.f32 %v3546_v47, %v3314_v27  ;;  %3848 = vmatprep.mubr.bf16.mxu0 %v3669_v13  ;;  %v3653_v49 = vmax.f32 %v3621_v30, 0.0 }
 0x374   : > { %3849 = vmatmul.mubr.bf16.gmra.mxu0 %v3668_v55 }
 0x375   : > { %v3654_v60 = vmax.f32 %v3622_v26, 0.0  ;;  %v3623_v38 = vadd.f32 %v6059_v29, %v3580_v7 }
 0x377   : > { %v3670_v8 = vpack.c.bf16 %v3654_v60, %v3652_v25  ;;  %v3655_v33 = vmax.f32 %v3623_v38, 0.0 }
 0x379   : > { %v3671_v34 = vpack.c.bf16 %v3655_v33, %v3653_v49 }
 0x37b   : > { %3856 = vmatprep.mubr.bf16.mxu0 %v3671_v34 }
 0x37c   : > { %3857 = vmatmul.mubr.bf16.gmra.mxu0 %v3670_v8 }
 0x404   : > { %v4440_v21 = vpop.f32.mrf.mxu0 }
 0x406   : > { %v4441_v24 = vpop.f32.mrf.mxu0 }
 0x407   : > { %v4442_v22 = vadd.f32 %v4441_v24, %v4440_v21 }
 0x408   : > { %v4443_v52 = vpop.f32.mrf.mxu0 }
 0x40a   : > { %v4444_v50 = vpop.f32.mrf.mxu0 }
 0x40b   : > { %v4445_v9 = vadd.f32 %v4444_v50, %v4443_v52 }
 0x40c   : > { %v4446_v31 = vpop.f32.mrf.mxu0 }
 0x40d   : > { %v3865_v20 = vadd.f32 %v4445_v9, %v4442_v22 }
 0x40e   : > { %v4447_v23 = vpop.f32.mrf.mxu0 }
 0x40f   : > { %v4448_v5 = vadd.f32 %v4447_v23, %v4446_v31  ;;  %v3866_v45 = vrot.slane %v3865_v20, 4 }
 0x410   : > { %v4449_v58 = vpop.f32.mrf.mxu0 }
 0x411   : > { %v3867_v25 = vadd.f32 %v3866_v45, %v3865_v20 }
 0x412   : > { %v4450_v17 = vpop.f32.mrf.mxu0 }
 0x413   : > { %v4451_v16 = vadd.f32 %v4450_v17, %v4449_v58  ;;  %v3868_v31 = vrot.slane %v3867_v25, 2 }
 0x414   : > { %v4452_v32 = vpop.f32.mrf.mxu0 }
 0x415   : > { %v3872_v12 = vadd.f32 %v4451_v16, %v4448_v5 }
 0x416   : > { %v4453_v3 = vpop.f32.mrf.mxu0 }
 0x417   : > { %v4454_v41 = vadd.f32 %v4453_v3, %v4452_v32  ;;  %v3873_v42 = vrot.slane %v3872_v12, 4 }
 0x418   : > { %v4455_v44 = vpop.f32.mrf.mxu0 }
 0x419   : > { %v3874_v1 = vadd.f32 %v3873_v42, %v3872_v12 }
 0x41a   : > { %v4456_v56 = vpop.f32.mrf.mxu0 }
 0x41b   : > { %v4457_v15 = vadd.f32 %v4456_v56, %v4455_v44  ;;  %v3875_v26 = vrot.slane %v3874_v1, 2 }
 0x41c   : > { %v4458_v62 = vpop.f32.mrf.mxu0 }
 0x41d   : > { %v3879_v10 = vadd.f32 %v4457_v15, %v4454_v41  ;;  %v3876_v24 = vadd.f32 %v3875_v26, %v3874_v1 }
 0x41e   : > { %v4459_v29 = vpop.f32.mrf.mxu0 }
 0x41f   : > { %v4460_v46 = vadd.f32 %v4459_v29, %v4458_v62  ;;  %v3880_v48 = vrot.slane %v3879_v10, 4  ;;  %v3877_v56 = vrot.slane %v3876_v24, 1 }
 0x420   : > { %v4461_v54 = vpop.f32.mrf.mxu0 }
 0x421   : > { %v3881_v27 = vadd.f32 %v3880_v48, %v3879_v10  ;;  %v3878_v5 = vadd.f32 %v3877_v56, %v3876_v24 }
 0x422   : > { %v4462_v40 = vpop.f32.mrf.mxu0 }
 0x423   : > { %v4463_v53 = vadd.f32 %v4462_v40, %v4461_v54  ;;  %v3882_v60 = vrot.slane %v3881_v27, 2  ;;  %v3869_v54 = vadd.f32 %v3868_v31, %v3867_v25 }
 0x424   : > { %v4464_v28 = vpop.f32.mrf.mxu0 }
 0x425   : > { %v3886_v37 = vadd.f32 %v4463_v53, %v4460_v46  ;;  %v3883_v23 = vadd.f32 %v3882_v60, %v3881_v27  ;;  %v3870_v12 = vrot.slane %v3869_v54, 1 }
 0x426   : > { %v4465_v61 = vpop.f32.mrf.mxu0 }
 0x427   : > { %v4466_v35 = vadd.f32 %v4465_v61, %v4464_v28  ;;  %v3887_v39 = vrot.slane %v3886_v37, 4  ;;  %v3884_v40 = vrot.slane %v3883_v23, 1  ;;  %v3871_v20 = vadd.f32 %v3870_v12, %v3869_v54 }
 0x428   : > { %v4467_v63 = vpop.f32.mrf.mxu0 }
 0x429   : > { %v3888_v57 = vadd.f32 %v3887_v39, %v3886_v37 }
 0x42a   : > { %v4468_v4 = vpop.f32.mrf.mxu0 }
 0x42b   : > { %v4469_v19 = vadd.f32 %v4468_v4, %v4467_v63  ;;  %v3889_v49 = vrot.slane %v3888_v57, 2 }
 0x42c   : > { %v4470_v11 = vpop.f32.mrf.mxu0 }
 0x42d   : > { %v3893_v18 = vadd.f32 %v4469_v19, %v4466_v35  ;;  %v3890_v17 = vadd.f32 %v3889_v49, %v3888_v57  ;;  %v4301_v35 = vld [vmem:[%s6232_s6] ss:$0 sm:$0xff] }
 0x42e   : > { %v4471_v0 = vpop.f32.mrf.mxu0  ;;  %v3928_v37 = vadd.f32 %v4301_v35, %v3878_v5 }
 0x42f   : > { %v4472_v59 = vadd.f32 %v4471_v0, %v4470_v11  ;;  %v3894_v55 = vrot.slane %v3893_v18, 4  ;;  %v3891_v61 = vrot.slane %v3890_v17, 1  ;;  %v3885_v11 = vadd.f32 %v3884_v40, %v3883_v23 }
 0x430   : > { %v4473_v6 = vpop.f32.mrf.mxu0 }
 0x431   : > { %v3895_v47 = vadd.f32 %v3894_v55, %v3893_v18  ;;  %v3892_v46 = vadd.f32 %v3891_v61, %v3890_v17 }
 0x432   : > { %v4474_v2 = vpop.f32.mrf.mxu0 }
 0x433   : > { %v4475_v51 = vadd.f32 %v4474_v2, %v4473_v6  ;;  %v3896_v34 = vrot.slane %v3895_v47, 2  ;;  %v3929_v6 = vadd.f32 %v4301_v35, %v3885_v11  ;;  %v3930_v48 = vadd.f32 %v4301_v35, %v3892_v46 }
 0x434   : > { %v4476_v36 = vpop.f32.mrf.mxu0 }
 0x435   : > { %v3900_v14 = vadd.f32 %v4475_v51, %v4472_v59  ;;  %v3897_v3 = vadd.f32 %v3896_v34, %v3895_v47  ;;  %v3943_v59 = vrot.slane %v3928_v37, 7  ;;  %v3949_v45 = vrot.slane %v3930_v48, 5 }
 0x436   : > { %v4477_v43 = vpop.f32.mrf.mxu0 }
 0x437   : > { %v3901_v13 = vrot.slane %v3900_v14, 4  ;;  %v4478_v8 = vadd.f32 %v4477_v43, %v4476_v36  ;;  %v3898_v4 = vrot.slane %v3897_v3, 1  ;;  %v3946_v36 = vrot.slane %v3929_v6, 6 }
 0x438   : > { %v4479_v30 = vpop.f32.mrf.mxu0 }
 0x439   : > { %v3902_v7 = vadd.f32 %v3901_v13, %v3900_v14  ;;  %v3899_v0 = vadd.f32 %v3898_v4, %v3897_v3  ;;  %v3927_v14 = vadd.f32 %v4301_v35, %v3871_v20 }
 0x43a   : > { %v4480_v38 = vpop.f32.mrf.mxu0 }
 0x43b   : > { %v4481_v33 = vadd.f32 %v4480_v38, %v4479_v30  ;;  %v3903_v52 = vrot.slane %v3902_v7, 2  ;;  %v3931_v39 = vadd.f32 %v4301_v35, %v3899_v0  ;;  %v3945_v57 = vsel %vm3944_vm2, %v3943_v59, %v3927_v14 }
 0x43c   : > { %v4482_v21 = vpop.f32.mrf.mxu0  ;;  %v3948_v30 = vsel %vm3947_vm3, %v3946_v36, %v3945_v57 }
 0x43d   : > { %v3907_v50 = vadd.f32 %v4481_v33, %v4478_v8  ;;  %v3904_v62 = vadd.f32 %v3903_v52, %v3902_v7  ;;  %v3952_v43 = vrot.slane %v3931_v39, 4  ;;  %v3951_v7 = vsel %vm3950_vm4, %v3949_v45, %v3948_v30 }
 0x43e   : > { %v4483_v58 = vpop.f32.mrf.mxu0 }
 0x43f   : > { %v3908_v32 = vrot.slane %v3907_v50, 4  ;;  %v4484_v16 = vadd.f32 %v4483_v58, %v4482_v21  ;;  %v3905_v53 = vrot.slane %v3904_v62, 1  ;;  %v3954_v60 = vsel %vm3953_vm5, %v3952_v43, %v3951_v7 }
 0x440   : > { %v4485_v44 = vpop.f32.mrf.mxu0 }
 0x441   : > { %v3909_v29 = vadd.f32 %v3908_v32, %v3907_v50  ;;  %v3906_v22 = vadd.f32 %v3905_v53, %v3904_v62 }
 0x442   : > { %v4486_v28 = vpop.f32.mrf.mxu0 }
 0x443   : > { %v3910_v63 = vrot.slane %v3909_v29, 2  ;;  %v4487_v15 = vadd.f32 %v4486_v28, %v4485_v44  ;;  %v3932_v51 = vadd.f32 %v4301_v35, %v3906_v22 }
 0x445   : > { %v3911_v41 = vadd.f32 %v3910_v63, %v3909_v29  ;;  %v3914_v19 = vadd.f32 %v4487_v15, %v4484_v16  ;;  %v3955_v13 = vrot.slane %v3932_v51, 3 }
 0x447   : > { %v3912_v9 = vrot.slane %v3911_v41, 1  ;;  %v3915_v10 = vrot.slane %v3914_v19, 4  ;;  %v3957_v49 = vsel %vm3956_vm6, %v3955_v13, %v3954_v60 }
 0x449   : > { %v3916_v18 = vadd.f32 %v3915_v10, %v3914_v19  ;;  %v3913_v42 = vadd.f32 %v3912_v9, %v3911_v41 }
 0x44b   : > { %v3917_v2 = vrot.slane %v3916_v18, 2  ;;  %v3933_v1 = vadd.f32 %v4301_v35, %v3913_v42 }
 0x44d   : > { %v3918_v55 = vadd.f32 %v3917_v2, %v3916_v18  ;;  %v3958_v26 = vrot.slane %v3933_v1, 2 }
 0x44f   : > { %v3919_v27 = vrot.slane %v3918_v55, 1  ;;  %v3960_v8 = vsel %vm3959_vm7, %v3958_v26, %v3957_v49 }
 0x451   : > { %v3920_v47 = vadd.f32 %v3919_v27, %v3918_v55 }
 0x453   : > { %v3934_v25 = vadd.f32 %v4301_v35, %v3920_v47 }
 0x455   : > { %v3961_v38 = vrot.slane %v3934_v25, 1 }
 0x457   : > { %v3963_v33 = vsel %vm3962_vm8, %v3961_v38, %v3960_v8 }
 0x458   : > { %3965 = vst [vmem:[%s341_s23] sm:$0xff] %v3963_v33 }
 0x459   : > { %5055 = shalt.err (!%p5052_p9)
}
 0x45a   : > { %s5056_s18 = scalar_lea.hbm %s6189_s29, 128  ;;  %s5060_s12 = scalar_lea.hbm %s6233_s7, 256 }
 0x45b   : > { %p5057_p1 = scmp.ne.s32.totalorder %s6189_s29, %s5056_s18  ;;  %p5061_p8 = scmp.lt.s32.totalorder %s6189_s29, %s6233_s7 }
 0x45c   : > { %p5062_p3 = scmp.lt.s32.totalorder %s5060_s12, %s5056_s18 }
 0x45d   : > { %p5058_p4 = pnand %p5057_p1, %p6359_p12 }
 0x45e   : > { %p5063_p11 = por %p5062_p3, %p5061_p8 }
 0x45f   : > { %p5059_p6 = pneg %p5058_p4 }
 0x461   : > { %p5064_p7 = pnand %p5063_p11, %p5059_p6 }
 0x463   : > { %5067 = shalt.err (!%p5064_p7)
}
 0x464   : > { %4662 = dma.vmem_to_hbm [thread:$0]  (%p6359_p12), %s3981_s16, 128, %s6189_s29, %s3967_s15  }
 0x465 PF: > { %s3992_s23 = sand.u32 1, %s5102_s24   ;;  %p6360_p13 = scmp.ne.s32.totalorder %s6244_s8, 0 }
 0x466   : > { %p6361_p0 = scmp.ge.s32.totalorder %s5114_s27, 2  ;;  %s3993_s10 = scalar_lea.sflag [#allocation6], %s3992_s23 }
 0x468   : > { %p4679_p5 = pnand %p6361_p0, %p6360_p13 }
 0x46a   : > { %p4680_p10 = pneg %p4679_p5 }
 0x46c   : > { %5097 = dma.done.wait (%p4680_p10), %s3993_s10, 128  }
 0x46d   : > { %5099 = vsyncadd (%p4680_p10), %s3993_s10, 4294967168  ;;  %p22_p2 = scmp.ge.s32.totalorder %s5242_s13, 4   ;;  %s6362_s24 = smov %s5106_s25 }
 0x46e   : > { %s6363_s25 = smov %s5110_s26  ;;  %s6364_s26 = smov %s5263_s20 }
 0x46f   : > { %s6365_s27 = smov %s5242_s13  ;;  %24 = sbr.rel (!%p22_p2) target bundleno = 9 (0x9), region = 117 }
 0x474   :  { %3998 = vsyncpa [#allocation5], 1 }
 0x475   :  { %4000 = vsyncpa [#allocation5 + $0x1], 1 }
 0x476   :  { %4001 = vsyncpa [#allocation8], 1 }
 0x477   :  { %4002 = vsyncpa [#allocation11], 1 }
 0x478   :  { %4003 = vsyncpa [#allocation6], 1 }
 0x479   :  { %4005 = vsyncpa [#allocation6 + $0x1], 1 }

</bundles_post_ra>
